<compile_context>
chip_gen: v7x
topology: tpu7x:2x2x1
jax: 0.10.0
libtpu: 0.0.40
codegen_flags: <defaults>
</compile_context>

<pallas_src>
import jax
import jax.numpy as jnp
from jax.experimental import pallas as pl
from jax.experimental.pallas import tpu as pltpu


def _se_scale_conv1x1_kernel(gate_ref, x_ref, w_ref, o_ref):
    # gate_ref: [1, C_in]         f32
    # x_ref   : [C_in, M]         f32
    # w_ref   : [C_out_blk, C_in] bf16
    # o_ref   : [C_out_blk, M]    f32
    s = jax.nn.sigmoid(gate_ref[...])                 # [1, C_in] f32 (EUP)
    # Fold the SE gate into the weight rows: (W * s) @ x == W @ (s * x).
    ws = (w_ref[...] * s).astype(jnp.bfloat16)        # sublane-broadcast mul
    o_ref[...] = jnp.dot(
        ws, x_ref[...].astype(jnp.bfloat16),
        preferred_element_type=jnp.float32,
    ).astype(o_ref.dtype)


def prepare_conv_weight(w_oihw):
    """OIHW 1x1 conv weight -> [C_out, C_in] bf16.  Do this ONCE (static weight)."""
    c_out, c_in = w_oihw.shape[0], w_oihw.shape[1]
    return w_oihw.reshape(c_out, c_in).astype(jnp.bfloat16)


def _default_cout_split():
    """2 weight chunks (megacore shard) only on dual-TC v7x; 1 step elsewhere."""
    try:
        kind = jax.devices()[0].device_kind.lower()
    except Exception:
        return 1
    return 2 if ("v7" in kind or "7x" in kind) else 1


def se_scale_conv1x1(gate_nc11, x_nchw, w2d_bf16, *, cout_split=None):
    """sigmoid(gate) * x followed by 1x1 conv (no bias). Inputs NCHW, N == 1."""
    n, c_in, h, w_sp = x_nchw.shape
    c_out = w2d_bf16.shape[0]
    assert n == 1, "module is defined for batch 1"
    assert gate_nc11.shape == (n, c_in, 1, 1)
    assert w2d_bf16.shape == (c_out, c_in)

    if cout_split is None:
        cout_split = _default_cout_split()
    assert c_out % cout_split == 0
    tco = c_out // cout_split
    assert tco % 8 == 0, "C_out tile must be sublane-aligned"

    m = h * w_sp
    x2d = x_nchw.reshape(c_in, m)        # NCHW with N=1: pure reshape, no transpose
    gate_row = gate_nc11.reshape(1, c_in)  # lane-dense row, single contiguous DMA

    bytes_accessed = (
        x2d.size * x2d.dtype.itemsize
        + w2d_bf16.size * w2d_bf16.dtype.itemsize
        + gate_row.size * gate_row.dtype.itemsize
        + c_out * m * jnp.dtype(x_nchw.dtype).itemsize
    )
    cost = pl.CostEstimate(
        flops=2 * c_out * c_in * m,
        transcendentals=c_in,
        bytes_accessed=bytes_accessed,
    )

    out2d = pl.pallas_call(
        _se_scale_conv1x1_kernel,
        out_shape=jax.ShapeDtypeStruct((c_out, m), x_nchw.dtype),
        grid=(cout_split,),
        in_specs=[
            pl.BlockSpec((1, c_in), lambda j: (0, 0)),     # gate row (fetched once)
            pl.BlockSpec((c_in, m), lambda j: (0, 0)),     # x        (fetched once)
            pl.BlockSpec((tco, c_in), lambda j: (j, 0)),   # weight chunk per step
        ],
        out_specs=pl.BlockSpec((tco, m), lambda j: (j, 0)),
        compiler_params=pltpu.CompilerParams(
            dimension_semantics=("parallel",),             # both TCs on v7x
        ),
        cost_estimate=cost,
    )(gate_row, x2d, w2d_bf16)

    return out2d.reshape(n, c_out, h, w_sp)                # already NCHW


if __name__ == "__main__":
    key = jax.random.PRNGKey(0)
    k_x, k_gate, k_w = jax.random.split(key, 3)

    N, C_IN, H, W = 1, 1824, 7, 7
    C_OUT = 304

    x580 = jax.random.normal(k_x, (N, C_IN, H, W), dtype=jnp.float32)
    x584 = jax.random.normal(k_gate, (N, C_IN, 1, 1), dtype=jnp.float32)
    # Deterministic conv weight init (Kaiming-uniform-like scale for a 1x1 conv).
    bound = 1.0 / (C_IN ** 0.5)
    w_conv = jax.random.uniform(
        k_w, (C_OUT, C_IN, 1, 1), dtype=jnp.float32, minval=-bound, maxval=bound
    )

    # Hoisted, one-time weight prep (reshape + bf16 cast) outside the hot path.
    w2d = prepare_conv_weight(w_conv)

    out = se_scale_conv1x1(x584, x580, w2d)
    out = jax.block_until_ready(out)

    # Reference check in plain JAX (f32).  bf16 weight/activation with f32
    # accumulation -> bf16-level tolerance.
    ref2d = jnp.dot(
        w_conv.reshape(C_OUT, C_IN),
        jax.nn.sigmoid(x584.reshape(C_IN, 1)) * x580.reshape(C_IN, H * W),
    )
    ref = ref2d.reshape(N, C_OUT, H, W)

    assert out.shape == (N, C_OUT, H, W)
    assert jnp.allclose(out, ref, atol=2e-2, rtol=2e-2), (
        "max abs diff = %g" % float(jnp.max(jnp.abs(out - ref)))
    )

    print("KERNEL_OK")
</pallas_src>

<mosaic_0001>
module attributes {stable_mosaic.version = 11 : i64} {
  func.func @_se_scale_conv1x1_kernel(%arg0: i32, %arg1: memref<1x1824xf32, #tpu.memory_space<vmem>>, %arg2: memref<1824x49xf32, #tpu.memory_space<vmem>>, %arg3: memref<304x1824xbf16, #tpu.memory_space<vmem>>, %arg4: memref<304x49xf32, #tpu.memory_space<vmem>>) attributes {dimension_semantics = [#tpu.dimension_semantics<parallel>], iteration_bounds = array<i64: 1>, scalar_prefetch = 0 : i64, scratch_operands = 0 : i64, tpu.core_type = #tpu.core_type<tc>, window_params = [{pipeline_mode = #tpu.pipeline_mode<synchronous>, transform_indices = @transform_0, window_bounds = array<i64: 1, 1824>}, {pipeline_mode = #tpu.pipeline_mode<synchronous>, transform_indices = @transform_1, window_bounds = array<i64: 1824, 49>}, {transform_indices = @transform_2, window_bounds = array<i64: 304, 1824>}, {transform_indices = @transform_3, window_bounds = array<i64: 304, 49>}]} {
    %c0 = arith.constant 0 : index
    %c0_0 = arith.constant 0 : index
    %0 = vector.load %arg1[%c0, %c0_0] : memref<1x1824xf32, #tpu.memory_space<vmem>>, vector<1x1824xf32>
    %1 = arith.negf %0 : vector<1x1824xf32>
    %2 = math.exp %1 : vector<1x1824xf32>
    %cst = arith.constant 1.000000e+00 : f32
    %3 = vector.broadcast %cst : f32 to vector<1x1824xf32>
    %4 = arith.addf %3, %2 : vector<1x1824xf32>
    %5 = arith.divf %3, %4 : vector<1x1824xf32>
    %c0_1 = arith.constant 0 : index
    %c0_2 = arith.constant 0 : index
    %6 = vector.load %arg3[%c0_1, %c0_2] : memref<304x1824xbf16, #tpu.memory_space<vmem>>, vector<304x1824xbf16>
    %7 = arith.extf %6 : vector<304x1824xbf16> to vector<304x1824xf32>
    %8 = vector.broadcast %5 : vector<1x1824xf32> to vector<304x1824xf32>
    %9 = arith.mulf %7, %8 : vector<304x1824xf32>
    %10 = arith.truncf %9 : vector<304x1824xf32> to vector<304x1824xbf16>
    %c0_3 = arith.constant 0 : index
    %c0_4 = arith.constant 0 : index
    %11 = vector.load %arg2[%c0_3, %c0_4] : memref<1824x49xf32, #tpu.memory_space<vmem>>, vector<1824x49xf32>
    %12 = arith.truncf %11 : vector<1824x49xf32> to vector<1824x49xbf16>
    %cst_5 = arith.constant dense<0.000000e+00> : vector<304x49xf32>
    %13 = tpu.matmul %10, %12, %cst_5 {dimension_numbers = #tpu.dot_dimension_numbers<[1], [0], [0], [1], [0, 0, 1, 1], [], []>} : vector<304x1824xbf16>, vector<1824x49xbf16>, vector<304x49xf32> -> vector<304x49xf32>
    %c0_6 = arith.constant 0 : index
    %c0_7 = arith.constant 0 : index
    %14 = vector.load %arg4[%c0_6, %c0_7] : memref<304x49xf32, #tpu.memory_space<vmem>>, vector<304x49xf32>
    tpu.vector_store %arg4[%c0_6, %c0_7], %13 {strides = array<i32>} : memref<304x49xf32, #tpu.memory_space<vmem>>, vector<304x49xf32>,
    return
  }
  func.func @transform_0(%arg0: i32) -> (i32, i32) {
    %c0_i32 = arith.constant 0 : i32
    %c0_i32_0 = arith.constant 0 : i32
    %c0_i32_1 = arith.constant 0 : i32
    return %c0_i32, %c0_i32_0 : i32, i32
  }
  func.func @transform_1(%arg0: i32) -> (i32, i32) {
    %c0_i32 = arith.constant 0 : i32
    %c0_i32_0 = arith.constant 0 : i32
    %c0_i32_1 = arith.constant 0 : i32
    return %c0_i32, %c0_i32_0 : i32, i32
  }
  func.func @transform_2(%arg0: i32) -> (i32, i32) {
    %c0_i32 = arith.constant 0 : i32
    %c0_i32_0 = arith.constant 0 : i32
    return %arg0, %c0_i32 : i32, i32
  }
  func.func @transform_3(%arg0: i32) -> (i32, i32) {
    %c0_i32 = arith.constant 0 : i32
    %c0_i32_0 = arith.constant 0 : i32
    return %arg0, %c0_i32 : i32, i32
  }
}

</mosaic_0001>

<bundles_post_ra>
// kernel: tpu_custom_call.1
= control target key start
LH: loop header
LB: loop body
LE: loop exit
PB: predicated region body
PF: predicated region fallthrough
CT: control target
= control target key end

     0   :  { %v4385_v0 = vmov 0   ;;  %vm4387_vm0 = vmmov 0   ;;  %vm2177_vm1 = vcmask 261120   ;;  %vm3715_vm2 = vcmask 400384   ;;  %s7281_s1 = inlined_call_operand.vmem [shape: f32[1824,49], index: 1, kind: input, shape index: {}]   ;;  %s7282_s0 = inlined_call_operand.vmem [shape: f32[1,1824], index: 0, kind: input, shape index: {}]   ;;  %s7283_s2 = inlined_call_operand.vmem [shape: bf16[304,1824], index: 2, kind: input, shape index: {}]   ;;  %s7284_s3 = inlined_call_operand.vmem [shape: f32[304,49], index: 3, kind: output, shape index: {}]  }
   0x1   :  { %2235 = vmatprep.subr.bf16.mxu1 %v4385_v0  ;;  %2975 = vmatprep.subr.bf16.mxu0 %v4385_v0  ;;  %v1835_v1 = vld [vmem:[%s7281_s1] sm:$0xff]  ;;  %v1836_v2 = vld [vmem:[%s7281_s1 + $0x8] sm:$0xff]  ;;  %v1837_v6 = vld [vmem:[%s7281_s1 + $0x10] sm:$0xff] }
   0x2   :  { %v1963_v3 = vld [vmem:[%s7281_s1 + $0x400] sm:$0xff]  ;;  %v2063_v4 = vpack.c.bf16 %v1836_v2, %v1835_v1  ;;  %v1964_v5 = vld [vmem:[%s7281_s1 + $0x408] sm:$0xff]  ;;  %v1838_v7 = vld [vmem:[%s7281_s1 + $0x18] sm:$0xff] }
   0x3   :  { %v2127_v8 = vpack.c.bf16 %v1964_v5, %v1963_v3  ;;  %v1965_v9 = vld [vmem:[%s7281_s1 + $0x410] sm:$0xff]  ;;  %v1966_v10 = vld [vmem:[%s7281_s1 + $0x418] sm:$0xff]  ;;  %v2064_v11 = vpack.c.bf16 %v1838_v7, %v1837_v6  ;;  %v1839_v13 = vld [vmem:[%s7281_s1 + $0x20] sm:$0xff]  ;;  %v905_v7 = vlaneseq }
   0x4   :  { %2236 = vmatpush1.bf16.msra.mxu1 %v2063_v4  ;;  %v2128_v12 = vpack.c.bf16 %v1966_v10, %v1965_v9  ;;  %v1840_v14 = vld [vmem:[%s7281_s1 + $0x28] sm:$0xff]  ;;  %v1967_v15 = vld [vmem:[%s7281_s1 + $0x420] sm:$0xff]  ;;  %v1841_v19 = vld [vmem:[%s7281_s1 + $0x30] sm:$0xff] }
   0x5   :  { %2976 = vmatpush1.bf16.msra.mxu0 %v2127_v8  ;;  %2237 = vmatprep.subr.bf16.mxu1 %v4385_v0  ;;  %v1968_v16 = vld [vmem:[%s7281_s1 + $0x428] sm:$0xff]  ;;  %v2065_v17 = vpack.c.bf16 %v1840_v14, %v1839_v13  ;;  %v1842_v20 = vld [vmem:[%s7281_s1 + $0x38] sm:$0xff]  ;;  %v1969_v21 = vld [vmem:[%s7281_s1 + $0x430] sm:$0xff] }
   0x6   :  { %2977 = vmatprep.subr.bf16.mxu0 %v4385_v0  ;;  %v2129_v18 = vpack.c.bf16 %v1968_v16, %v1967_v15  ;;  %v1970_v22 = vld [vmem:[%s7281_s1 + $0x438] sm:$0xff]  ;;  %v2066_v23 = vpack.c.bf16 %v1842_v20, %v1841_v19  ;;  %v1843_v25 = vld [vmem:[%s7281_s1 + $0x40] sm:$0xff]  ;;  %v1844_v26 = vld [vmem:[%s7281_s1 + $0x48] sm:$0xff]  ;;  %v4573_v15 = vshrl.u32 %v905_v7, 7 }
   0x7   :  { %v2130_v24 = vpack.c.bf16 %v1970_v22, %v1969_v21  ;;  %v1971_v27 = vld [vmem:[%s7281_s1 + $0x440] sm:$0xff]  ;;  %v1972_v28 = vld [vmem:[%s7281_s1 + $0x448] sm:$0xff]  ;;  %v2067_v29 = vpack.c.bf16 %v1844_v26, %v1843_v25  ;;  %v1845_v31 = vld [vmem:[%s7281_s1 + $0x50] sm:$0xff] }
   0x8   :  { %2238 = vmatpush1.bf16.msra.mxu1 %v2064_v11  ;;  %v2131_v30 = vpack.c.bf16 %v1972_v28, %v1971_v27  ;;  %v1846_v32 = vld [vmem:[%s7281_s1 + $0x58] sm:$0xff]  ;;  %v1973_v33 = vld [vmem:[%s7281_s1 + $0x450] sm:$0xff]  ;;  %v1847_v37 = vld [vmem:[%s7281_s1 + $0x60] sm:$0xff] }
   0x9   :  { %2978 = vmatpush1.bf16.msra.mxu0 %v2128_v12  ;;  %2239 = vmatprep.subr.bf16.mxu1 %v4385_v0  ;;  %v1974_v34 = vld [vmem:[%s7281_s1 + $0x458] sm:$0xff]  ;;  %v2068_v35 = vpack.c.bf16 %v1846_v32, %v1845_v31  ;;  %v1848_v38 = vld [vmem:[%s7281_s1 + $0x68] sm:$0xff]  ;;  %v1975_v39 = vld [vmem:[%s7281_s1 + $0x460] sm:$0xff] }
   0xa   :  { %2979 = vmatprep.subr.bf16.mxu0 %v4385_v0  ;;  %v2132_v36 = vpack.c.bf16 %v1974_v34, %v1973_v33  ;;  %v1976_v40 = vld [vmem:[%s7281_s1 + $0x468] sm:$0xff]  ;;  %v15_v41 = vld [vmem:[%s7282_s0] sm:$0xff]  ;;  %v2069_v44 = vpack.c.bf16 %v1848_v38, %v1847_v37  ;;  %v1849_v47 = vld [vmem:[%s7281_s1 + $0x70] sm:$0xff] }
   0xb   :  { %v3758_v42 = vmul.f32 -1.442695, %v15_v41  ;;  %v16_v43 = vld [vmem:[%s7282_s0 + $0x8] sm:$0x7f]  ;;  %v2133_v46 = vpack.c.bf16 %v1976_v40, %v1975_v39  ;;  %v1850_v48 = vld [vmem:[%s7281_s1 + $0x78] sm:$0xff]  ;;  %v1977_v49 = vld [vmem:[%s7281_s1 + $0x470] sm:$0xff] }
   0xc   :  { %2240 = vmatpush1.bf16.msra.mxu1 %v2065_v17  ;;  %v3759_v45 = vmul.f32 -1.442695, %v16_v43  ;;  %v1978_v50 = vld [vmem:[%s7281_s1 + $0x478] sm:$0xff]  ;;  %v2070_v51 = vpack.c.bf16 %v1850_v48, %v1849_v47  ;;  %v1851_v53 = vld [vmem:[%s7281_s1 + $0x80] sm:$0xff]  ;;  %v1852_v54 = vld [vmem:[%s7281_s1 + $0x88] sm:$0xff] }
   0xd   :  { %2980 = vmatpush1.bf16.msra.mxu0 %v2129_v18  ;;  %2241 = vmatprep.subr.bf16.mxu1 %v4385_v0  ;;  %4377 = vpow2.f32 %v3758_v42  ;;  %v2134_v52 = vpack.c.bf16 %v1978_v50, %v1977_v49  ;;  %v1979_v55 = vld [vmem:[%s7281_s1 + $0x480] sm:$0xff]  ;;  %v1980_v56 = vld [vmem:[%s7281_s1 + $0x488] sm:$0xff]  ;;  %v2071_v57 = vpack.c.bf16 %v1852_v54, %v1851_v53  ;;  %v1853_v59 = vld [vmem:[%s7281_s1 + $0x90] sm:$0xff] }
   0xe   :  { %2981 = vmatprep.subr.bf16.mxu0 %v4385_v0  ;;  %4379 = vpow2.f32 %v3759_v45  ;;  %v2135_v58 = vpack.c.bf16 %v1980_v56, %v1979_v55  ;;  %v1854_v60 = vld [vmem:[%s7281_s1 + $0x98] sm:$0xff]  ;;  %v1981_v61 = vld [vmem:[%s7281_s1 + $0x490] sm:$0xff]  ;;  %v1855_v5 = vld [vmem:[%s7281_s1 + $0xa0] sm:$0xff]  ;;  %v907_v45 = vsub.s32 0, %v4573_v15 }
   0xf   :  { %v1982_v62 = vld [vmem:[%s7281_s1 + $0x498] sm:$0xff]  ;;  %v2072_v2 = vpack.c.bf16 %v1854_v60, %v1853_v59  ;;  %v1856_v6 = vld [vmem:[%s7281_s1 + $0xa8] sm:$0xff]  ;;  %v1983_v9 = vld [vmem:[%s7281_s1 + $0x4a0] sm:$0xff] }
  0x10   :  { %2242 = vmatpush1.bf16.msra.mxu1 %v2066_v23  ;;  %v2136_v4 = vpack.c.bf16 %v1982_v62, %v1981_v61  ;;  %v1984_v10 = vld [vmem:[%s7281_s1 + $0x4a8] sm:$0xff]  ;;  %v2073_v11 = vpack.c.bf16 %v1856_v6, %v1855_v5  ;;  %v1857_v13 = vld [vmem:[%s7281_s1 + $0xb0] sm:$0xff]  ;;  %v1858_v14 = vld [vmem:[%s7281_s1 + $0xb8] sm:$0xff] }
  0x11   :  { %2982 = vmatpush1.bf16.msra.mxu0 %v2130_v24  ;;  %2243 = vmatprep.subr.bf16.mxu1 %v4385_v0  ;;  %v2137_v12 = vpack.c.bf16 %v1984_v10, %v1983_v9  ;;  %v1985_v16 = vld [vmem:[%s7281_s1 + $0x4b0] sm:$0xff]  ;;  %v1986_v17 = vld [vmem:[%s7281_s1 + $0x4b8] sm:$0xff]  ;;  %v2074_v18 = vpack.c.bf16 %v1858_v14, %v1857_v13  ;;  %v1859_v19 = vld [vmem:[%s7281_s1 + $0xc0] sm:$0xff]  ;;  %v911_v24 = vsub.s32 1, %v4573_v15 }
  0x12   :  { %2983 = vmatprep.subr.bf16.mxu0 %v4385_v0  ;;  %v4588_v20 = vld [vmem:[%s7283_s2] sm:$0xff]  ;;  %v2138_v22 = vpack.c.bf16 %v1986_v17, %v1985_v16  ;;  %v1860_v23 = vld [vmem:[%s7281_s1 + $0xc8] sm:$0xff]  ;;  %v1861_v37 = vld [vmem:[%s7281_s1 + $0xd0] sm:$0xff] }
  0x13   :  { %v4593_v21 = vld [vmem:[%s7283_s2 + $0x3c] sm:$0xff]  ;;  %v1988_v28 = vld [vmem:[%s7281_s1 + $0x4c8] sm:$0xff]  ;;  %v2075_v32 = vpack.c.bf16 %v1860_v23, %v1859_v19  ;;  %v1989_v40 = vld [vmem:[%s7281_s1 + $0x4d0] sm:$0xff] }
  0x14   :  { %2244 = vmatpush1.bf16.msra.mxu1 %v2067_v29  ;;  %v4603_v25 = vld [vmem:[%s7283_s2 + $0x20] sm:$0xff]  ;;  %v334_v29 = vunpack.c.h.bf16 %v4588_v20  ;;  %v1862_v38 = vld [vmem:[%s7281_s1 + $0xd8] sm:$0xff]  ;;  %v1992_v54 = vld [vmem:[%s7281_s1 + $0x4e8] sm:$0xff]  ;;  %v348_v59 = vunpack.c.l.bf16 %v4593_v21 }
  0x15   :  { %2984 = vmatpush1.bf16.msra.mxu0 %v2131_v30  ;;  %2245 = vmatprep.subr.bf16.mxu1 %v4385_v0  ;;  %v4608_v26 = vld [vmem:[%s7283_s2 + $0x5c] sm:$0xff]  ;;  %v349_v30 = vunpack.c.h.bf16 %v4593_v21  ;;  %v342_v33 = vunpack.c.h.bf16 %v4603_v25  ;;  %v4687_v62 = vld [vmem:[%s7283_s2 + $0xd4] sm:$0xff]  ;;  %v1868_v17 = vld [vmem:[%s7281_s1 + $0x108] sm:$0xff] }
  0x16   :  { %2985 = vmatprep.subr.bf16.mxu0 %v4385_v0  ;;  %v1987_v27 = vld [vmem:[%s7281_s1 + $0x4c0] sm:$0xff]  ;;  %v357_v34 = vunpack.c.h.bf16 %v4608_v26  ;;  %v1990_v41 = vld [vmem:[%s7281_s1 + $0x4d8] sm:$0xff]  ;;  %v1865_v5 = vld [vmem:[%s7281_s1 + $0xf0] sm:$0xff] }
  0x17   :  { %v4378_v63 = vpop.eup %4377  ;;  %v2140_v49 = vpack.c.bf16 %v1990_v41, %v1989_v40  ;;  %v1863_v50 = vld [vmem:[%s7281_s1 + $0xe0] sm:$0xff]  ;;  %v4667_v56 = vld [vmem:[%s7283_s2 + $0x78] sm:$0xff]  ;;  %v1993_v9 = vld [vmem:[%s7281_s1 + $0x4f0] sm:$0xff]  ;;  %v386_v41 = vunpack.c.l.bf16 %v4687_v62 }
  0x18   :  { %2246 = vmatpush1.bf16.msra.mxu1 %v2068_v35  ;;  %v4380_v1 = vpop.eup %4379  ;;  %v23_v3 = vadd.f32 1.0, %v4378_v63  ;;  %v4682_v61 = vld [vmem:[%s7283_s2 + $0x98] sm:$0xff]  ;;  %v364_v7 = vunpack.c.h.bf16 %v4667_v56  ;;  %v1867_v16 = vld [vmem:[%s7281_s1 + $0x100] sm:$0xff] }
  0x19   :  { %2986 = vmatpush1.bf16.msra.mxu0 %v2132_v36  ;;  %2247 = vmatprep.subr.bf16.mxu1 %v4385_v0  ;;  %v24_v8 = vadd.f32 1.0, %v4380_v1  ;;  %v2139_v36 = vpack.c.bf16 %v1988_v28, %v1987_v27  ;;  %v341_v1 = vunpack.c.l.bf16 %v4603_v25  ;;  %v1866_v6 = vld [vmem:[%s7281_s1 + $0xf8] sm:$0xff]  ;;  %v4731_v25 = vld [vmem:[%s7283_s2 + $0xf0] sm:$0xff]  ;;  %v2079_v27 = vpack.c.bf16 %v1868_v17, %v1867_v16  ;;  %v1996_v28 = vld [vmem:[%s7281_s1 + $0x508] sm:$0xff] }
  0x1a   :  { %2987 = vmatprep.subr.bf16.mxu0 %v4385_v0  ;;  %4381 = vrcp.f32 %v23_v3  ;;  %v1994_v10 = vld [vmem:[%s7281_s1 + $0x4f8] sm:$0xff]  ;;  %v2000_v16 = vld [vmem:[%s7281_s1 + $0x528] sm:$0xff] }
  0x1b   :  { %4383 = vrcp.f32 %v24_v8  ;;  %v2142_v21 = vpack.c.bf16 %v1994_v10, %v1993_v9  ;;  %v4810_v9 = vld [vmem:[%s7283_s2 + $0x1c4] sm:$0xff] }
  0x1c   :  { %2248 = vmatpush1.bf16.msra.mxu1 %v2069_v44 }
  0x1d   :  { %2988 = vmatpush1.bf16.msra.mxu0 %v2133_v46  ;;  %2249 = vmatprep.subr.bf16.mxu1 %v4385_v0  ;;  %v2076_v46 = vpack.c.bf16 %v1862_v38, %v1861_v37  ;;  %v371_v38 = vunpack.c.l.bf16 %v4682_v61 }
  0x1e   :  { %2989 = vmatprep.subr.bf16.mxu0 %v4385_v0 }
  0x20   :  { %2250 = vmatpush1.bf16.msra.mxu1 %v2070_v51  ;;  %v1864_v51 = vld [vmem:[%s7281_s1 + $0xe8] sm:$0xff] }
  0x21   :  { %2990 = vmatpush1.bf16.msra.mxu0 %v2134_v52  ;;  %2251 = vmatprep.subr.bf16.mxu1 %v4385_v0  ;;  %v1991_v52 = vld [vmem:[%s7281_s1 + $0x4e0] sm:$0xff]  ;;  %v2077_v63 = vpack.c.bf16 %v1864_v51, %v1863_v50 }
  0x22   :  { %2991 = vmatprep.subr.bf16.mxu0 %v4385_v0 }
  0x24   :  { %2252 = vmatpush1.bf16.msra.mxu1 %v2071_v57  ;;  %v4619_v31 = vpop.eup %4381  ;;  %v4672_v57 = vld [vmem:[%s7283_s2 + $0xb4] sm:$0xff] }
  0x25   :  { %2992 = vmatpush1.bf16.msra.mxu0 %v2135_v58  ;;  %2253 = vmatprep.subr.bf16.mxu1 %v4385_v0  ;;  %v4623_v35 = vpop.eup %4383  ;;  %v4633_v39 = vrot.slane %v4619_v31, %v911_v24  ;;  %v333_v58 = vunpack.c.l.bf16 %v4588_v20  ;;  %v4677_v60 = vrot.slane %v4619_v31, %v907_v45  ;;  %v379_v8 = vunpack.c.h.bf16 %v4672_v57 }
  0x26   :  { %2993 = vmatprep.subr.bf16.mxu0 %v4385_v0  ;;  %v4643_v42 = vrot.slane %v4623_v35, %v911_v24  ;;  %v4692_v3 = vrot.slane %v4623_v35, %v907_v45  ;;  %v378_v37 = vunpack.c.l.bf16 %v4672_v57  ;;  %v394_v45 = vunpack.c.h.bf16 %v4731_v25 }
  0x27   :  { %v981_v43 = vmul.f32 %v4633_v39, %v334_v29  ;;  %v996_v44 = vmul.f32 %v4633_v39, %v349_v30  ;;  %v980_v13 = vmul.f32 %v4677_v60, %v333_v58  ;;  %v995_v14 = vmul.f32 %v4677_v60, %v348_v59 }
  0x28   :  { %2254 = vmatpush1.bf16.msra.mxu1 %v2072_v2  ;;  %v989_v47 = vmul.f32 %v4643_v42, %v342_v33  ;;  %v1004_v48 = vmul.f32 %v4643_v42, %v357_v34  ;;  %v356_v2 = vunpack.c.l.bf16 %v4608_v26  ;;  %v988_v19 = vmul.f32 %v4692_v3, %v341_v1  ;;  %v4736_v26 = vld [vmem:[%s7283_s2 + $0x12c] sm:$0xff] }
  0x29   :  { %2994 = vmatpush1.bf16.msra.mxu0 %v2136_v4  ;;  %2255 = vmatprep.subr.bf16.mxu1 %v4385_v0  ;;  %v1551_v53 = vpack.c.bf16 %v996_v44, %v981_v43  ;;  %v2141_v4 = vpack.c.bf16 %v1992_v54, %v1991_v52  ;;  %v1011_v23 = vmul.f32 %v4633_v39, %v364_v7  ;;  %v4752_v33 = vld [vmem:[%s7283_s2 + $0x14c] sm:$0xff]  ;;  %v1870_v44 = vld [vmem:[%s7281_s1 + $0x118] sm:$0xff] }
  0x2a   :  { %2995 = vmatprep.subr.bf16.mxu0 %v4385_v0  ;;  %v1559_v55 = vpack.c.bf16 %v1004_v48, %v989_v47  ;;  %v1003_v20 = vmul.f32 %v4692_v3, %v356_v2  ;;  %v1026_v24 = vmul.f32 %v4633_v39, %v379_v8  ;;  %v1550_v34 = vpack.c.bf16 %v995_v14, %v980_v13  ;;  %v1869_v43 = vld [vmem:[%s7281_s1 + $0x110] sm:$0xff]  ;;  %v1871_v2 = vld [vmem:[%s7281_s1 + $0x120] sm:$0xff]  ;;  %v1872_v7 = vld [vmem:[%s7281_s1 + $0x128] sm:$0xff] }
  0x2b   :  { %2267 = vmatprep.mubr.bf16.mxu1 %v1551_v53  ;;  %v417_v50 = vunpack.c.h.bf16 %v4752_v33  ;;  %v1997_v52 = vld [vmem:[%s7281_s1 + $0x510] sm:$0xff]  ;;  %v1998_v53 = vld [vmem:[%s7281_s1 + $0x518] sm:$0xff]  ;;  %v2080_v57 = vpack.c.bf16 %v1870_v44, %v1869_v43  ;;  %v1033_v58 = vmul.f32 %v4692_v3, %v386_v41  ;;  %v1041_v59 = vmul.f32 %v4633_v39, %v394_v45  ;;  %v4805_v8 = vld [vmem:[%s7283_s2 + $0x188] sm:$0xff] }
  0x2c   :  { %2256 = vmatpush1.bf16.msra.mxu1 %v2073_v11  ;;  %3007 = vmatprep.mubr.bf16.mxu0 %v1559_v55  ;;  %v372_v11 = vunpack.c.h.bf16 %v4682_v61  ;;  %v1558_v40 = vpack.c.bf16 %v1003_v20, %v988_v19  ;;  %v1566_v48 = vpack.c.bf16 %v1026_v24, %v1011_v23  ;;  %v1025_v55 = vmul.f32 %v4677_v60, %v378_v37  ;;  %v1999_v14 = vld [vmem:[%s7281_s1 + $0x520] sm:$0xff] }
  0x2d   :  { %2996 = vmatpush1.bf16.msra.mxu0 %v2137_v12  ;;  %2257 = vmatprep.subr.bf16.mxu1 %v4385_v0  ;;  %v387_v12 = vunpack.c.h.bf16 %v4687_v62  ;;  %v2144_v62 = vpack.c.bf16 %v1998_v53, %v1997_v52  ;;  %v1064_v1 = vmul.f32 %v4643_v42, %v417_v50  ;;  %v416_v13 = vunpack.c.l.bf16 %v4752_v33  ;;  %v2002_v33 = vld [vmem:[%s7281_s1 + $0x538] sm:$0xff]  ;;  %v4851_v43 = vld [vmem:[%s7283_s2 + $0x1e0] sm:$0xff]  ;;  %v1876_v50 = vld [vmem:[%s7281_s1 + $0x148] sm:$0xff] }
  0x2e   :  { %2997 = vmatprep.subr.bf16.mxu0 %v4385_v0  ;;  %v1019_v29 = vmul.f32 %v4643_v42, %v372_v11  ;;  %v408_v11 = vunpack.c.l.bf16 %v4736_v26  ;;  %v432_v23 = vunpack.c.h.bf16 %v4805_v8  ;;  %v447_v24 = vunpack.c.h.bf16 %v4810_v9  ;;  %v4856_v44 = vld [vmem:[%s7283_s2 + $0x21c] sm:$0xff] }
  0x2f   :  { %v1034_v30 = vmul.f32 %v4643_v42, %v387_v12  ;;  %v4861_v45 = vld [vmem:[%s7283_s2 + $0x200] sm:$0xff]  ;;  %v431_v53 = vunpack.c.l.bf16 %v4805_v8 }
  0x30   :  { %2258 = vmatpush1.bf16.msra.mxu1 %v2074_v18  ;;  %v2078_v18 = vpack.c.bf16 %v1866_v6, %v1865_v5  ;;  %v4795_v5 = vld [vmem:[%s7283_s2 + $0x1a4] sm:$0xff]  ;;  %v393_v6 = vunpack.c.l.bf16 %v4731_v25  ;;  %v2145_v25 = vpack.c.bf16 %v2000_v16, %v1999_v14 }
  0x31   :  { %2998 = vmatpush1.bf16.msra.mxu0 %v2138_v22  ;;  %2259 = vmatprep.subr.bf16.mxu1 %v4385_v0  ;;  %v1995_v22 = vld [vmem:[%s7281_s1 + $0x500] sm:$0xff]  ;;  %v1574_v51 = vpack.c.bf16 %v1034_v30, %v1019_v29  ;;  %v439_v20 = vunpack.c.h.bf16 %v4795_v5  ;;  %v1055_v29 = vmul.f32 %v4677_v60, %v408_v11  ;;  %v438_v52 = vunpack.c.l.bf16 %v4795_v5  ;;  %v1877_v5 = vld [vmem:[%s7281_s1 + $0x150] sm:$0xff]  ;;  %v2006_v11 = vld [vmem:[%s7281_s1 + $0x558] sm:$0xff] }
  0x32   :  { %2999 = vmatprep.subr.bf16.mxu0 %v4385_v0  ;;  %v2143_v47 = vpack.c.bf16 %v1996_v28, %v1995_v22  ;;  %v2081_v22 = vpack.c.bf16 %v1872_v7, %v1871_v2  ;;  %v1040_v28 = vmul.f32 %v4677_v60, %v393_v6  ;;  %v1878_v6 = vld [vmem:[%s7281_s1 + $0x158] sm:$0xff] }
  0x33   :  { %v1086_v37 = vmul.f32 %v4633_v39, %v439_v20  ;;  %v1085_v8 = vmul.f32 %v4677_v60, %v438_v52  ;;  %v4925_v20 = vld [vmem:[%s7283_s2 + $0x278] sm:$0xff] }
  0x34   :  { %2260 = vmatpush1.bf16.msra.mxu1 %v2075_v32  ;;  %v4747_v32 = vld [vmem:[%s7283_s2 + $0x110] sm:$0xff]  ;;  %v2010_v52 = vld [vmem:[%s7281_s1 + $0x578] sm:$0xff] }
  0x35   :  { %3000 = vmatpush1.bf16.msra.mxu0 %v2139_v36  ;;  %2261 = vmatprep.subr.bf16.mxu1 %v4385_v0  ;;  %v363_v36 = vunpack.c.l.bf16 %v4667_v56  ;;  %v1018_v56 = vmul.f32 %v4692_v3, %v371_v38  ;;  %v401_v12 = vunpack.c.l.bf16 %v4747_v32  ;;  %v1079_v38 = vmul.f32 %v4643_v42, %v432_v23  ;;  %v4931_v23 = vld [vmem:[%s7283_s2 + $0x2b4] sm:$0xff] }
  0x36   :  { %3001 = vmatprep.subr.bf16.mxu0 %v4385_v0 }
  0x37   :  { %v1010_v54 = vmul.f32 %v4677_v60, %v363_v36  ;;  %v1573_v17 = vpack.c.bf16 %v1033_v58, %v1018_v56  ;;  %v1048_v30 = vmul.f32 %v4692_v3, %v401_v12  ;;  %v2004_v56 = vld [vmem:[%s7281_s1 + $0x548] sm:$0xff] }
  0x38   :  { %2262 = vmatpush1.bf16.msra.mxu1 %v2076_v46  ;;  %v409_v46 = vunpack.c.h.bf16 %v4736_v26  ;;  %v1873_v26 = vld [vmem:[%s7281_s1 + $0x130] sm:$0xff] }
  0x39   :  { %3002 = vmatpush1.bf16.msra.mxu0 %v2140_v49  ;;  %2263 = vmatprep.subr.bf16.mxu1 %v4385_v0  ;;  %v402_v49 = vunpack.c.h.bf16 %v4747_v32  ;;  %v1565_v10 = vpack.c.bf16 %v1025_v55, %v1010_v54  ;;  %v2001_v32 = vld [vmem:[%s7281_s1 + $0x530] sm:$0xff]  ;;  %v446_v54 = vunpack.c.l.bf16 %v4810_v9  ;;  %v2003_v55 = vld [vmem:[%s7281_s1 + $0x540] sm:$0xff]  ;;  %v1078_v9 = vmul.f32 %v4692_v3, %v431_v53 }
  0x3a   :  { %3003 = vmatprep.subr.bf16.mxu0 %v4385_v0  ;;  %v1056_v61 = vmul.f32 %v4633_v39, %v409_v46 }
  0x3b   :  { %v1093_v12 = vmul.f32 %v4692_v3, %v446_v54 }
  0x3c   :  { %2264 = vmatpush1.bf16.msra.mxu1 %v2077_v63  ;;  %v1049_v63 = vmul.f32 %v4643_v42, %v402_v49  ;;  %v1875_v49 = vld [vmem:[%s7281_s1 + $0x140] sm:$0xff] }
  0x3d   :  { %3004 = vmatpush1.bf16.msra.mxu0 %v2141_v4  ;;  %2265 = vmatprep.subr.bf16.mxu1 %v4385_v0  ;;  %v4790_v4 = vld [vmem:[%s7283_s2 + $0x168] sm:$0xff]  ;;  %v2083_v2 = vpack.c.bf16 %v1876_v50, %v1875_v49 }
  0x3e   :  { %3005 = vmatprep.subr.bf16.mxu0 %v4385_v0  ;;  %v424_v19 = vunpack.c.h.bf16 %v4790_v4  ;;  %v423_v46 = vunpack.c.l.bf16 %v4790_v4  ;;  %v2147_v4 = vpack.c.bf16 %v2004_v56, %v2003_v55 }
  0x40   :  { %2266 = vmatpush1.bf16.msra.mxu1 %v2078_v18  ;;  %v1581_v18 = vpack.c.bf16 %v1056_v61, %v1041_v59  ;;  %v1071_v36 = vmul.f32 %v4633_v39, %v424_v19  ;;  %v454_v59 = vunpack.c.h.bf16 %v4851_v43  ;;  %v469_v61 = vunpack.c.h.bf16 %v4856_v44  ;;  %v4920_v19 = vld [vmem:[%s7283_s2 + $0x294] sm:$0xff] }
  0x41   :  { %3006 = vmatpush1.bf16.msra.mxu0 %v2142_v21  ;;  %2420 = vmatprep.subr.bf16.mxu1 %v4385_v0  ;;  %v1589_v21 = vpack.c.bf16 %v1064_v1, %v1049_v63  ;;  %v462_v63 = vunpack.c.h.bf16 %v4861_v45  ;;  %v1070_v7 = vmul.f32 %v4677_v60, %v423_v46  ;;  %v1881_v46 = vld [vmem:[%s7281_s1 + $0x170] sm:$0xff] }
  0x42   :  { %3160 = vmatprep.subr.bf16.mxu0 %v4385_v0  ;;  %v1596_v58 = vpack.c.bf16 %v1086_v37, %v1071_v36  ;;  %v1116_v14 = vmul.f32 %v4633_v39, %v469_v61  ;;  %v4989_v61 = vld [vmem:[%s7283_s2 + $0x2f0] sm:$0xff] }
  0x43   :  { %2268 = vmatmul.mubr.bf16.vlgmr.msra.gmra.mrb[0].mxu1 %v1550_v34  ;;  %v1063_v34 = vmul.f32 %v4692_v3, %v416_v13  ;;  %v1101_v13 = vmul.f32 %v4633_v39, %v454_v59  ;;  %v1109_v16 = vmul.f32 %v4643_v42, %v462_v63  ;;  %v4984_v59 = vld [vmem:[%s7283_s2 + $0x30c] sm:$0xff] }
  0x44   :  { %3008 = vmatmul.mubr.bf16.vlgmr.msra.gmra.mrb[0].mxu0 %v1558_v40  ;;  %2421 = vmatpush1.bf16.msra.mxu1 %v2079_v27  ;;  %v1874_v27 = vld [vmem:[%s7281_s1 + $0x138] sm:$0xff]  ;;  %v1094_v40 = vmul.f32 %v4643_v42, %v447_v24 }
  0x45   :  { %3161 = vmatpush1.bf16.msra.mxu0 %v2143_v47  ;;  %2275 = vmatprep.mubr.bf16.mxu1 %v1566_v48  ;;  %v2082_v41 = vpack.c.bf16 %v1874_v27, %v1873_v26  ;;  %v2146_v47 = vpack.c.bf16 %v2002_v33, %v2001_v32  ;;  %v4868_v48 = vld [vmem:[%s7283_s2 + $0x23c] sm:$0xff]  ;;  %v1880_v26 = vld [vmem:[%s7281_s1 + $0x168] sm:$0xff]  ;;  %v1595_v27 = vpack.c.bf16 %v1085_v8, %v1070_v7  ;;  %v498_v7 = vunpack.c.l.bf16 %v4920_v19 }
  0x46   :  { %3015 = vmatprep.mubr.bf16.mxu0 %v1574_v51  ;;  %2422 = vmatprep.subr.bf16.mxu1 %v4385_v0  ;;  %v1580_v51 = vpack.c.bf16 %v1055_v29, %v1040_v28  ;;  %v477_v1 = vunpack.c.h.bf16 %v4868_v48  ;;  %v468_v28 = vunpack.c.l.bf16 %v4856_v44  ;;  %v461_v29 = vunpack.c.l.bf16 %v4861_v45  ;;  %v2007_v32 = vld [vmem:[%s7281_s1 + $0x560] sm:$0xff]  ;;  %v2008_v33 = vld [vmem:[%s7281_s1 + $0x568] sm:$0xff] }
  0x47   :  { %3162 = vmatprep.subr.bf16.mxu0 %v4385_v0  ;;  %v1611_v36 = vpack.c.bf16 %v1116_v14, %v1101_v13  ;;  %v2149_v45 = vpack.c.bf16 %v2008_v33, %v2007_v32  ;;  %v491_v8 = vunpack.c.l.bf16 %v4925_v20 }
  0x48   :  { %2423 = vmatpush1.bf16.msra.mxu1 %v2080_v57  ;;  %v1588_v57 = vpack.c.bf16 %v1063_v34, %v1048_v30  ;;  %v476_v30 = vunpack.c.l.bf16 %v4868_v48  ;;  %v1603_v34 = vpack.c.bf16 %v1093_v12, %v1078_v9  ;;  %v1115_v49 = vmul.f32 %v4677_v60, %v468_v28  ;;  %v2014_v28 = vld [vmem:[%s7281_s1 + $0x598] sm:$0xff] }
  0x49   :  { %3163 = vmatpush1.bf16.msra.mxu0 %v2144_v62  ;;  %2424 = vmatprep.subr.bf16.mxu1 %v4385_v0  ;;  %v1604_v62 = vpack.c.bf16 %v1094_v40, %v1079_v38  ;;  %v499_v38 = vunpack.c.h.bf16 %v4920_v19  ;;  %v1108_v50 = vmul.f32 %v4692_v3, %v461_v29  ;;  %v506_v9 = vunpack.c.l.bf16 %v4931_v23 }
  0x4a   :  { %3164 = vmatprep.subr.bf16.mxu0 %v4385_v0  ;;  %v1123_v53 = vmul.f32 %v4692_v3, %v476_v30 }
  0x4b   :  { %2276 = vmatmul.mubr.bf16.gmra.mrb[4].mxu1 %v1565_v10  ;;  %v2005_v10 = vld [vmem:[%s7281_s1 + $0x550] sm:$0xff]  ;;  %v1146_v55 = vmul.f32 %v4633_v39, %v499_v38  ;;  %v1153_v29 = vmul.f32 %v4692_v3, %v506_v9  ;;  %v5053_v38 = vld [vmem:[%s7283_s2 + $0x368] sm:$0xff] }
  0x4c   :  { %3016 = vmatmul.mubr.bf16.gmra.mrb[4].mxu0 %v1573_v17  ;;  %2283 = vmatprep.mubr.bf16.mxu1 %v1581_v18  ;;  %v1124_v17 = vmul.f32 %v4643_v42, %v477_v1  ;;  %v4915_v18 = vld [vmem:[%s7283_s2 + $0x258] sm:$0xff]  ;;  %v2148_v24 = vpack.c.bf16 %v2006_v11, %v2005_v10  ;;  %v4995_v1 = vld [vmem:[%s7283_s2 + $0x32c] sm:$0xff]  ;;  %v2011_v10 = vld [vmem:[%s7281_s1 + $0x580] sm:$0xff]  ;;  %v1618_v12 = vpack.c.bf16 %v1123_v53, %v1108_v50 }
  0x4d   :  { %3023 = vmatprep.mubr.bf16.mxu0 %v1589_v21  ;;  %2425 = vmatpush1.bf16.msra.mxu1 %v2081_v22  ;;  %v2084_v21 = vpack.c.bf16 %v1878_v6, %v1877_v5  ;;  %v453_v22 = vunpack.c.l.bf16 %v4851_v43  ;;  %v484_v37 = vunpack.c.h.bf16 %v4915_v18  ;;  %v507_v43 = vunpack.c.h.bf16 %v4931_v23  ;;  %v1884_v5 = vld [vmem:[%s7281_s1 + $0x188] sm:$0xff]  ;;  %v1886_v23 = vld [vmem:[%s7281_s1 + $0x198] sm:$0xff] }
  0x4e   :  { %3165 = vmatpush1.bf16.msra.mxu0 %v2145_v25  ;;  %2426 = vmatprep.subr.bf16.mxu1 %v4385_v0  ;;  %v1879_v25 = vld [vmem:[%s7281_s1 + $0x160] sm:$0xff]  ;;  %v1619_v40 = vpack.c.bf16 %v1124_v17, %v1109_v16  ;;  %v483_v63 = vunpack.c.l.bf16 %v4915_v18  ;;  %v2012_v11 = vld [vmem:[%s7281_s1 + $0x588] sm:$0xff]  ;;  %v529_v16 = vunpack.c.h.bf16 %v4984_v59  ;;  %v522_v18 = vunpack.c.h.bf16 %v4989_v61 }
  0x4f   :  { %3166 = vmatprep.subr.bf16.mxu0 %v4385_v0  ;;  %v2085_v44 = vpack.c.bf16 %v1880_v26, %v1879_v25  ;;  %v1100_v48 = vmul.f32 %v4677_v60, %v453_v22  ;;  %v1131_v54 = vmul.f32 %v4633_v39, %v484_v37  ;;  %v537_v19 = vunpack.c.h.bf16 %v4995_v1  ;;  %v1885_v22 = vld [vmem:[%s7281_s1 + $0x190] sm:$0xff]  ;;  %v5048_v37 = vld [vmem:[%s7283_s2 + $0x384] sm:$0xff] }
  0x50   :  { %v1145_v25 = vmul.f32 %v4677_v60, %v498_v7  ;;  %v1138_v26 = vmul.f32 %v4692_v3, %v491_v8  ;;  %v1176_v32 = vmul.f32 %v4633_v39, %v529_v16  ;;  %v1169_v33 = vmul.f32 %v4643_v42, %v522_v18  ;;  %v2018_v7 = vld [vmem:[%s7281_s1 + $0x5b8] sm:$0xff]  ;;  %v5117_v16 = vld [vmem:[%s7283_s2 + $0x3e0] sm:$0xff] }
  0x51   :  { %2427 = vmatpush1.bf16.msra.mxu1 %v2082_v41  ;;  %v492_v41 = vunpack.c.h.bf16 %v4925_v20  ;;  %v1610_v6 = vpack.c.bf16 %v1115_v49, %v1100_v48  ;;  %v1626_v13 = vpack.c.bf16 %v1146_v55, %v1131_v54  ;;  %v528_v48 = vunpack.c.l.bf16 %v4984_v59 }
  0x52   :  { %3167 = vmatpush1.bf16.msra.mxu0 %v2146_v47  ;;  %2428 = vmatprep.subr.bf16.mxu1 %v4385_v0  ;;  %v1882_v47 = vld [vmem:[%s7281_s1 + $0x178] sm:$0xff]  ;;  %v521_v49 = vunpack.c.l.bf16 %v4989_v61  ;;  %v536_v50 = vunpack.c.l.bf16 %v4995_v1  ;;  %v1633_v53 = vpack.c.bf16 %v1153_v29, %v1138_v26 }
  0x53   :  { %2284 = vmatmul.mubr.bf16.gmra.mrb[8].mxu1 %v1580_v51  ;;  %3168 = vmatprep.subr.bf16.mxu0 %v4385_v0  ;;  %v2009_v51 = vld [vmem:[%s7281_s1 + $0x570] sm:$0xff]  ;;  %v1139_v56 = vmul.f32 %v4643_v42, %v492_v41  ;;  %v1890_v1 = vld [vmem:[%s7281_s1 + $0x1b8] sm:$0xff] }
  0x54   :  { %3024 = vmatmul.mubr.bf16.gmra.mrb[8].mxu0 %v1588_v57  ;;  %2291 = vmatprep.mubr.bf16.mxu1 %v1596_v58  ;;  %v1154_v57 = vmul.f32 %v4643_v42, %v507_v43  ;;  %v4979_v58 = vld [vmem:[%s7283_s2 + $0x2d0] sm:$0xff]  ;;  %v5059_v43 = vld [vmem:[%s7283_s2 + $0x3a4] sm:$0xff]  ;;  %v1183_v8 = vmul.f32 %v4692_v3, %v536_v50 }
  0x55   :  { %3031 = vmatprep.mubr.bf16.mxu0 %v1604_v62  ;;  %2429 = vmatpush1.bf16.msra.mxu1 %v2083_v2  ;;  %v2086_v62 = vpack.c.bf16 %v1882_v47, %v1881_v46  ;;  %v2150_v2 = vpack.c.bf16 %v2010_v52, %v2009_v51  ;;  %v514_v14 = vunpack.c.h.bf16 %v4979_v58  ;;  %v513_v41 = vunpack.c.l.bf16 %v4979_v58  ;;  %v1888_v46 = vld [vmem:[%s7281_s1 + $0x1a8] sm:$0xff]  ;;  %v2015_v51 = vld [vmem:[%s7281_s1 + $0x5a0] sm:$0xff] }
  0x56   :  { %3169 = vmatpush1.bf16.msra.mxu0 %v2147_v4  ;;  %2430 = vmatprep.subr.bf16.mxu1 %v4385_v0  ;;  %v1883_v4 = vld [vmem:[%s7281_s1 + $0x180] sm:$0xff]  ;;  %v1634_v17 = vpack.c.bf16 %v1154_v57, %v1139_v56  ;;  %v2016_v52 = vld [vmem:[%s7281_s1 + $0x5a8] sm:$0xff]  ;;  %v559_v56 = vunpack.c.h.bf16 %v5048_v37  ;;  %v552_v58 = vunpack.c.h.bf16 %v5053_v38  ;;  %v567_v59 = vunpack.c.h.bf16 %v5059_v43 }
  0x57   :  { %3170 = vmatprep.subr.bf16.mxu0 %v4385_v0  ;;  %v2087_v20 = vpack.c.bf16 %v1884_v5, %v1883_v4  ;;  %v1161_v30 = vmul.f32 %v4633_v39, %v514_v14  ;;  %v1175_v4 = vmul.f32 %v4677_v60, %v528_v48  ;;  %v1168_v5 = vmul.f32 %v4692_v3, %v521_v49  ;;  %v5112_v14 = vld [vmem:[%s7283_s2 + $0x3fc] sm:$0xff] }
  0x58   :  { %v566_v26 = vunpack.c.l.bf16 %v5059_v43  ;;  %v1894_v43 = vld [vmem:[%s7281_s1 + $0x1d8] sm:$0xff] }
  0x59   :  { %2431 = vmatpush1.bf16.msra.mxu1 %v2084_v21  ;;  %v2151_v21 = vpack.c.bf16 %v2012_v11, %v2011_v10  ;;  %v1641_v54 = vpack.c.bf16 %v1176_v32, %v1161_v30  ;;  %v1206_v10 = vmul.f32 %v4633_v39, %v559_v56  ;;  %v1199_v11 = vmul.f32 %v4643_v42, %v552_v58  ;;  %v2022_v48 = vld [vmem:[%s7281_s1 + $0x5d8] sm:$0xff] }
  0x5a   :  { %3171 = vmatpush1.bf16.msra.mxu0 %v2148_v24  ;;  %2432 = vmatprep.subr.bf16.mxu1 %v4385_v0  ;;  %v1130_v24 = vmul.f32 %v4677_v60, %v483_v63  ;;  %v1889_v63 = vld [vmem:[%s7281_s1 + $0x1b0] sm:$0xff]  ;;  %v1648_v29 = vpack.c.bf16 %v1183_v8, %v1168_v5  ;;  %v1213_v49 = vmul.f32 %v4692_v3, %v566_v26  ;;  %v5181_v56 = vld [vmem:[%s7283_s2 + $0x458] sm:$0xff] }
  0x5b   :  { %2292 = vmatmul.mubr.bf16.gmra.mrb[12].mxu1 %v1595_v27  ;;  %3172 = vmatprep.subr.bf16.mxu0 %v4385_v0  ;;  %v2013_v27 = vld [vmem:[%s7281_s1 + $0x590] sm:$0xff] }
  0x5c   :  { %3032 = vmatmul.mubr.bf16.gmra.mrb[12].mxu0 %v1603_v34  ;;  %2299 = vmatprep.mubr.bf16.mxu1 %v1611_v36  ;;  %v1184_v34 = vmul.f32 %v4643_v42, %v537_v19  ;;  %v5043_v36 = vld [vmem:[%s7283_s2 + $0x348] sm:$0xff]  ;;  %v1625_v47 = vpack.c.bf16 %v1145_v25, %v1130_v24  ;;  %v5123_v19 = vld [vmem:[%s7283_s2 + $0x41c] sm:$0xff]  ;;  %v558_v24 = vunpack.c.l.bf16 %v5048_v37  ;;  %v551_v25 = vunpack.c.l.bf16 %v5053_v38  ;;  %v189_v26 = vld [vmem:[%s7283_s2 + $0x4b0] sm:$0xff] }
  0x5d   :  { %3039 = vmatprep.mubr.bf16.mxu0 %v1619_v40  ;;  %2433 = vmatpush1.bf16.msra.mxu1 %v2085_v44  ;;  %v2088_v40 = vpack.c.bf16 %v1886_v23, %v1885_v22  ;;  %v2152_v44 = vpack.c.bf16 %v2014_v28, %v2013_v27  ;;  %v544_v55 = vunpack.c.h.bf16 %v5043_v36  ;;  %v543_v18 = vunpack.c.l.bf16 %v5043_v36  ;;  %v1892_v22 = vld [vmem:[%s7281_s1 + $0x1c8] sm:$0xff]  ;;  %v2019_v27 = vld [vmem:[%s7281_s1 + $0x5c0] sm:$0xff] }
  0x5e   :  { %3173 = vmatpush1.bf16.msra.mxu0 %v2149_v45  ;;  %2434 = vmatprep.subr.bf16.mxu1 %v4385_v0  ;;  %v1887_v45 = vld [vmem:[%s7281_s1 + $0x1a0] sm:$0xff]  ;;  %v1649_v57 = vpack.c.bf16 %v1184_v34, %v1169_v33  ;;  %v2020_v28 = vld [vmem:[%s7281_s1 + $0x5c8] sm:$0xff]  ;;  %v589_v33 = vunpack.c.h.bf16 %v5112_v14  ;;  %v582_v36 = vunpack.c.h.bf16 %v5117_v16  ;;  %v597_v37 = vunpack.c.h.bf16 %v5123_v19 }
  0x5f   :  { %3174 = vmatprep.subr.bf16.mxu0 %v4385_v0  ;;  %v2089_v61 = vpack.c.bf16 %v1888_v46, %v1887_v45  ;;  %v1191_v9 = vmul.f32 %v4633_v39, %v544_v55  ;;  %v1205_v45 = vmul.f32 %v4677_v60, %v558_v24  ;;  %v1198_v46 = vmul.f32 %v4692_v3, %v551_v25  ;;  %v5176_v55 = vld [vmem:[%s7283_s2 + $0x474] sm:$0xff] }
  0x60   :  { %v596_v5 = vunpack.c.l.bf16 %v5123_v19 }
  0x61   :  { %2435 = vmatpush1.bf16.msra.mxu1 %v2086_v62  ;;  %v2153_v62 = vpack.c.bf16 %v2016_v52, %v2015_v51  ;;  %v1656_v30 = vpack.c.bf16 %v1206_v10, %v1191_v9  ;;  %v1236_v51 = vmul.f32 %v4633_v39, %v589_v33  ;;  %v1229_v52 = vmul.f32 %v4643_v42, %v582_v36  ;;  %v193_v36 = vld [vmem:[%s7283_s2 + $0x4d0] sm:$0xff] }
  0x62   :  { %3175 = vmatpush1.bf16.msra.mxu0 %v2150_v2  ;;  %2436 = vmatprep.subr.bf16.mxu1 %v4385_v0  ;;  %v1160_v2 = vmul.f32 %v4677_v60, %v513_v41  ;;  %v1893_v41 = vld [vmem:[%s7281_s1 + $0x1d0] sm:$0xff]  ;;  %v1663_v8 = vpack.c.bf16 %v1213_v49, %v1198_v46 }
  0x63   :  { %2300 = vmatmul.mubr.bf16.gmra.mrb[16].mxu1 %v1610_v6  ;;  %3176 = vmatprep.subr.bf16.mxu0 %v4385_v0  ;;  %v2017_v6 = vld [vmem:[%s7281_s1 + $0x5b0] sm:$0xff] }
  0x64   :  { %3040 = vmatmul.mubr.bf16.gmra.mrb[16].mxu0 %v1618_v12  ;;  %2307 = vmatprep.mubr.bf16.mxu1 %v1626_v13  ;;  %v1214_v12 = vmul.f32 %v4643_v42, %v567_v59  ;;  %v5107_v13 = vld [vmem:[%s7283_s2 + $0x3c0] sm:$0xff]  ;;  %v1640_v23 = vpack.c.bf16 %v1175_v4, %v1160_v2  ;;  %v5187_v59 = vld [vmem:[%s7283_s2 + $0x494] sm:$0xff]  ;;  %v588_v2 = vunpack.c.l.bf16 %v5112_v14  ;;  %v581_v4 = vunpack.c.l.bf16 %v5117_v16 }
  0x65   :  { %3047 = vmatprep.mubr.bf16.mxu0 %v1634_v17  ;;  %2437 = vmatpush1.bf16.msra.mxu1 %v2087_v20  ;;  %v2090_v17 = vpack.c.bf16 %v1890_v1, %v1889_v63  ;;  %v2154_v20 = vpack.c.bf16 %v2018_v7, %v2017_v6  ;;  %v574_v32 = vunpack.c.h.bf16 %v5107_v13  ;;  %v573_v58 = vunpack.c.l.bf16 %v5107_v13  ;;  %v1896_v63 = vld [vmem:[%s7281_s1 + $0x1e8] sm:$0xff]  ;;  %v2023_v6 = vld [vmem:[%s7281_s1 + $0x5e0] sm:$0xff] }
  0x66   :  { %3177 = vmatpush1.bf16.msra.mxu0 %v2151_v21  ;;  %2438 = vmatprep.subr.bf16.mxu1 %v4385_v0  ;;  %v1891_v21 = vld [vmem:[%s7281_s1 + $0x1c0] sm:$0xff]  ;;  %v1664_v34 = vpack.c.bf16 %v1214_v12, %v1199_v11  ;;  %v2024_v7 = vld [vmem:[%s7281_s1 + $0x5e8] sm:$0xff]  ;;  %v619_v11 = vunpack.c.h.bf16 %v5176_v55  ;;  %v612_v13 = vunpack.c.h.bf16 %v5181_v56  ;;  %v627_v14 = vunpack.c.h.bf16 %v5187_v59 }
  0x67   :  { %3178 = vmatprep.subr.bf16.mxu0 %v4385_v0  ;;  %v2091_v38 = vpack.c.bf16 %v1892_v22, %v1891_v21  ;;  %v1221_v50 = vmul.f32 %v4633_v39, %v574_v32  ;;  %v1235_v19 = vmul.f32 %v4677_v60, %v588_v2  ;;  %v1897_v21 = vld [vmem:[%s7281_s1 + $0x1f0] sm:$0xff]  ;;  %v1898_v22 = vld [vmem:[%s7281_s1 + $0x1f8] sm:$0xff]  ;;  %v217_v2 = vld [vmem:[%s7283_s2 + $0x584] sm:$0xff] }
  0x68   :  { %v1266_v25 = vmul.f32 %v4633_v39, %v619_v11  ;;  %v2026_v32 = vld [vmem:[%s7281_s1 + $0x5f8] sm:$0xff] }
  0x69   :  { %2439 = vmatpush1.bf16.msra.mxu1 %v2088_v40  ;;  %v2155_v40 = vpack.c.bf16 %v2020_v28, %v2019_v27  ;;  %v1671_v9 = vpack.c.bf16 %v1236_v51, %v1221_v50  ;;  %v1259_v27 = vmul.f32 %v4643_v42, %v612_v13  ;;  %v1274_v28 = vmul.f32 %v4643_v42, %v627_v14 }
  0x6a   :  { %3179 = vmatpush1.bf16.msra.mxu0 %v2152_v44  ;;  %2440 = vmatprep.subr.bf16.mxu1 %v4385_v0  ;;  %v1190_v44 = vmul.f32 %v4677_v60, %v543_v18  ;;  %v1220_v18 = vmul.f32 %v4677_v60, %v573_v58  ;;  %v642_v50 = vunpack.c.h.bf16 %v193_v36  ;;  %v687_v14 = vunpack.c.h.bf16 %v217_v2 }
  0x6b   :  { %2308 = vmatmul.mubr.bf16.gmra.mrb[20].mxu1 %v1625_v47  ;;  %3180 = vmatprep.subr.bf16.mxu0 %v4385_v0  ;;  %v2021_v47 = vld [vmem:[%s7281_s1 + $0x5d0] sm:$0xff]  ;;  %v1694_v49 = vpack.c.bf16 %v1274_v28, %v1259_v27  ;;  %v225_v28 = vld [vmem:[%s7283_s2 + $0x5c0] sm:$0xff] }
  0x6c   :  { %3048 = vmatmul.mubr.bf16.gmra.mrb[20].mxu0 %v1633_v53  ;;  %2315 = vmatprep.mubr.bf16.mxu1 %v1641_v54  ;;  %v1244_v53 = vmul.f32 %v4643_v42, %v597_v37  ;;  %v5171_v54 = vld [vmem:[%s7283_s2 + $0x438] sm:$0xff]  ;;  %v1655_v1 = vpack.c.bf16 %v1205_v45, %v1190_v44  ;;  %v201_v37 = vld [vmem:[%s7283_s2 + $0x50c] sm:$0xff]  ;;  %v634_v44 = vunpack.c.h.bf16 %v189_v26  ;;  %v1289_v58 = vmul.f32 %v4643_v42, %v642_v50 }
  0x6d   :  { %3055 = vmatprep.mubr.bf16.mxu0 %v1649_v57  ;;  %2441 = vmatpush1.bf16.msra.mxu1 %v2089_v61  ;;  %v2092_v57 = vpack.c.bf16 %v1894_v43, %v1893_v41  ;;  %v2156_v61 = vpack.c.bf16 %v2022_v48, %v2021_v47  ;;  %v604_v10 = vunpack.c.h.bf16 %v5171_v54  ;;  %v603_v33 = vunpack.c.l.bf16 %v5171_v54 }
  0x6e   :  { %3181 = vmatpush1.bf16.msra.mxu0 %v2153_v62  ;;  %2442 = vmatprep.subr.bf16.mxu1 %v4385_v0  ;;  %v1895_v62 = vld [vmem:[%s7281_s1 + $0x1e0] sm:$0xff]  ;;  %v1679_v12 = vpack.c.bf16 %v1244_v53, %v1229_v52  ;;  %v611_v41 = vunpack.c.l.bf16 %v5181_v56  ;;  %v626_v43 = vunpack.c.l.bf16 %v5187_v59  ;;  %v657_v51 = vunpack.c.h.bf16 %v201_v37 }
  0x6f   :  { %3182 = vmatprep.subr.bf16.mxu0 %v4385_v0  ;;  %v2093_v16 = vpack.c.bf16 %v1896_v63, %v1895_v62  ;;  %v1251_v24 = vmul.f32 %v4633_v39, %v604_v10  ;;  %v1250_v52 = vmul.f32 %v4677_v60, %v603_v33  ;;  %v1281_v56 = vmul.f32 %v4633_v39, %v634_v44  ;;  %v213_v62 = vld [vmem:[%s7283_s2 + $0x564] sm:$0xff] }
  0x70   :  { %v1258_v54 = vmul.f32 %v4692_v3, %v611_v41  ;;  %v1304_v59 = vmul.f32 %v4643_v42, %v657_v51  ;;  %v633_v63 = vunpack.c.l.bf16 %v189_v26  ;;  %v679_v11 = vunpack.c.h.bf16 %v213_v62 }
  0x71   :  { %2443 = vmatpush1.bf16.msra.mxu1 %v2090_v17  ;;  %v2157_v17 = vpack.c.bf16 %v2024_v7, %v2023_v6  ;;  %v1686_v46 = vpack.c.bf16 %v1266_v25, %v1251_v24  ;;  %v641_v6 = vunpack.c.l.bf16 %v193_v36  ;;  %v656_v7 = vunpack.c.l.bf16 %v201_v37  ;;  %v221_v24 = vld [vmem:[%s7283_s2 + $0x5a0] sm:$0xff] }
  0x72   :  { %3183 = vmatpush1.bf16.msra.mxu0 %v2154_v20  ;;  %2444 = vmatprep.subr.bf16.mxu1 %v4385_v0  ;;  %v1228_v20 = vmul.f32 %v4692_v3, %v581_v4  ;;  %v229_v25 = vld [vmem:[%s7283_s2 + $0x5dc] sm:$0xff]  ;;  %v678_v27 = vunpack.c.l.bf16 %v213_v62  ;;  %v686_v33 = vunpack.c.l.bf16 %v217_v2  ;;  %v694_v37 = vunpack.c.h.bf16 %v221_v24 }
  0x73   :  { %2316 = vmatmul.mubr.bf16.gmra.mrb[24].mxu1 %v1640_v23  ;;  %3184 = vmatprep.subr.bf16.mxu0 %v4385_v0  ;;  %v1243_v23 = vmul.f32 %v4692_v3, %v596_v5  ;;  %v702_v41 = vunpack.c.h.bf16 %v225_v28 }
  0x74   :  { %3056 = vmatmul.mubr.bf16.gmra.mrb[24].mxu0 %v1648_v29  ;;  %2323 = vmatprep.mubr.bf16.mxu1 %v1656_v30  ;;  %v197_v29 = vld [vmem:[%s7283_s2 + $0x4ec] sm:$0xff] }
  0x75   :  { %3063 = vmatprep.mubr.bf16.mxu0 %v1664_v34  ;;  %2445 = vmatpush1.bf16.msra.mxu1 %v2091_v38  ;;  %v2025_v30 = vld [vmem:[%s7281_s1 + $0x5f0] sm:$0xff]  ;;  %v618_v34 = vunpack.c.l.bf16 %v5176_v55  ;;  %v2094_v38 = vpack.c.bf16 %v1898_v22, %v1897_v21  ;;  %v1678_v45 = vpack.c.bf16 %v1243_v23, %v1228_v20  ;;  %v649_v47 = vunpack.c.h.bf16 %v197_v29 }
  0x76   :  { %3185 = vmatpush1.bf16.msra.mxu0 %v2155_v40  ;;  %2446 = vmatprep.subr.bf16.mxu1 %v4385_v0  ;;  %v1670_v40 = vpack.c.bf16 %v1235_v19, %v1220_v18  ;;  %v2158_v48 = vpack.c.bf16 %v2026_v32, %v2025_v30  ;;  %v1273_v55 = vmul.f32 %v4692_v3, %v626_v43  ;;  %v648_v5 = vunpack.c.l.bf16 %v197_v29  ;;  %v233_v29 = vld [vmem:[%s7283_s2 + $0x5fc] sm:$0xff] }
  0x77   :  { %3186 = vmatprep.subr.bf16.mxu0 %v4385_v0  ;;  %v1265_v53 = vmul.f32 %v4677_v60, %v618_v34  ;;  %v1288_v18 = vmul.f32 %v4692_v3, %v641_v6  ;;  %v1303_v19 = vmul.f32 %v4692_v3, %v656_v7  ;;  %v1326_v21 = vmul.f32 %v4633_v39, %v679_v11 }
  0x78   :  { %v1334_v23 = vmul.f32 %v4643_v42, %v687_v14  ;;  %v717_v43 = vunpack.c.h.bf16 %v233_v29  ;;  %v1349_v50 = vmul.f32 %v4643_v42, %v702_v41 }
  0x79   :  { %2447 = vmatpush1.bf16.msra.mxu1 %v2092_v57  ;;  %v1296_v57 = vmul.f32 %v4633_v39, %v649_v47  ;;  %v1685_v4 = vpack.c.bf16 %v1265_v53, %v1250_v52  ;;  %v1708_v34 = vpack.c.bf16 %v1303_v19, %v1288_v18  ;;  %v1333_v47 = vmul.f32 %v4692_v3, %v686_v33  ;;  %v237_v52 = vld [vmem:[%s7283_s2 + $0x618] sm:$0xff] }
  0x7a   :  { %3187 = vmatpush1.bf16.msra.mxu0 %v2156_v61  ;;  %2448 = vmatprep.subr.bf16.mxu1 %v4385_v0  ;;  %v205_v61 = vld [vmem:[%s7283_s2 + $0x528] sm:$0xff]  ;;  %v1364_v51 = vmul.f32 %v4643_v42, %v717_v43  ;;  %v245_v53 = vld [vmem:[%s7283_s2 + $0x654] sm:$0xff]  ;;  %v723_v18 = vunpack.c.l.bf16 %v237_v52 }
  0x7b   :  { %2324 = vmatmul.mubr.bf16.gmra.mrb[28].mxu1 %v1655_v1  ;;  %3188 = vmatprep.subr.bf16.mxu0 %v4385_v0  ;;  %v209_v1 = vld [vmem:[%s7283_s2 + $0x548] sm:$0xff]  ;;  %v664_v10 = vunpack.c.h.bf16 %v205_v61  ;;  %v663_v26 = vunpack.c.l.bf16 %v205_v61  ;;  %v701_v61 = vunpack.c.l.bf16 %v225_v28  ;;  %v739_v2 = vunpack.c.h.bf16 %v245_v53 }
  0x7c   :  { %3064 = vmatmul.mubr.bf16.gmra.mrb[28].mxu0 %v1663_v8  ;;  %2331 = vmatprep.mubr.bf16.mxu1 %v1671_v9  ;;  %v1693_v8 = vpack.c.bf16 %v1273_v55, %v1258_v54  ;;  %v1701_v9 = vpack.c.bf16 %v1296_v57, %v1281_v56  ;;  %v672_v13 = vunpack.c.h.bf16 %v209_v1  ;;  %v671_v32 = vunpack.c.l.bf16 %v209_v1  ;;  %v241_v55 = vld [vmem:[%s7283_s2 + $0x638] sm:$0xff] }
  0x7d   :  { %3071 = vmatprep.mubr.bf16.mxu0 %v1679_v12  ;;  %2449 = vmatpush1.bf16.msra.mxu1 %v2093_v16  ;;  %v1709_v12 = vpack.c.bf16 %v1304_v59, %v1289_v58  ;;  %v1280_v16 = vmul.f32 %v4677_v60, %v633_v63  ;;  %v1311_v20 = vmul.f32 %v4633_v39, %v664_v10  ;;  %v249_v56 = vld [vmem:[%s7283_s2 + $0x674] sm:$0xff]  ;;  %v693_v58 = vunpack.c.l.bf16 %v221_v24 }
  0x7e   :  { %3189 = vmatpush1.bf16.msra.mxu0 %v2157_v17  ;;  %2450 = vmatprep.subr.bf16.mxu1 %v4385_v0  ;;  %v1295_v17 = vmul.f32 %v4677_v60, %v648_v5  ;;  %v1319_v22 = vmul.f32 %v4643_v42, %v672_v13  ;;  %v1310_v44 = vmul.f32 %v4677_v60, %v663_v26  ;;  %v708_v59 = vunpack.c.l.bf16 %v229_v25 }
  0x7f   :  { %3190 = vmatprep.subr.bf16.mxu0 %v4385_v0  ;;  %v1716_v36 = vpack.c.bf16 %v1326_v21, %v1311_v20  ;;  %v716_v63 = vunpack.c.l.bf16 %v233_v29  ;;  %v724_v1 = vunpack.c.h.bf16 %v237_v52  ;;  %v732_v5 = vunpack.c.h.bf16 %v241_v55  ;;  %v257_v20 = vld [vmem:[%s7283_s2 + $0x6b0] sm:$0xff] }
  0x80   :  { %v1700_v30 = vpack.c.bf16 %v1295_v17, %v1280_v16  ;;  %v747_v6 = vunpack.c.h.bf16 %v249_v56  ;;  %v1340_v7 = vmul.f32 %v4677_v60, %v693_v58  ;;  %v253_v16 = vld [vmem:[%s7283_s2 + $0x690] sm:$0xff]  ;;  %v738_v19 = vunpack.c.l.bf16 %v245_v53 }
  0x81   :  { %2451 = vmatpush1.bf16.msra.mxu1 %v2094_v38  ;;  %v709_v38 = vunpack.c.h.bf16 %v229_v25  ;;  %v1363_v10 = vmul.f32 %v4692_v3, %v716_v63  ;;  %v1371_v11 = vmul.f32 %v4633_v39, %v724_v1  ;;  %v1379_v13 = vmul.f32 %v4643_v42, %v732_v5  ;;  %v261_v17 = vld [vmem:[%s7283_s2 + $0x6cc] sm:$0xff] }
  0x82   :  { %3191 = vmatpush1.bf16.msra.mxu0 %v2158_v48  ;;  %2605 = vmatprep.subr.bf16.mxu1 %v4385_v0  ;;  %v1341_v48 = vmul.f32 %v4633_v39, %v694_v37  ;;  %v1394_v14 = vmul.f32 %v4643_v42, %v747_v6  ;;  %v265_v21 = vld [vmem:[%s7283_s2 + $0x6ec] sm:$0xff]  ;;  %v746_v24 = vunpack.c.l.bf16 %v249_v56  ;;  %v769_v28 = vunpack.c.h.bf16 %v261_v17 }
  0x83   :  { %2332 = vmatmul.mubr.bf16.gmra.mrb[32].mxu1 %v1670_v40  ;;  %3345 = vmatprep.subr.bf16.mxu0 %v4385_v0  ;;  %v1724_v40 = vpack.c.bf16 %v1334_v23, %v1319_v22  ;;  %v731_v23 = vunpack.c.l.bf16 %v241_v55  ;;  %v1370_v33 = vmul.f32 %v4677_v60, %v723_v18  ;;  %v761_v52 = vunpack.c.l.bf16 %v257_v20 }
  0x84   :  { %3072 = vmatmul.mubr.bf16.gmra.mrb[32].mxu0 %v1678_v45  ;;  %2339 = vmatprep.mubr.bf16.mxu1 %v1686_v46  ;;  %v1325_v45 = vmul.f32 %v4677_v60, %v678_v27  ;;  %v1318_v46 = vmul.f32 %v4692_v3, %v671_v32  ;;  %v754_v27 = vunpack.c.h.bf16 %v253_v16  ;;  %v1754_v29 = vpack.c.bf16 %v1394_v14, %v1379_v13 }
  0x85   :  { %3079 = vmatprep.mubr.bf16.mxu0 %v1694_v49  ;;  %v1356_v49 = vmul.f32 %v4633_v39, %v709_v38  ;;  %v777_v32 = vunpack.c.h.bf16 %v265_v21  ;;  %v1393_v37 = vmul.f32 %v4692_v3, %v746_v24  ;;  %v1408_v63 = vmul.f32 %v4692_v3, %v761_v52 }
  0x86   :  { %v1715_v54 = vpack.c.bf16 %v1325_v45, %v1310_v44  ;;  %v1723_v57 = vpack.c.bf16 %v1333_v47, %v1318_v46  ;;  %v1401_v38 = vmul.f32 %v4633_v39, %v754_v27  ;;  %v269_v44 = vld [vmem:[%s7283_s2 + $0x708] sm:$0xff] }
  0x87   :  { %v1731_v62 = vpack.c.bf16 %v1356_v49, %v1341_v48  ;;  %v1424_v43 = vmul.f32 %v4643_v42, %v777_v32  ;;  %v277_v45 = vld [vmem:[%s7283_s2 + $0x744] sm:$0xff]  ;;  %v784_v55 = vunpack.c.h.bf16 %v269_v44 }
  0x88   :  { %v273_v47 = vld [vmem:[%s7283_s2 + $0x728] sm:$0xff]  ;;  %v799_v56 = vunpack.c.h.bf16 %v277_v45 }
  0x89   :  { %v281_v48 = vld [vmem:[%s7283_s2 + $0x764] sm:$0xff]  ;;  %v792_v58 = vunpack.c.h.bf16 %v273_v47  ;;  %v791_v14 = vunpack.c.l.bf16 %v273_v47 }
  0x8b   :  { %2340 = vmatmul.mubr.bf16.gmra.mrb[36].mxu1 %v1685_v4  ;;  %v1739_v4 = vpack.c.bf16 %v1364_v51, %v1349_v50  ;;  %v753_v50 = vunpack.c.l.bf16 %v253_v16  ;;  %v768_v51 = vunpack.c.l.bf16 %v261_v17  ;;  %v1439_v5 = vmul.f32 %v4643_v42, %v792_v58  ;;  %v317_v58 = vld [vmem:[%s7283_s2 + $0x870] sm:$0xff] }
  0x8c   :  { %3080 = vmatmul.mubr.bf16.gmra.mrb[36].mxu0 %v1693_v8  ;;  %2347 = vmatprep.mubr.bf16.mxu1 %v1701_v9  ;;  %v1355_v8 = vmul.f32 %v4677_v60, %v708_v59  ;;  %v1348_v9 = vmul.f32 %v4692_v3, %v701_v61  ;;  %v807_v59 = vunpack.c.h.bf16 %v281_v48  ;;  %v806_v16 = vunpack.c.l.bf16 %v281_v48 }
  0x8d   :  { %3087 = vmatprep.mubr.bf16.mxu0 %v1709_v12  ;;  %v1386_v12 = vmul.f32 %v4633_v39, %v739_v2  ;;  %v1400_v61 = vmul.f32 %v4677_v60, %v753_v50  ;;  %v1431_v2 = vmul.f32 %v4633_v39, %v784_v55 }
  0x8e   :  { %v1730_v22 = vpack.c.bf16 %v1355_v8, %v1340_v7  ;;  %v1738_v25 = vpack.c.bf16 %v1363_v10, %v1348_v9  ;;  %v1454_v6 = vmul.f32 %v4643_v42, %v807_v59  ;;  %v285_v7 = vld [vmem:[%s7283_s2 + $0x780] sm:$0xff]  ;;  %v783_v9 = vunpack.c.l.bf16 %v269_v44  ;;  %v325_v59 = vld [vmem:[%s7283_s2 + $0x8ac] sm:$0xff] }
  0x8f   :  { %v1746_v26 = vpack.c.bf16 %v1386_v12, %v1371_v11  ;;  %v293_v8 = vld [vmem:[%s7283_s2 + $0x7bc] sm:$0xff]  ;;  %v798_v10 = vunpack.c.l.bf16 %v277_v45  ;;  %v1453_v27 = vmul.f32 %v4692_v3, %v806_v16 }
  0x90   :  { %v289_v11 = vld [vmem:[%s7283_s2 + $0x7a0] sm:$0xff]  ;;  %v1430_v24 = vmul.f32 %v4677_v60, %v783_v9  ;;  %v889_v9 = vunpack.c.h.bf16 %v325_v59 }
  0x91   :  { %v297_v12 = vld [vmem:[%s7283_s2 + $0x7dc] sm:$0xff]  ;;  %v821_v44 = vunpack.c.l.bf16 %v289_v11 }
  0x93   :  { %2348 = vmatmul.mubr.bf16.gmra.mrb[40].mxu1 %v1700_v30  ;;  %v762_v30 = vunpack.c.h.bf16 %v257_v20  ;;  %v829_v20 = vunpack.c.h.bf16 %v293_v8 }
  0x94   :  { %3088 = vmatmul.mubr.bf16.gmra.mrb[40].mxu0 %v1708_v34  ;;  %2355 = vmatprep.mubr.bf16.mxu1 %v1716_v36  ;;  %v1385_v34 = vmul.f32 %v4677_v60, %v738_v19  ;;  %v1378_v36 = vmul.f32 %v4692_v3, %v731_v23  ;;  %v814_v19 = vunpack.c.h.bf16 %v285_v7  ;;  %v837_v23 = vunpack.c.h.bf16 %v297_v12 }
  0x95   :  { %3095 = vmatprep.mubr.bf16.mxu0 %v1724_v40  ;;  %v1416_v40 = vmul.f32 %v4633_v39, %v769_v28  ;;  %v1409_v41 = vmul.f32 %v4643_v42, %v762_v30 }
  0x96   :  { %v1745_v46 = vpack.c.bf16 %v1385_v34, %v1370_v33  ;;  %v1753_v49 = vpack.c.bf16 %v1393_v37, %v1378_v36  ;;  %v1461_v28 = vmul.f32 %v4633_v39, %v814_v19  ;;  %v1484_v32 = vmul.f32 %v4643_v42, %v837_v23  ;;  %v301_v33 = vld [vmem:[%s7283_s2 + $0x7f8] sm:$0xff] }
  0x97   :  { %v1761_v53 = vpack.c.bf16 %v1416_v40, %v1401_v38  ;;  %v309_v34 = vld [vmem:[%s7283_s2 + $0x834] sm:$0xff]  ;;  %v844_v47 = vunpack.c.h.bf16 %v301_v33 }
  0x98   :  { %v305_v37 = vld [vmem:[%s7283_s2 + $0x818] sm:$0xff]  ;;  %v859_v48 = vunpack.c.h.bf16 %v309_v34 }
  0x99   :  { %v313_v38 = vld [vmem:[%s7283_s2 + $0x854] sm:$0xff]  ;;  %v852_v50 = vunpack.c.h.bf16 %v305_v37 }
  0x9b   :  { %2356 = vmatmul.mubr.bf16.gmra.mrb[44].mxu1 %v1715_v54  ;;  %v776_v54 = vunpack.c.l.bf16 %v265_v21  ;;  %v1784_v21 = vpack.c.bf16 %v1454_v6, %v1439_v5  ;;  %v321_v5 = vld [vmem:[%s7283_s2 + $0x890] sm:$0xff] }
  0x9c   :  { %3096 = vmatmul.mubr.bf16.gmra.mrb[44].mxu0 %v1723_v57  ;;  %2363 = vmatprep.mubr.bf16.mxu1 %v1731_v62  ;;  %v1769_v57 = vpack.c.bf16 %v1424_v43, %v1409_v41  ;;  %v1415_v62 = vmul.f32 %v4677_v60, %v768_v51  ;;  %v813_v41 = vunpack.c.l.bf16 %v285_v7  ;;  %v828_v43 = vunpack.c.l.bf16 %v293_v8  ;;  %v329_v6 = vld [vmem:[%s7283_s2 + $0x8cc] sm:$0xff] }
  0x9d   :  { %3103 = vmatprep.mubr.bf16.mxu0 %v1739_v4  ;;  %v1423_v1 = vmul.f32 %v4692_v3, %v776_v54  ;;  %v1446_v4 = vmul.f32 %v4633_v39, %v799_v56  ;;  %v867_v51 = vunpack.c.h.bf16 %v313_v38  ;;  %v1468_v54 = vmul.f32 %v4692_v3, %v821_v44 }
  0x9e   :  { %v1760_v13 = vpack.c.bf16 %v1415_v62, %v1400_v61  ;;  %v1460_v52 = vmul.f32 %v4677_v60, %v813_v41  ;;  %v1491_v56 = vmul.f32 %v4633_v39, %v844_v47  ;;  %v1499_v61 = vmul.f32 %v4643_v42, %v852_v50 }
  0x9f   :  { %v1768_v17 = vpack.c.bf16 %v1423_v1, %v1408_v63  ;;  %v1776_v18 = vpack.c.bf16 %v1446_v4, %v1431_v2  ;;  %v1514_v62 = vmul.f32 %v4643_v42, %v867_v51  ;;  %v843_v63 = vunpack.c.l.bf16 %v301_v33 }
  0xa0   :  { %v858_v1 = vunpack.c.l.bf16 %v309_v34  ;;  %v851_v2 = vunpack.c.l.bf16 %v305_v37  ;;  %v866_v4 = vunpack.c.l.bf16 %v313_v38  ;;  %v874_v8 = vunpack.c.h.bf16 %v317_v58 }
  0xa1   :  { %v1490_v16 = vmul.f32 %v4677_v60, %v843_v63  ;;  %v881_v33 = vunpack.c.l.bf16 %v321_v5  ;;  %v896_v34 = vunpack.c.l.bf16 %v329_v6 }
  0xa2   :  { %v1513_v19 = vmul.f32 %v4692_v3, %v866_v4 }
  0xa3   :  { %2364 = vmatmul.mubr.bf16.gmra.mrb[48].mxu1 %v1730_v22  ;;  %v822_v22 = vunpack.c.h.bf16 %v289_v11  ;;  %v1528_v47 = vmul.f32 %v4692_v3, %v881_v33  ;;  %v1902_v33 = vld [vmem:[%s7281_s1 + $0x218] sm:$0xff] }
  0xa4   :  { %3104 = vmatmul.mubr.bf16.gmra.mrb[48].mxu0 %v1738_v25  ;;  %2371 = vmatprep.mubr.bf16.mxu1 %v1746_v26  ;;  %v1445_v25 = vmul.f32 %v4677_v60, %v798_v10  ;;  %v1438_v26 = vmul.f32 %v4692_v3, %v791_v14  ;;  %v897_v14 = vunpack.c.h.bf16 %v329_v6 }
  0xa5   :  { %3111 = vmatprep.mubr.bf16.mxu0 %v1754_v29  ;;  %v1476_v29 = vmul.f32 %v4633_v39, %v829_v20  ;;  %v1469_v30 = vmul.f32 %v4643_v42, %v822_v22  ;;  %v1521_v20 = vmul.f32 %v4633_v39, %v874_v8  ;;  %v919_v22 = vsub.s32 3, %v4573_v15 }
  0xa6   :  { %v1775_v36 = vpack.c.bf16 %v1445_v25, %v1430_v24  ;;  %v1783_v40 = vpack.c.bf16 %v1453_v27, %v1438_v26  ;;  %v1544_v24 = vmul.f32 %v4643_v42, %v897_v14  ;;  %v30_v25 = vld [vmem:[%s7283_s2 + $0x8] sm:$0xff] }
  0xa7   :  { %v1791_v45 = vpack.c.bf16 %v1476_v29, %v1461_v28  ;;  %v38_v26 = vld [vmem:[%s7283_s2 + $0x44] sm:$0xff]  ;;  %v5434_v38 = vrot.slane %v4619_v31, %v919_v22  ;;  %v5437_v44 = vrot.slane %v4623_v35, %v919_v22 }
  0xa8   :  { %v42_v29 = vld [vmem:[%s7283_s2 + $0x64] sm:$0xff]  ;;  %v351_v37 = vunpack.c.h.bf16 %v38_v26 }
  0xa9   :  { %v2028_v22 = vld [vmem:[%s7281_s1 + $0x608] sm:$0xff] }
  0xaa   :  { %v998_v51 = vmul.f32 %v5434_v38, %v351_v37 }
  0xab   :  { %2372 = vmatmul.mubr.bf16.gmra.mrb[52].mxu1 %v1745_v46  ;;  %v836_v46 = vunpack.c.l.bf16 %v297_v12  ;;  %v1814_v12 = vpack.c.bf16 %v1514_v62, %v1499_v61  ;;  %v58_v61 = vld [vmem:[%s7283_s2 + $0xdc] sm:$0xff] }
  0xac   :  { %3112 = vmatmul.mubr.bf16.gmra.mrb[52].mxu0 %v1753_v49  ;;  %2379 = vmatprep.mubr.bf16.mxu1 %v1761_v53  ;;  %v1799_v49 = vpack.c.bf16 %v1484_v32, %v1469_v30  ;;  %v1475_v53 = vmul.f32 %v4677_v60, %v828_v43  ;;  %v888_v32 = vunpack.c.l.bf16 %v325_v59  ;;  %v359_v43 = vunpack.c.h.bf16 %v42_v29  ;;  %v50_v59 = vld [vmem:[%s7283_s2 + $0xa0] sm:$0xff] }
  0xad   :  { %3119 = vmatprep.mubr.bf16.mxu0 %v1769_v57  ;;  %v1483_v55 = vmul.f32 %v4692_v3, %v836_v46  ;;  %v1506_v57 = vmul.f32 %v4633_v39, %v859_v48  ;;  %v915_v48 = vsub.s32 2, %v4573_v15  ;;  %v389_v8 = vunpack.c.h.bf16 %v58_v61 }
  0xae   :  { %v1790_v7 = vpack.c.bf16 %v1475_v53, %v1460_v52  ;;  %v1535_v46 = vmul.f32 %v4677_v60, %v888_v32  ;;  %v1006_v53 = vmul.f32 %v5437_v44, %v359_v43  ;;  %v1901_v32 = vld [vmem:[%s7281_s1 + $0x210] sm:$0xff] }
  0xaf   :  { %v1798_v10 = vpack.c.bf16 %v1483_v55, %v1468_v54  ;;  %v1806_v11 = vpack.c.bf16 %v1506_v57, %v1491_v56  ;;  %v335_v54 = vunpack.c.l.bf16 %v30_v25  ;;  %v54_v55 = vld [vmem:[%s7283_s2 + $0xbc] sm:$0xff]  ;;  %v5455_v57 = vrot.slane %v4619_v31, %v915_v48 }
  0xb0   :  { %v381_v6 = vunpack.c.h.bf16 %v54_v55 }
  0xb3   :  { %2380 = vmatmul.mubr.bf16.gmra.mrb[56].mxu1 %v1760_v13  ;;  %v882_v13 = vunpack.c.h.bf16 %v321_v5 }
  0xb4   :  { %3120 = vmatmul.mubr.bf16.gmra.mrb[56].mxu0 %v1768_v17  ;;  %2387 = vmatprep.mubr.bf16.mxu1 %v1776_v18  ;;  %v1505_v17 = vmul.f32 %v4677_v60, %v858_v1  ;;  %v1498_v18 = vmul.f32 %v4692_v3, %v851_v2  ;;  %v358_v1 = vunpack.c.l.bf16 %v42_v29  ;;  %v5464_v2 = vrot.slane %v4623_v35, %v915_v48 }
  0xb5   :  { %3127 = vmatprep.mubr.bf16.mxu0 %v1784_v21  ;;  %v1536_v21 = vmul.f32 %v4633_v39, %v889_v9  ;;  %v1529_v23 = vmul.f32 %v4643_v42, %v882_v13  ;;  %v34_v39 = vld [vmem:[%s7283_s2 + $0x28] sm:$0xff]  ;;  %v873_v42 = vunpack.c.l.bf16 %v317_v58  ;;  %v982_v9 = vmul.f32 %v5455_v57, %v335_v54 }
  0xb6   :  { %v1805_v27 = vpack.c.bf16 %v1505_v17, %v1490_v16  ;;  %v1813_v28 = vpack.c.bf16 %v1513_v19, %v1498_v18  ;;  %v344_v41 = vunpack.c.h.bf16 %v34_v39  ;;  %v343_v58 = vunpack.c.l.bf16 %v34_v39  ;;  %v2027_v16 = vld [vmem:[%s7281_s1 + $0x600] sm:$0xff]  ;;  %v5484_v19 = vld [vmem:[%s7283_s2 + $0xf8] sm:$0xff] }
  0xb7   :  { %v1821_v30 = vpack.c.bf16 %v1536_v21, %v1521_v20  ;;  %v1005_v14 = vmul.f32 %v5464_v2, %v358_v1  ;;  %v1028_v18 = vmul.f32 %v5434_v38, %v381_v6  ;;  %v5489_v20 = vld [vmem:[%s7283_s2 + $0x134] sm:$0xff]  ;;  %v380_v39 = vunpack.c.l.bf16 %v54_v55 }
  0xb8   :  { %v991_v52 = vmul.f32 %v5437_v44, %v344_v41  ;;  %v990_v13 = vmul.f32 %v5464_v2, %v343_v58  ;;  %v373_v29 = vunpack.c.l.bf16 %v50_v59  ;;  %v2159_v37 = vpack.c.bf16 %v2028_v22, %v2027_v16  ;;  %v5536_v58 = vld [vmem:[%s7283_s2 + $0x170] sm:$0xff] }
  0xb9   :  { %v5552_v1 = vld [vmem:[%s7283_s2 + $0x190] sm:$0xff] }
  0xba   :  { %v1561_v4 = vpack.c.bf16 %v1006_v53, %v991_v52  ;;  %v1905_v22 = vld [vmem:[%s7281_s1 + $0x230] sm:$0xff] }
  0xbb   :  { %2388 = vmatmul.mubr.bf16.gmra.mrb[60].mxu1 %v1775_v36  ;;  %v336_v36 = vunpack.c.h.bf16 %v30_v25  ;;  %v5499_v25 = vld [vmem:[%s7283_s2 + $0x118] sm:$0xff] }
  0xbc   :  { %3128 = vmatmul.mubr.bf16.gmra.mrb[60].mxu0 %v1783_v40  ;;  %2395 = vmatprep.mubr.bf16.mxu1 %v1791_v45  ;;  %v1829_v40 = vpack.c.bf16 %v1544_v24, %v1529_v23  ;;  %v1520_v45 = vmul.f32 %v4677_v60, %v873_v42  ;;  %v46_v60 = vld [vmem:[%s7283_s2 + $0x80] sm:$0xff]  ;;  %v1036_v24 = vmul.f32 %v5437_v44, %v389_v8  ;;  %v388_v42 = vunpack.c.l.bf16 %v58_v61 }
  0xbd   :  { %3135 = vmatprep.mubr.bf16.mxu0 %v1799_v49  ;;  %v1543_v49 = vmul.f32 %v4692_v3, %v896_v34  ;;  %v983_v50 = vmul.f32 %v5434_v38, %v336_v36  ;;  %v350_v3 = vunpack.c.l.bf16 %v38_v26  ;;  %v366_v5 = vunpack.c.h.bf16 %v46_v60  ;;  %v5504_v26 = vld [vmem:[%s7283_s2 + $0x154] sm:$0xff]  ;;  %v2031_v8 = vld [vmem:[%s7281_s1 + $0x620] sm:$0xff] }
  0xbe   :  { %v1820_v56 = vpack.c.bf16 %v1535_v46, %v1520_v45  ;;  %v396_v34 = vunpack.c.h.bf16 %v5484_v19  ;;  %v411_v36 = vunpack.c.h.bf16 %v5489_v20  ;;  %v404_v41 = vunpack.c.h.bf16 %v5499_v25  ;;  %v2029_v46 = vld [vmem:[%s7281_s1 + $0x610] sm:$0xff] }
  0xbf   :  { %v1828_v62 = vpack.c.bf16 %v1543_v49, %v1528_v47  ;;  %v1553_v63 = vpack.c.bf16 %v998_v51, %v983_v50  ;;  %v1013_v17 = vmul.f32 %v5434_v38, %v366_v5  ;;  %v419_v43 = vunpack.c.h.bf16 %v5504_v26  ;;  %v2030_v47 = vld [vmem:[%s7281_s1 + $0x618] sm:$0xff] }
  0xc0   :  { %v1027_v49 = vmul.f32 %v5455_v57, %v380_v39  ;;  %v1020_v50 = vmul.f32 %v5464_v2, %v373_v29  ;;  %v2096_v51 = vpack.c.bf16 %v1902_v33, %v1901_v32  ;;  %v1035_v52 = vmul.f32 %v5464_v2, %v388_v42  ;;  %v5597_v32 = vld [vmem:[%s7283_s2 + $0x1e8] sm:$0xff] }
  0xc1   :  { %v1043_v53 = vmul.f32 %v5434_v38, %v396_v34  ;;  %v1058_v54 = vmul.f32 %v5434_v38, %v411_v36  ;;  %v1051_v55 = vmul.f32 %v5437_v44, %v404_v41  ;;  %v395_v61 = vunpack.c.l.bf16 %v5484_v19  ;;  %v5602_v33 = vld [vmem:[%s7283_s2 + $0x224] sm:$0xff] }
  0xc2   :  { %v403_v6 = vunpack.c.l.bf16 %v5499_v25  ;;  %v5607_v34 = vld [vmem:[%s7283_s2 + $0x208] sm:$0xff]  ;;  %v1907_v41 = vld [vmem:[%s7281_s1 + $0x240] sm:$0xff] }
  0xc3   :  { %2396 = vmatmul.mubr.bf16.gmra.mrb[64].mxu1 %v1790_v7  ;;  %v374_v7 = vunpack.c.h.bf16 %v50_v59  ;;  %v5541_v59 = vld [vmem:[%s7283_s2 + $0x1ac] sm:$0xff]  ;;  %v1042_v19 = vmul.f32 %v5455_v57, %v395_v61  ;;  %v1910_v61 = vld [vmem:[%s7281_s1 + $0x258] sm:$0xff] }
  0xc4   :  { %3136 = vmatmul.mubr.bf16.gmra.mrb[64].mxu0 %v1798_v10  ;;  %2403 = vmatprep.mubr.bf16.mxu1 %v1806_v11  ;;  %v997_v10 = vmul.f32 %v5455_v57, %v350_v3  ;;  %v1899_v11 = vld [vmem:[%s7281_s1 + $0x200] sm:$0xff] }
  0xc5   :  { %3143 = vmatprep.mubr.bf16.mxu0 %v1814_v12  ;;  %v1900_v12 = vld [vmem:[%s7281_s1 + $0x208] sm:$0xff]  ;;  %v1021_v23 = vmul.f32 %v5437_v44, %v374_v7  ;;  %v1903_v3 = vld [vmem:[%s7281_s1 + $0x220] sm:$0xff]  ;;  %v418_v7 = vunpack.c.l.bf16 %v5504_v26  ;;  %v2033_v26 = vld [vmem:[%s7281_s1 + $0x630] sm:$0xff] }
  0xc6   :  { %v2095_v21 = vpack.c.bf16 %v1900_v12, %v1899_v11  ;;  %v1583_v11 = vpack.c.bf16 %v1058_v54, %v1043_v53  ;;  %v426_v12 = vunpack.c.h.bf16 %v5536_v58  ;;  %v456_v53 = vunpack.c.h.bf16 %v5597_v32 }
  0xc7   :  { %v1576_v45 = vpack.c.bf16 %v1036_v24, %v1021_v23  ;;  %v1906_v23 = vld [vmem:[%s7281_s1 + $0x238] sm:$0xff]  ;;  %v1050_v24 = vmul.f32 %v5464_v2, %v403_v6  ;;  %v1065_v25 = vmul.f32 %v5464_v2, %v418_v7  ;;  %v471_v54 = vunpack.c.h.bf16 %v5602_v33 }
  0xc8   :  { %v2098_v42 = vpack.c.bf16 %v1906_v23, %v1905_v22  ;;  %v1103_v7 = vmul.f32 %v5434_v38, %v456_v53  ;;  %v463_v23 = vunpack.c.l.bf16 %v5607_v34  ;;  %v5730_v53 = vld [vmem:[%s7283_s2 + $0x314] sm:$0xff] }
  0xcb   :  { %2404 = vmatmul.mubr.bf16.gmra.mrb[68].mxu1 %v1805_v27  ;;  %v1552_v27 = vpack.c.bf16 %v997_v10, %v982_v9  ;;  %v2032_v9 = vld [vmem:[%s7281_s1 + $0x628] sm:$0xff]  ;;  %v1575_v10 = vpack.c.bf16 %v1035_v52, %v1020_v50 }
  0xcc   :  { %3144 = vmatmul.mubr.bf16.gmra.mrb[68].mxu0 %v1813_v28  ;;  %2411 = vmatprep.mubr.bf16.mxu1 %v1821_v30  ;;  %v365_v28 = vunpack.c.l.bf16 %v46_v60  ;;  %v1560_v30 = vpack.c.bf16 %v1005_v14, %v990_v13  ;;  %v2160_v60 = vpack.c.bf16 %v2030_v47, %v2029_v46  ;;  %v441_v13 = vunpack.c.h.bf16 %v5541_v59  ;;  %v2036_v50 = vld [vmem:[%s7281_s1 + $0x648] sm:$0xff] }
  0xcd   :  { %3151 = vmatprep.mubr.bf16.mxu0 %v1829_v40  ;;  %v1568_v40 = vpack.c.bf16 %v1028_v18, %v1013_v17  ;;  %v434_v17 = vunpack.c.h.bf16 %v5552_v1  ;;  %v425_v46 = vunpack.c.l.bf16 %v5536_v58  ;;  %v440_v47 = vunpack.c.l.bf16 %v5541_v59  ;;  %v1909_v59 = vld [vmem:[%s7281_s1 + $0x250] sm:$0xff] }
  0xce   :  { %v1012_v48 = vmul.f32 %v5455_v57, %v365_v28  ;;  %v1073_v28 = vmul.f32 %v5434_v38, %v426_v12  ;;  %v1088_v39 = vmul.f32 %v5434_v38, %v441_v13  ;;  %v5666_v12 = vld [vmem:[%s7283_s2 + $0x29c] sm:$0xff] }
  0xcf   :  { %v1081_v29 = vmul.f32 %v5437_v44, %v434_v17  ;;  %v5671_v13 = vld [vmem:[%s7283_s2 + $0x280] sm:$0xff]  ;;  %v470_v17 = vunpack.c.l.bf16 %v5602_v33 }
  0xd0   :  { %v1567_v5 = vpack.c.bf16 %v1027_v49, %v1012_v48  ;;  %v433_v48 = vunpack.c.l.bf16 %v5552_v1  ;;  %v2035_v49 = vld [vmem:[%s7281_s1 + $0x640] sm:$0xff] }
  0xd1   :  { %v2163_v58 = vpack.c.bf16 %v2036_v50, %v2035_v49 }
  0xd2   :  { %v1080_v1 = vmul.f32 %v5464_v2, %v433_v48 }
  0xd3   :  { %2412 = vmatmul.mubr.bf16.gmra.mrb[72].mxu1 %v1820_v56  ;;  %v1066_v56 = vmul.f32 %v5437_v44, %v419_v43  ;;  %v1908_v43 = vld [vmem:[%s7281_s1 + $0x248] sm:$0xff] }
  0xd4   :  { %3152 = vmatmul.mubr.bf16.gmra.mrb[72].mxu0 %v1828_v62  ;;  %2452 = vmatprep.mubr.bf16.mxu1 %v1553_v63  ;;  %v410_v62 = vunpack.c.l.bf16 %v5489_v20  ;;  %v1904_v63 = vld [vmem:[%s7281_s1 + $0x228] sm:$0xff] }
  0xd5   :  { %3192 = vmatprep.mubr.bf16.mxu0 %v1561_v4  ;;  %v5557_v4 = vld [vmem:[%s7283_s2 + $0x1cc] sm:$0xff]  ;;  %v1591_v14 = vpack.c.bf16 %v1066_v56, %v1051_v55  ;;  %v2097_v16 = vpack.c.bf16 %v1904_v63, %v1903_v3  ;;  %v464_v55 = vunpack.c.h.bf16 %v5607_v34  ;;  %v2099_v3 = vpack.c.bf16 %v1908_v43, %v1907_v41  ;;  %v1914_v41 = vld [vmem:[%s7281_s1 + $0x278] sm:$0xff] }
  0xd6   :  { %v449_v18 = vunpack.c.h.bf16 %v5557_v4  ;;  %v1057_v20 = vmul.f32 %v5455_v57, %v410_v62  ;;  %v448_v52 = vunpack.c.l.bf16 %v5557_v4  ;;  %v1072_v62 = vmul.f32 %v5455_v57, %v425_v46  ;;  %v2037_v4 = vld [vmem:[%s7281_s1 + $0x650] sm:$0xff] }
  0xd7   :  { %v1087_v63 = vmul.f32 %v5455_v57, %v440_v47  ;;  %v1110_v43 = vmul.f32 %v5464_v2, %v463_v23  ;;  %v2041_v46 = vld [vmem:[%s7281_s1 + $0x670] sm:$0xff]  ;;  %v2042_v47 = vld [vmem:[%s7281_s1 + $0x678] sm:$0xff] }
  0xd8   :  { %v1582_v36 = vpack.c.bf16 %v1057_v20, %v1042_v19  ;;  %v1095_v6 = vmul.f32 %v5464_v2, %v448_v52  ;;  %v1911_v20 = vld [vmem:[%s7281_s1 + $0x260] sm:$0xff]  ;;  %v5725_v52 = vld [vmem:[%s7283_s2 + $0x2d8] sm:$0xff] }
  0xd9   :  { %v1597_v22 = vpack.c.bf16 %v1087_v63, %v1072_v62  ;;  %v500_v63 = vunpack.c.l.bf16 %v5666_v12 }
  0xdb   :  { %2453 = vmatmul.mubr.bf16.vlgmr.msra.gmra.mrb[0].mxu1 %v1552_v27  ;;  %v2034_v27 = vld [vmem:[%s7281_s1 + $0x638] sm:$0xff] }
  0xdc   :  { %3193 = vmatmul.mubr.bf16.vlgmr.msra.gmra.mrb[0].mxu0 %v1560_v30  ;;  %2606 = vmatpush1.bf16.msra.mxu1 %v2095_v21  ;;  %v2161_v21 = vpack.c.bf16 %v2032_v9, %v2031_v8  ;;  %v1096_v30 = vmul.f32 %v5437_v44, %v449_v18  ;;  %v1118_v8 = vmul.f32 %v5434_v38, %v471_v54  ;;  %v5678_v18 = vld [vmem:[%s7283_s2 + $0x2bc] sm:$0xff] }
  0xdd   :  { %3346 = vmatpush1.bf16.msra.mxu0 %v2159_v37  ;;  %2460 = vmatprep.mubr.bf16.mxu1 %v1568_v40  ;;  %v2162_v37 = vpack.c.bf16 %v2034_v27, %v2033_v26  ;;  %v5613_v40 = vld [vmem:[%s7283_s2 + $0x244] sm:$0xff]  ;;  %v1111_v9 = vmul.f32 %v5437_v44, %v464_v55  ;;  %v1605_v27 = vpack.c.bf16 %v1095_v6, %v1080_v1  ;;  %v5735_v54 = vld [vmem:[%s7283_s2 + $0x2f8] sm:$0xff]  ;;  %v493_v1 = vunpack.c.l.bf16 %v5671_v13 }
  0xde   :  { %3200 = vmatprep.mubr.bf16.mxu0 %v1576_v45  ;;  %2607 = vmatprep.subr.bf16.mxu1 %v4385_v0  ;;  %v1590_v45 = vpack.c.bf16 %v1065_v25, %v1050_v24  ;;  %v479_v56 = vunpack.c.h.bf16 %v5613_v40  ;;  %v478_v24 = vunpack.c.l.bf16 %v5613_v40  ;;  %v2039_v25 = vld [vmem:[%s7281_s1 + $0x660] sm:$0xff]  ;;  %v2040_v26 = vld [vmem:[%s7281_s1 + $0x668] sm:$0xff]  ;;  %v1913_v40 = vld [vmem:[%s7281_s1 + $0x270] sm:$0xff] }
  0xdf   :  { %3347 = vmatprep.subr.bf16.mxu0 %v4385_v0 }
  0xe0   :  { %2608 = vmatpush1.bf16.msra.mxu1 %v2096_v51  ;;  %v1598_v51 = vpack.c.bf16 %v1088_v39, %v1073_v28  ;;  %v1613_v28 = vpack.c.bf16 %v1118_v8, %v1103_v7  ;;  %v508_v7 = vunpack.c.l.bf16 %v5678_v18  ;;  %v516_v8 = vunpack.c.h.bf16 %v5725_v52 }
  0xe1   :  { %3348 = vmatpush1.bf16.msra.mxu0 %v2160_v60  ;;  %2609 = vmatprep.subr.bf16.mxu1 %v4385_v0  ;;  %v1606_v60 = vpack.c.bf16 %v1096_v30, %v1081_v29  ;;  %v501_v29 = vunpack.c.h.bf16 %v5666_v12 }
  0xe2   :  { %3349 = vmatprep.subr.bf16.mxu0 %v4385_v0  ;;  %v1155_v23 = vmul.f32 %v5464_v2, %v508_v7  ;;  %v5853_v7 = vld [vmem:[%s7283_s2 + $0x3c8] sm:$0xff] }
  0xe3   :  { %2461 = vmatmul.mubr.bf16.gmra.mrb[4].mxu1 %v1567_v5  ;;  %v2038_v5 = vld [vmem:[%s7281_s1 + $0x658] sm:$0xff]  ;;  %v1148_v49 = vmul.f32 %v5434_v38, %v501_v29  ;;  %v5799_v29 = vld [vmem:[%s7283_s2 + $0x370] sm:$0xff] }
  0xe4   :  { %3201 = vmatmul.mubr.bf16.gmra.mrb[4].mxu0 %v1575_v10  ;;  %2468 = vmatprep.mubr.bf16.mxu1 %v1583_v11  ;;  %v1126_v10 = vmul.f32 %v5437_v44, %v479_v56  ;;  %v5661_v11 = vld [vmem:[%s7283_s2 + $0x260] sm:$0xff]  ;;  %v2164_v19 = vpack.c.bf16 %v2038_v5, %v2037_v4  ;;  %v5740_v56 = vld [vmem:[%s7283_s2 + $0x334] sm:$0xff]  ;;  %v2044_v5 = vld [vmem:[%s7281_s1 + $0x688] sm:$0xff] }
  0xe5   :  { %3208 = vmatprep.mubr.bf16.mxu0 %v1591_v14  ;;  %2610 = vmatpush1.bf16.msra.mxu1 %v2097_v16  ;;  %v2100_v14 = vpack.c.bf16 %v1910_v61, %v1909_v59  ;;  %v455_v16 = vunpack.c.l.bf16 %v5597_v32  ;;  %v486_v39 = vunpack.c.h.bf16 %v5661_v11  ;;  %v509_v32 = vunpack.c.h.bf16 %v5678_v18  ;;  %v1916_v59 = vld [vmem:[%s7281_s1 + $0x288] sm:$0xff]  ;;  %v2043_v4 = vld [vmem:[%s7281_s1 + $0x680] sm:$0xff] }
  0xe6   :  { %3350 = vmatpush1.bf16.msra.mxu0 %v2161_v21  ;;  %2611 = vmatprep.subr.bf16.mxu1 %v4385_v0  ;;  %v1912_v21 = vld [vmem:[%s7281_s1 + $0x268] sm:$0xff]  ;;  %v1621_v30 = vpack.c.bf16 %v1126_v10, %v1111_v9  ;;  %v485_v62 = vunpack.c.l.bf16 %v5661_v11  ;;  %v531_v9 = vunpack.c.h.bf16 %v5730_v53  ;;  %v524_v11 = vunpack.c.h.bf16 %v5735_v54 }
  0xe7   :  { %3351 = vmatprep.subr.bf16.mxu0 %v4385_v0  ;;  %v2101_v33 = vpack.c.bf16 %v1912_v21, %v1911_v20  ;;  %v1102_v34 = vmul.f32 %v5455_v57, %v455_v16  ;;  %v1133_v48 = vmul.f32 %v5434_v38, %v486_v39  ;;  %v539_v12 = vunpack.c.h.bf16 %v5740_v56  ;;  %v1917_v16 = vld [vmem:[%s7281_s1 + $0x290] sm:$0xff] }
  0xe8   :  { %v1132_v18 = vmul.f32 %v5455_v57, %v485_v62  ;;  %v1140_v20 = vmul.f32 %v5464_v2, %v493_v1  ;;  %v2045_v21 = vld [vmem:[%s7281_s1 + $0x690] sm:$0xff] }
  0xe9   :  { %2612 = vmatpush1.bf16.msra.mxu1 %v2098_v42  ;;  %v494_v42 = vunpack.c.h.bf16 %v5671_v13  ;;  %v1628_v6 = vpack.c.bf16 %v1148_v49, %v1133_v48  ;;  %v5794_v39 = vld [vmem:[%s7283_s2 + $0x38c] sm:$0xff] }
  0xea   :  { %3352 = vmatpush1.bf16.msra.mxu0 %v2162_v37  ;;  %2613 = vmatprep.subr.bf16.mxu1 %v4385_v0  ;;  %v2165_v37 = vpack.c.bf16 %v2040_v26, %v2039_v25  ;;  %v1178_v25 = vmul.f32 %v5434_v38, %v531_v9  ;;  %v1171_v26 = vmul.f32 %v5437_v44, %v524_v11  ;;  %v2049_v62 = vld [vmem:[%s7281_s1 + $0x6b0] sm:$0xff]  ;;  %v5863_v9 = vld [vmem:[%s7283_s2 + $0x3e8] sm:$0xff] }
  0xeb   :  { %2469 = vmatmul.mubr.bf16.gmra.mrb[8].mxu1 %v1582_v36  ;;  %3353 = vmatprep.subr.bf16.mxu0 %v4385_v0  ;;  %v1117_v36 = vmul.f32 %v5455_v57, %v470_v17  ;;  %v1141_v50 = vmul.f32 %v5437_v44, %v494_v42  ;;  %v1918_v17 = vld [vmem:[%s7281_s1 + $0x298] sm:$0xff]  ;;  %v515_v42 = vunpack.c.l.bf16 %v5725_v52  ;;  %v554_v52 = vunpack.c.h.bf16 %v5799_v29 }
  0xec   :  { %3209 = vmatmul.mubr.bf16.gmra.mrb[8].mxu0 %v1590_v45  ;;  %2476 = vmatprep.mubr.bf16.mxu1 %v1598_v51  ;;  %v1125_v45 = vmul.f32 %v5464_v2, %v478_v24  ;;  %v1156_v51 = vmul.f32 %v5437_v44, %v509_v32  ;;  %v1163_v24 = vmul.f32 %v5434_v38, %v516_v8  ;;  %v530_v32 = vunpack.c.l.bf16 %v5730_v53  ;;  %v5858_v8 = vld [vmem:[%s7283_s2 + $0x404] sm:$0xff] }
  0xed   :  { %3216 = vmatprep.mubr.bf16.mxu0 %v1606_v60  ;;  %2614 = vmatpush1.bf16.msra.mxu1 %v2099_v3  ;;  %v2102_v60 = vpack.c.bf16 %v1914_v41, %v1913_v40  ;;  %v1612_v55 = vpack.c.bf16 %v1117_v36, %v1102_v34  ;;  %v2166_v3 = vpack.c.bf16 %v2042_v47, %v2041_v46  ;;  %v1919_v36 = vld [vmem:[%s7281_s1 + $0x2a0] sm:$0xff]  ;;  %v523_v41 = vunpack.c.l.bf16 %v5735_v54  ;;  %v2048_v46 = vld [vmem:[%s7281_s1 + $0x6a8] sm:$0xff] }
  0xee   :  { %3354 = vmatpush1.bf16.msra.mxu0 %v2163_v58  ;;  %2615 = vmatprep.subr.bf16.mxu1 %v4385_v0  ;;  %v1915_v58 = vld [vmem:[%s7281_s1 + $0x280] sm:$0xff]  ;;  %v1620_v61 = vpack.c.bf16 %v1125_v45, %v1110_v43  ;;  %v1636_v10 = vpack.c.bf16 %v1156_v51, %v1141_v50  ;;  %v538_v43 = vunpack.c.l.bf16 %v5740_v56  ;;  %v1635_v47 = vpack.c.bf16 %v1155_v23, %v1140_v20 }
  0xef   :  { %3355 = vmatprep.subr.bf16.mxu0 %v4385_v0  ;;  %v2103_v13 = vpack.c.bf16 %v1916_v59, %v1915_v58  ;;  %v2047_v45 = vld [vmem:[%s7281_s1 + $0x6a0] sm:$0xff]  ;;  %v1643_v48 = vpack.c.bf16 %v1178_v25, %v1163_v24  ;;  %v561_v50 = vunpack.c.h.bf16 %v5794_v39  ;;  %v1922_v58 = vld [vmem:[%s7281_s1 + $0x2b8] sm:$0xff]  ;;  %v1170_v59 = vmul.f32 %v5464_v2, %v523_v41 }
  0xf0   :  { %v2169_v56 = vpack.c.bf16 %v2048_v46, %v2047_v45  ;;  %v553_v20 = vunpack.c.l.bf16 %v5799_v29  ;;  %v576_v25 = vunpack.c.h.bf16 %v5853_v7 }
  0xf1   :  { %2616 = vmatpush1.bf16.msra.mxu1 %v2100_v14  ;;  %v2167_v14 = vpack.c.bf16 %v2044_v5, %v2043_v4  ;;  %v1208_v4 = vmul.f32 %v5434_v38, %v561_v50  ;;  %v1201_v5 = vmul.f32 %v5437_v44, %v554_v52  ;;  %v5927_v50 = vld [vmem:[%s7283_s2 + $0x460] sm:$0xff]  ;;  %v575_v52 = vunpack.c.l.bf16 %v5853_v7 }
  0xf2   :  { %3356 = vmatpush1.bf16.msra.mxu0 %v2164_v19  ;;  %2617 = vmatprep.subr.bf16.mxu1 %v4385_v0  ;;  %v1147_v19 = vmul.f32 %v5455_v57, %v500_v63  ;;  %v2050_v63 = vld [vmem:[%s7281_s1 + $0x6b8] sm:$0xff]  ;;  %v614_v7 = vunpack.c.h.bf16 %v5927_v50 }
  0xf3   :  { %2477 = vmatmul.mubr.bf16.gmra.mrb[12].mxu1 %v1597_v22  ;;  %3357 = vmatprep.subr.bf16.mxu0 %v4385_v0  ;;  %v2046_v22 = vld [vmem:[%s7281_s1 + $0x698] sm:$0xff] }
  0xf4   :  { %3217 = vmatmul.mubr.bf16.gmra.mrb[12].mxu0 %v1605_v27  ;;  %2484 = vmatprep.mubr.bf16.mxu1 %v1613_v28  ;;  %v1186_v27 = vmul.f32 %v5437_v44, %v539_v12  ;;  %v5789_v28 = vld [vmem:[%s7283_s2 + $0x350] sm:$0xff]  ;;  %v2168_v34 = vpack.c.bf16 %v2046_v22, %v2045_v21  ;;  %v1627_v40 = vpack.c.bf16 %v1147_v19, %v1132_v18  ;;  %v5868_v12 = vld [vmem:[%s7283_s2 + $0x424] sm:$0xff]  ;;  %v560_v19 = vunpack.c.l.bf16 %v5794_v39 }
  0xf5   :  { %3224 = vmatprep.mubr.bf16.mxu0 %v1621_v30  ;;  %2618 = vmatpush1.bf16.msra.mxu1 %v2101_v33  ;;  %v2104_v30 = vpack.c.bf16 %v1918_v17, %v1917_v16  ;;  %v5806_v33 = vld [vmem:[%s7283_s2 + $0x3ac] sm:$0xff]  ;;  %v546_v49 = vunpack.c.h.bf16 %v5789_v28  ;;  %v545_v18 = vunpack.c.l.bf16 %v5789_v28  ;;  %v2051_v21 = vld [vmem:[%s7281_s1 + $0x6c0] sm:$0xff]  ;;  %v584_v28 = vunpack.c.h.bf16 %v5863_v9 }
  0xf6   :  { %3358 = vmatpush1.bf16.msra.mxu0 %v2165_v37  ;;  %2619 = vmatprep.subr.bf16.mxu1 %v4385_v0  ;;  %v1920_v37 = vld [vmem:[%s7281_s1 + $0x2a8] sm:$0xff]  ;;  %v1651_v51 = vpack.c.bf16 %v1186_v27, %v1171_v26  ;;  %v569_v53 = vunpack.c.h.bf16 %v5806_v33  ;;  %v568_v24 = vunpack.c.l.bf16 %v5806_v33  ;;  %v591_v26 = vunpack.c.h.bf16 %v5858_v8 }
  0xf7   :  { %3359 = vmatprep.subr.bf16.mxu0 %v4385_v0  ;;  %v2105_v54 = vpack.c.bf16 %v1920_v37, %v1919_v36  ;;  %v1193_v1 = vmul.f32 %v5434_v38, %v546_v49  ;;  %v1924_v16 = vld [vmem:[%s7281_s1 + $0x2c8] sm:$0xff]  ;;  %v599_v39 = vunpack.c.h.bf16 %v5868_v12  ;;  %v1192_v33 = vmul.f32 %v5455_v57, %v545_v18  ;;  %v2053_v37 = vld [vmem:[%s7281_s1 + $0x6d0] sm:$0xff]  ;;  %v5922_v49 = vld [vmem:[%s7283_s2 + $0x47c] sm:$0xff] }
  0xf8   :  { %v2052_v22 = vld [vmem:[%s7281_s1 + $0x6c8] sm:$0xff]  ;;  %v1200_v36 = vmul.f32 %v5464_v2, %v553_v20  ;;  %v1215_v41 = vmul.f32 %v5464_v2, %v568_v24  ;;  %v1238_v45 = vmul.f32 %v5434_v38, %v591_v26  ;;  %v1231_v46 = vmul.f32 %v5437_v44, %v584_v28  ;;  %v2057_v18 = vld [vmem:[%s7281_s1 + $0x6f0] sm:$0xff]  ;;  %v190_v24 = vld [vmem:[%s7283_s2 + $0x4b8] sm:$0xff] }
  0xf9   :  { %2620 = vmatpush1.bf16.msra.mxu1 %v2102_v60  ;;  %v1162_v60 = vmul.f32 %v5455_v57, %v515_v42  ;;  %v1658_v23 = vpack.c.bf16 %v1208_v4, %v1193_v1  ;;  %v1925_v42 = vld [vmem:[%s7281_s1 + $0x2d0] sm:$0xff] }
  0xfa   :  { %3360 = vmatpush1.bf16.msra.mxu0 %v2166_v3  ;;  %2621 = vmatprep.subr.bf16.mxu1 %v4385_v0  ;;  %v1921_v3 = vld [vmem:[%s7281_s1 + $0x2b0] sm:$0xff] }
  0xfb   :  { %2485 = vmatmul.mubr.bf16.gmra.mrb[16].mxu1 %v1612_v55  ;;  %3361 = vmatprep.subr.bf16.mxu0 %v4385_v0  ;;  %v1177_v55 = vmul.f32 %v5455_v57, %v530_v32  ;;  %v1926_v32 = vld [vmem:[%s7281_s1 + $0x2d8] sm:$0xff] }
  0xfc   :  { %3225 = vmatmul.mubr.bf16.gmra.mrb[16].mxu0 %v1620_v61  ;;  %2492 = vmatprep.mubr.bf16.mxu1 %v1628_v6  ;;  %v1185_v61 = vmul.f32 %v5464_v2, %v538_v43  ;;  %v1216_v6 = vmul.f32 %v5437_v44, %v569_v53  ;;  %v1223_v43 = vmul.f32 %v5434_v38, %v576_v25  ;;  %v590_v53 = vunpack.c.l.bf16 %v5858_v8  ;;  %v198_v25 = vld [vmem:[%s7283_s2 + $0x4f4] sm:$0xff] }
  0xfd   :  { %3232 = vmatprep.mubr.bf16.mxu0 %v1636_v10  ;;  %2622 = vmatpush1.bf16.msra.mxu1 %v2103_v13  ;;  %v2106_v10 = vpack.c.bf16 %v1922_v58, %v1921_v3  ;;  %v1642_v11 = vpack.c.bf16 %v1177_v55, %v1162_v60  ;;  %v2170_v13 = vpack.c.bf16 %v2050_v63, %v2049_v62  ;;  %v1927_v55 = vld [vmem:[%s7281_s1 + $0x2e0] sm:$0xff]  ;;  %v583_v58 = vunpack.c.l.bf16 %v5863_v9  ;;  %v2056_v62 = vld [vmem:[%s7281_s1 + $0x6e8] sm:$0xff] }
  0xfe   :  { %3362 = vmatpush1.bf16.msra.mxu0 %v2167_v14  ;;  %2623 = vmatprep.subr.bf16.mxu1 %v4385_v0  ;;  %v1923_v14 = vld [vmem:[%s7281_s1 + $0x2c0] sm:$0xff]  ;;  %v1650_v17 = vpack.c.bf16 %v1185_v61, %v1170_v59  ;;  %v1666_v27 = vpack.c.bf16 %v1216_v6, %v1201_v5  ;;  %v598_v59 = vunpack.c.l.bf16 %v5868_v12  ;;  %v1665_v63 = vpack.c.bf16 %v1215_v41, %v1200_v36 }
  0xff   :  { %3363 = vmatprep.subr.bf16.mxu0 %v4385_v0  ;;  %v2107_v29 = vpack.c.bf16 %v1924_v16, %v1923_v14  ;;  %v2055_v61 = vld [vmem:[%s7281_s1 + $0x6e0] sm:$0xff]  ;;  %v1673_v1 = vpack.c.bf16 %v1238_v45, %v1223_v43  ;;  %v621_v5 = vunpack.c.h.bf16 %v5922_v49  ;;  %v1930_v14 = vld [vmem:[%s7281_s1 + $0x2f8] sm:$0xff]  ;;  %v1230_v16 = vmul.f32 %v5464_v2, %v583_v58  ;;  %v210_v58 = vld [vmem:[%s7283_s2 + $0x550] sm:$0xff] }
 0x100   :  { %v2173_v12 = vpack.c.bf16 %v2056_v62, %v2055_v61 }
 0x101   :  { %2624 = vmatpush1.bf16.msra.mxu1 %v2104_v30  ;;  %v2171_v30 = vpack.c.bf16 %v2052_v22, %v2051_v21  ;;  %v1268_v21 = vmul.f32 %v5434_v38, %v621_v5  ;;  %v1261_v22 = vmul.f32 %v5437_v44, %v614_v7 }
 0x102   :  { %3364 = vmatpush1.bf16.msra.mxu0 %v2168_v34  ;;  %2625 = vmatprep.subr.bf16.mxu1 %v4385_v0  ;;  %v1207_v34 = vmul.f32 %v5455_v57, %v560_v19  ;;  %v2058_v19 = vld [vmem:[%s7281_s1 + $0x6f8] sm:$0xff] }
 0x103   :  { %2493 = vmatmul.mubr.bf16.gmra.mrb[20].mxu1 %v1627_v40  ;;  %3365 = vmatprep.subr.bf16.mxu0 %v4385_v0  ;;  %v2054_v40 = vld [vmem:[%s7281_s1 + $0x6d8] sm:$0xff] }
 0x104   :  { %3233 = vmatmul.mubr.bf16.gmra.mrb[20].mxu0 %v1635_v47  ;;  %2500 = vmatprep.mubr.bf16.mxu1 %v1643_v48  ;;  %v1246_v47 = vmul.f32 %v5437_v44, %v599_v39  ;;  %v5917_v48 = vld [vmem:[%s7283_s2 + $0x440] sm:$0xff]  ;;  %v2172_v60 = vpack.c.bf16 %v2054_v40, %v2053_v37  ;;  %v1657_v3 = vpack.c.bf16 %v1207_v34, %v1192_v33  ;;  %v194_v39 = vld [vmem:[%s7283_s2 + $0x4d8] sm:$0xff]  ;;  %v613_v33 = vunpack.c.l.bf16 %v5927_v50 }
 0x105   :  { %3240 = vmatprep.mubr.bf16.mxu0 %v1651_v51  ;;  %2626 = vmatpush1.bf16.msra.mxu1 %v2105_v54  ;;  %v2108_v51 = vpack.c.bf16 %v1926_v32, %v1925_v42  ;;  %v5934_v54 = vld [vmem:[%s7283_s2 + $0x49c] sm:$0xff]  ;;  %v606_v4 = vunpack.c.h.bf16 %v5917_v48  ;;  %v605_v28 = vunpack.c.l.bf16 %v5917_v48  ;;  %v620_v32 = vunpack.c.l.bf16 %v5922_v49 }
 0x106   :  { %3366 = vmatpush1.bf16.msra.mxu0 %v2169_v56  ;;  %2627 = vmatprep.subr.bf16.mxu1 %v4385_v0  ;;  %v1928_v56 = vld [vmem:[%s7281_s1 + $0x2e8] sm:$0xff]  ;;  %v1681_v6 = vpack.c.bf16 %v1246_v47, %v1231_v46  ;;  %v629_v8 = vunpack.c.h.bf16 %v5934_v54  ;;  %v628_v34 = vunpack.c.l.bf16 %v5934_v54  ;;  %v636_v37 = vunpack.c.h.bf16 %v190_v24 }
 0x107   :  { %3367 = vmatprep.subr.bf16.mxu0 %v4385_v0  ;;  %v2109_v9 = vpack.c.bf16 %v1928_v56, %v1927_v55  ;;  %v1253_v20 = vmul.f32 %v5434_v38, %v606_v4  ;;  %v651_v40 = vunpack.c.h.bf16 %v198_v25  ;;  %v644_v43 = vunpack.c.h.bf16 %v194_v39  ;;  %v214_v55 = vld [vmem:[%s7283_s2 + $0x56c] sm:$0xff] }
 0x108   :  { %v1252_v46 = vmul.f32 %v5455_v57, %v605_v28  ;;  %v1267_v47 = vmul.f32 %v5455_v57, %v620_v32  ;;  %v1260_v48 = vmul.f32 %v5464_v2, %v613_v33  ;;  %v1275_v49 = vmul.f32 %v5464_v2, %v628_v34 }
 0x109   :  { %2628 = vmatpush1.bf16.msra.mxu1 %v2106_v10  ;;  %v1222_v10 = vmul.f32 %v5455_v57, %v575_v52  ;;  %v1688_v36 = vpack.c.bf16 %v1268_v21, %v1253_v20  ;;  %v4386_v50 = vmov 0.0   ;;  %v1298_v52 = vmul.f32 %v5434_v38, %v651_v40  ;;  %v230_v20 = vld [vmem:[%s7283_s2 + $0x5e4] sm:$0xff] }
 0x10a   :  { %3368 = vmatpush1.bf16.msra.mxu0 %v2170_v13  ;;  %2629 = vmatprep.subr.bf16.mxu1 %v4385_v0  ;;  %v1929_v13 = vld [vmem:[%s7281_s1 + $0x2f0] sm:$0xff]  ;;  %v635_v56 = vunpack.c.l.bf16 %v190_v24  ;;  %v1687_v61 = vpack.c.bf16 %v1267_v47, %v1252_v46  ;;  %v1695_v62 = vpack.c.bf16 %v1275_v49, %v1260_v48  ;;  %v238_v47 = vld [vmem:[%s7283_s2 + $0x620] sm:$0xff] }
 0x10b   :  { %2501 = vmatmul.mubr.bf16.gmra.mrb[24].mxu1 %v1642_v11  ;;  %3369 = vmatprep.subr.bf16.mxu0 %v4385_v0  ;;  %v1237_v11 = vmul.f32 %v5455_v57, %v590_v53  ;;  %v2110_v26 = vpack.c.bf16 %v1930_v14, %v1929_v13  ;;  %v1291_v53 = vmul.f32 %v5437_v44, %v644_v43  ;;  %v246_v48 = vld [vmem:[%s7283_s2 + $0x65c] sm:$0xff] }
 0x10c   :  { %3241 = vmatmul.mubr.bf16.gmra.mrb[24].mxu0 %v1650_v17  ;;  %2508 = vmatprep.mubr.bf16.mxu1 %v1658_v23  ;;  %v1245_v17 = vmul.f32 %v5464_v2, %v598_v59  ;;  %v1276_v23 = vmul.f32 %v5437_v44, %v629_v8  ;;  %v218_v59 = vld [vmem:[%s7283_s2 + $0x58c] sm:$0xff]  ;;  %v674_v8 = vunpack.c.h.bf16 %v210_v58 }
 0x10d   :  { %3248 = vmatprep.mubr.bf16.mxu0 %v1666_v27  ;;  %2630 = vmatpush1.bf16.msra.mxu1 %v2107_v29  ;;  %v1672_v27 = vpack.c.bf16 %v1237_v11, %v1222_v10  ;;  %v202_v29 = vld [vmem:[%s7283_s2 + $0x514] sm:$0xff]  ;;  %v1282_v10 = vmul.f32 %v5455_v57, %v635_v56 }
 0x10e   :  { %3370 = vmatpush1.bf16.msra.mxu0 %v2171_v30  ;;  %2631 = vmatprep.subr.bf16.mxu1 %v4385_v0  ;;  %v2174_v30 = vpack.c.bf16 %v2058_v19, %v2057_v18  ;;  %v1680_v42 = vpack.c.bf16 %v1245_v17, %v1230_v16  ;;  %v1696_v41 = vpack.c.bf16 %v1276_v23, %v1261_v22  ;;  %v659_v45 = vunpack.c.h.bf16 %v202_v29  ;;  %v222_v19 = vld [vmem:[%s7283_s2 + $0x5a8] sm:$0xff] }
 0x10f   :  { %3371 = vmatprep.subr.bf16.mxu0 %v4385_v0  ;;  %v658_v4 = vunpack.c.l.bf16 %v202_v29  ;;  %v1321_v17 = vmul.f32 %v5437_v44, %v674_v8  ;;  %v226_v22 = vld [vmem:[%s7283_s2 + $0x5c8] sm:$0xff]  ;;  %v696_v29 = vunpack.c.h.bf16 %v222_v19  ;;  %v695_v49 = vunpack.c.l.bf16 %v222_v19 }
 0x110   :  { %v1306_v54 = vmul.f32 %v5437_v44, %v659_v45  ;;  %v234_v23 = vld [vmem:[%s7283_s2 + $0x604] sm:$0xff]  ;;  %v704_v32 = vunpack.c.h.bf16 %v226_v22 }
 0x111   :  { %2632 = vmatpush1.bf16.msra.mxu1 %v2108_v51  ;;  %v1283_v51 = vmul.f32 %v5434_v38, %v636_v37  ;;  %v1305_v13 = vmul.f32 %v5464_v2, %v658_v4  ;;  %v719_v33 = vunpack.c.h.bf16 %v234_v23 }
 0x112   :  { %3372 = vmatpush1.bf16.msra.mxu0 %v2172_v60  ;;  %2633 = vmatprep.subr.bf16.mxu1 %v4385_v0  ;;  %v206_v60 = vld [vmem:[%s7283_s2 + $0x530] sm:$0xff]  ;;  %v1711_v7 = vpack.c.bf16 %v1306_v54, %v1291_v53  ;;  %v1351_v45 = vmul.f32 %v5437_v44, %v704_v32  ;;  %v250_v53 = vld [vmem:[%s7283_s2 + $0x67c] sm:$0xff] }
 0x113   :  { %2509 = vmatmul.mubr.bf16.gmra.mrb[28].mxu1 %v1657_v3  ;;  %3373 = vmatprep.subr.bf16.mxu0 %v4385_v0  ;;  %v650_v3 = vunpack.c.l.bf16 %v198_v25  ;;  %v666_v5 = vunpack.c.h.bf16 %v206_v60  ;;  %v665_v24 = vunpack.c.l.bf16 %v206_v60  ;;  %v680_v25 = vunpack.c.l.bf16 %v214_v55 }
 0x114   :  { %3249 = vmatmul.mubr.bf16.gmra.mrb[28].mxu0 %v1665_v63  ;;  %2516 = vmatprep.mubr.bf16.mxu1 %v1673_v1  ;;  %v643_v63 = vunpack.c.l.bf16 %v194_v39  ;;  %v1703_v1 = vpack.c.bf16 %v1298_v52, %v1283_v51  ;;  %v1366_v46 = vmul.f32 %v5437_v44, %v719_v33  ;;  %v710_v51 = vunpack.c.l.bf16 %v230_v20  ;;  %v242_v52 = vld [vmem:[%s7283_s2 + $0x640] sm:$0xff] }
 0x115   :  { %3256 = vmatprep.mubr.bf16.mxu0 %v1681_v6  ;;  %2634 = vmatpush1.bf16.msra.mxu1 %v2109_v9  ;;  %v681_v6 = vunpack.c.h.bf16 %v214_v55  ;;  %v689_v9 = vunpack.c.h.bf16 %v218_v59  ;;  %v1297_v11 = vmul.f32 %v5455_v57, %v650_v3  ;;  %v1313_v14 = vmul.f32 %v5434_v38, %v666_v5 }
 0x116   :  { %3374 = vmatpush1.bf16.msra.mxu0 %v2173_v12  ;;  %2635 = vmatprep.subr.bf16.mxu1 %v4385_v0  ;;  %v1290_v12 = vmul.f32 %v5464_v2, %v643_v63  ;;  %v1312_v34 = vmul.f32 %v5455_v57, %v665_v24  ;;  %v703_v55 = vunpack.c.l.bf16 %v226_v22  ;;  %v718_v3 = vunpack.c.l.bf16 %v234_v23 }
 0x117   :  { %3375 = vmatprep.subr.bf16.mxu0 %v4385_v0  ;;  %v1328_v16 = vmul.f32 %v5434_v38, %v681_v6  ;;  %v1336_v18 = vmul.f32 %v5437_v44, %v689_v9  ;;  %v1702_v21 = vpack.c.bf16 %v1297_v11, %v1282_v10  ;;  %v749_v63 = vunpack.c.h.bf16 %v250_v53  ;;  %v254_v11 = vld [vmem:[%s7283_s2 + $0x698] sm:$0xff] }
 0x118   :  { %v1710_v28 = vpack.c.bf16 %v1305_v13, %v1290_v12  ;;  %v1357_v4 = vmul.f32 %v5455_v57, %v710_v51  ;;  %v1350_v5 = vmul.f32 %v5464_v2, %v703_v55  ;;  %v1365_v6 = vmul.f32 %v5464_v2, %v718_v3  ;;  %v262_v12 = vld [vmem:[%s7283_s2 + $0x6d4] sm:$0xff] }
 0x119   :  { %2636 = vmatpush1.bf16.msra.mxu1 %v2110_v26  ;;  %v673_v26 = vunpack.c.l.bf16 %v210_v58  ;;  %v1718_v39 = vpack.c.bf16 %v1328_v16, %v1313_v14  ;;  %v726_v58 = vunpack.c.h.bf16 %v238_v47  ;;  %v1396_v10 = vmul.f32 %v5437_v44, %v749_v63  ;;  %v258_v14 = vld [vmem:[%s7283_s2 + $0x6b8] sm:$0xff] }
 0x11a   :  { %3376 = vmatpush1.bf16.msra.mxu0 %v2174_v30  ;;  %2790 = vmatprep.subr.bf16.mxu1 %v4385_v0  ;;  %v711_v30 = vunpack.c.h.bf16 %v230_v20  ;;  %v266_v16 = vld [vmem:[%s7283_s2 + $0x6f4] sm:$0xff]  ;;  %v733_v19 = vunpack.c.l.bf16 %v242_v52  ;;  %v748_v20 = vunpack.c.l.bf16 %v250_v53  ;;  %v756_v23 = vunpack.c.h.bf16 %v254_v11 }
 0x11b   :  { %2517 = vmatmul.mubr.bf16.gmra.mrb[32].mxu1 %v1672_v27  ;;  %3800 = vmatprep.subr.bf16.mxu0 %v4386_v50  ;;  %v688_v27 = vunpack.c.l.bf16 %v218_v59  ;;  %v1320_v37 = vmul.f32 %v5464_v2, %v673_v26  ;;  %v741_v59 = vunpack.c.h.bf16 %v246_v48  ;;  %v771_v24 = vunpack.c.h.bf16 %v262_v12 }
 0x11c   :  { %3257 = vmatmul.mubr.bf16.gmra.mrb[32].mxu0 %v1680_v42  ;;  %2524 = vmatprep.mubr.bf16.mxu1 %v1688_v36  ;;  %v1726_v42 = vpack.c.bf16 %v1336_v18, %v1321_v17  ;;  %v1327_v36 = vmul.f32 %v5455_v57, %v680_v25  ;;  %v1358_v43 = vmul.f32 %v5434_v38, %v711_v30  ;;  %v725_v17 = vunpack.c.l.bf16 %v238_v47 }
 0x11d   :  { %3264 = vmatprep.mubr.bf16.mxu0 %v1696_v41  ;;  %v1335_v40 = vmul.f32 %v5464_v2, %v688_v27  ;;  %v1343_v41 = vmul.f32 %v5434_v38, %v696_v29  ;;  %v1388_v8 = vmul.f32 %v5434_v38, %v741_v59  ;;  %v740_v18 = vunpack.c.l.bf16 %v246_v48 }
 0x11e   :  { %v1717_v54 = vpack.c.bf16 %v1327_v36, %v1312_v34  ;;  %v764_v26 = vunpack.c.h.bf16 %v258_v14  ;;  %v779_v27 = vunpack.c.h.bf16 %v266_v16  ;;  %v1380_v29 = vmul.f32 %v5464_v2, %v733_v19  ;;  %v270_v36 = vld [vmem:[%s7283_s2 + $0x710] sm:$0xff] }
 0x11f   :  { %v1725_v60 = vpack.c.bf16 %v1335_v40, %v1320_v37  ;;  %v1733_v56 = vpack.c.bf16 %v1358_v43, %v1343_v41  ;;  %v1395_v30 = vmul.f32 %v5464_v2, %v748_v20  ;;  %v1418_v32 = vmul.f32 %v5434_v38, %v771_v24  ;;  %v278_v37 = vld [vmem:[%s7283_s2 + $0x74c] sm:$0xff] }
 0x120   :  { %v1411_v33 = vmul.f32 %v5437_v44, %v764_v26  ;;  %v1426_v34 = vmul.f32 %v5437_v44, %v779_v27  ;;  %v755_v40 = vunpack.c.l.bf16 %v254_v11  ;;  %v770_v41 = vunpack.c.l.bf16 %v262_v12  ;;  %v274_v43 = vld [vmem:[%s7283_s2 + $0x730] sm:$0xff] }
 0x121   :  { %v1755_v47 = vpack.c.bf16 %v1395_v30, %v1380_v29  ;;  %v763_v48 = vunpack.c.l.bf16 %v258_v14  ;;  %v778_v51 = vunpack.c.l.bf16 %v266_v16  ;;  %v801_v53 = vunpack.c.h.bf16 %v278_v37  ;;  %v310_v29 = vld [vmem:[%s7283_s2 + $0x83c] sm:$0xff] }
 0x122   :  { %v1417_v3 = vmul.f32 %v5455_v57, %v770_v41  ;;  %v793_v11 = vunpack.c.l.bf16 %v274_v43 }
 0x123   :  { %2525 = vmatmul.mubr.bf16.gmra.mrb[36].mxu1 %v1687_v61  ;;  %v1741_v61 = vpack.c.bf16 %v1366_v46, %v1351_v45  ;;  %v282_v45 = vld [vmem:[%s7283_s2 + $0x76c] sm:$0xff]  ;;  %v1425_v59 = vmul.f32 %v5464_v2, %v778_v51 }
 0x124   :  { %3265 = vmatmul.mubr.bf16.gmra.mrb[36].mxu0 %v1695_v62  ;;  %2532 = vmatprep.mubr.bf16.mxu1 %v1703_v1  ;;  %v734_v62 = vunpack.c.h.bf16 %v242_v52  ;;  %v1342_v1 = vmul.f32 %v5455_v57, %v695_v49  ;;  %v786_v52 = vunpack.c.h.bf16 %v270_v36  ;;  %v809_v55 = vunpack.c.h.bf16 %v282_v45 }
 0x125   :  { %3272 = vmatprep.mubr.bf16.mxu0 %v1711_v7  ;;  %v1373_v7 = vmul.f32 %v5434_v38, %v726_v58  ;;  %v1410_v58 = vmul.f32 %v5464_v2, %v763_v48  ;;  %v808_v12 = vunpack.c.l.bf16 %v282_v45  ;;  %v861_v45 = vunpack.c.h.bf16 %v310_v29 }
 0x126   :  { %v1381_v9 = vmul.f32 %v5437_v44, %v734_v62  ;;  %v1732_v13 = vpack.c.bf16 %v1357_v4, %v1342_v1  ;;  %v1448_v62 = vmul.f32 %v5434_v38, %v801_v53  ;;  %v1456_v1 = vmul.f32 %v5437_v44, %v809_v55  ;;  %v286_v4 = vld [vmem:[%s7283_s2 + $0x788] sm:$0xff] }
 0x127   :  { %v1748_v22 = vpack.c.bf16 %v1388_v8, %v1373_v7  ;;  %v290_v7 = vld [vmem:[%s7283_s2 + $0x7a8] sm:$0xff]  ;;  %v816_v16 = vunpack.c.h.bf16 %v286_v4  ;;  %v1455_v24 = vmul.f32 %v5464_v2, %v808_v12  ;;  %v815_v30 = vunpack.c.l.bf16 %v286_v4 }
 0x128   :  { %v1756_v25 = vpack.c.bf16 %v1396_v10, %v1381_v9  ;;  %v298_v8 = vld [vmem:[%s7283_s2 + $0x7e4] sm:$0xff]  ;;  %v785_v9 = vunpack.c.l.bf16 %v270_v36  ;;  %v800_v10 = vunpack.c.l.bf16 %v278_v37  ;;  %v824_v19 = vunpack.c.h.bf16 %v290_v7 }
 0x129   :  { %v839_v20 = vunpack.c.h.bf16 %v298_v8  ;;  %v823_v37 = vunpack.c.l.bf16 %v290_v7  ;;  %v838_v41 = vunpack.c.l.bf16 %v298_v8 }
 0x12a   :  { %v1471_v27 = vmul.f32 %v5437_v44, %v824_v19 }
 0x12b   :  { %2533 = vmatmul.mubr.bf16.gmra.mrb[40].mxu1 %v1702_v21  ;;  %v1740_v21 = vpack.c.bf16 %v1365_v6, %v1350_v5  ;;  %v294_v5 = vld [vmem:[%s7283_s2 + $0x7c4] sm:$0xff]  ;;  %v1485_v53 = vmul.f32 %v5464_v2, %v838_v41 }
 0x12c   :  { %3273 = vmatmul.mubr.bf16.gmra.mrb[40].mxu0 %v1710_v28  ;;  %2540 = vmatprep.mubr.bf16.mxu1 %v1718_v39  ;;  %v1372_v28 = vmul.f32 %v5455_v57, %v725_v17  ;;  %v1387_v39 = vmul.f32 %v5455_v57, %v740_v18  ;;  %v831_v17 = vunpack.c.h.bf16 %v294_v5 }
 0x12d   :  { %3280 = vmatprep.mubr.bf16.mxu0 %v1726_v42  ;;  %v1403_v42 = vmul.f32 %v5434_v38, %v756_v23  ;;  %v1440_v23 = vmul.f32 %v5464_v2, %v793_v11 }
 0x12e   :  { %v1747_v46 = vpack.c.bf16 %v1387_v39, %v1372_v28  ;;  %v1478_v26 = vmul.f32 %v5434_v38, %v831_v17  ;;  %v1486_v28 = vmul.f32 %v5437_v44, %v839_v20  ;;  %v302_v39 = vld [vmem:[%s7283_s2 + $0x800] sm:$0xff]  ;;  %v927_v20 = vsub.s32 5, %v4573_v15 }
 0x12f   :  { %v1763_v49 = vpack.c.bf16 %v1418_v32, %v1403_v42  ;;  %v830_v42 = vunpack.c.l.bf16 %v294_v5  ;;  %v306_v32 = vld [vmem:[%s7283_s2 + $0x820] sm:$0xff]  ;;  %v1785_v36 = vpack.c.bf16 %v1455_v24, %v1440_v23  ;;  %v31_v23 = vld [vmem:[%s7283_s2 + $0x10] sm:$0xff] }
 0x130   :  { %v853_v4 = vunpack.c.l.bf16 %v306_v32  ;;  %v39_v24 = vld [vmem:[%s7283_s2 + $0x4c] sm:$0xff] }
 0x131   :  { %v1477_v51 = vmul.f32 %v5455_v57, %v830_v42  ;;  %v338_v42 = vunpack.c.h.bf16 %v31_v23 }
 0x133   :  { %2541 = vmatmul.mubr.bf16.gmra.mrb[44].mxu1 %v1717_v54  ;;  %v1771_v54 = vpack.c.bf16 %v1426_v34, %v1411_v33  ;;  %v314_v33 = vld [vmem:[%s7283_s2 + $0x85c] sm:$0xff] }
 0x134   :  { %3281 = vmatmul.mubr.bf16.gmra.mrb[44].mxu0 %v1725_v60  ;;  %2548 = vmatprep.mubr.bf16.mxu1 %v1733_v56  ;;  %v794_v60 = vunpack.c.h.bf16 %v274_v43  ;;  %v1402_v56 = vmul.f32 %v5455_v57, %v755_v40  ;;  %v846_v43 = vunpack.c.h.bf16 %v302_v39  ;;  %v869_v48 = vunpack.c.h.bf16 %v314_v33 }
 0x135   :  { %3288 = vmatprep.mubr.bf16.mxu0 %v1741_v61  ;;  %v1433_v61 = vmul.f32 %v5434_v38, %v786_v52  ;;  %v1470_v52 = vmul.f32 %v5464_v2, %v823_v37  ;;  %v868_v5 = vunpack.c.l.bf16 %v314_v33  ;;  %v6180_v33 = vrot.slane %v4619_v31, %v927_v20 }
 0x136   :  { %v1441_v63 = vmul.f32 %v5437_v44, %v794_v60  ;;  %v1762_v6 = vpack.c.bf16 %v1417_v3, %v1402_v56  ;;  %v1508_v60 = vmul.f32 %v5434_v38, %v861_v45  ;;  %v1516_v56 = vmul.f32 %v5437_v44, %v869_v48  ;;  %v318_v3 = vld [vmem:[%s7283_s2 + $0x878] sm:$0xff] }
 0x137   :  { %v1778_v14 = vpack.c.bf16 %v1448_v62, %v1433_v61  ;;  %v322_v61 = vld [vmem:[%s7283_s2 + $0x898] sm:$0xff]  ;;  %v876_v8 = vunpack.c.h.bf16 %v318_v3  ;;  %v1515_v17 = vmul.f32 %v5464_v2, %v868_v5  ;;  %v985_v48 = vmul.f32 %v6180_v33, %v338_v42 }
 0x138   :  { %v1786_v18 = vpack.c.bf16 %v1456_v1, %v1441_v63  ;;  %v330_v62 = vld [vmem:[%s7283_s2 + $0x8d4] sm:$0xff]  ;;  %v845_v63 = vunpack.c.l.bf16 %v302_v39  ;;  %v860_v1 = vunpack.c.l.bf16 %v310_v29  ;;  %v884_v11 = vunpack.c.h.bf16 %v322_v61 }
 0x139   :  { %v899_v12 = vunpack.c.h.bf16 %v330_v62  ;;  %v883_v39 = vunpack.c.l.bf16 %v322_v61  ;;  %v898_v29 = vunpack.c.l.bf16 %v330_v62 }
 0x13b   :  { %2549 = vmatmul.mubr.bf16.gmra.mrb[48].mxu1 %v1732_v13  ;;  %v1770_v13 = vpack.c.bf16 %v1425_v59, %v1410_v58  ;;  %v326_v58 = vld [vmem:[%s7283_s2 + $0x8b4] sm:$0xff]  ;;  %v1530_v45 = vmul.f32 %v5464_v2, %v883_v39 }
 0x13c   :  { %3289 = vmatmul.mubr.bf16.gmra.mrb[48].mxu0 %v1740_v21  ;;  %2556 = vmatprep.mubr.bf16.mxu1 %v1748_v22  ;;  %v1432_v21 = vmul.f32 %v5455_v57, %v785_v9  ;;  %v1447_v22 = vmul.f32 %v5455_v57, %v800_v10  ;;  %v891_v9 = vunpack.c.h.bf16 %v326_v58 }
 0x13d   :  { %3296 = vmatprep.mubr.bf16.mxu0 %v1756_v25  ;;  %v1463_v25 = vmul.f32 %v5434_v38, %v816_v16  ;;  %v1500_v16 = vmul.f32 %v5464_v2, %v853_v4 }
 0x13e   :  { %v1777_v34 = vpack.c.bf16 %v1447_v22, %v1432_v21  ;;  %v1538_v19 = vmul.f32 %v5434_v38, %v891_v9  ;;  %v1531_v21 = vmul.f32 %v5437_v44, %v884_v11  ;;  %v1546_v22 = vmul.f32 %v5437_v44, %v899_v12  ;;  %v1931_v12 = vld [vmem:[%s7281_s1 + $0x300] sm:$0xff] }
 0x13f   :  { %v1793_v40 = vpack.c.bf16 %v1478_v26, %v1463_v25  ;;  %v875_v25 = vunpack.c.l.bf16 %v318_v3  ;;  %v890_v26 = vunpack.c.l.bf16 %v326_v58  ;;  %v51_v3 = vld [vmem:[%s7283_s2 + $0xa8] sm:$0xff] }
 0x140   :  { %v59_v58 = vld [vmem:[%s7283_s2 + $0xe4] sm:$0xff] }
 0x141   :  { %v1522_v41 = vmul.f32 %v5455_v57, %v875_v25  ;;  %v6245_v25 = vld [vmem:[%s7283_s2 + $0x120] sm:$0xff] }
 0x143   :  { %2557 = vmatmul.mubr.bf16.gmra.mrb[52].mxu1 %v1747_v46  ;;  %v1801_v46 = vpack.c.bf16 %v1486_v28, %v1471_v27  ;;  %v43_v27 = vld [vmem:[%s7283_s2 + $0x6c] sm:$0xff] }
 0x144   :  { %3297 = vmatmul.mubr.bf16.gmra.mrb[52].mxu0 %v1755_v47  ;;  %2564 = vmatprep.mubr.bf16.mxu1 %v1763_v49  ;;  %v854_v47 = vunpack.c.h.bf16 %v306_v32  ;;  %v1462_v49 = vmul.f32 %v5455_v57, %v815_v30  ;;  %v353_v32 = vunpack.c.h.bf16 %v39_v24  ;;  %v361_v37 = vunpack.c.h.bf16 %v43_v27 }
 0x145   :  { %3304 = vmatprep.mubr.bf16.mxu0 %v1771_v54  ;;  %v1493_v54 = vmul.f32 %v5434_v38, %v846_v43  ;;  %v1537_v43 = vmul.f32 %v5455_v57, %v890_v26  ;;  %v360_v62 = vunpack.c.l.bf16 %v43_v27  ;;  %v6250_v26 = vld [vmem:[%s7283_s2 + $0x15c] sm:$0xff]  ;;  %v375_v27 = vunpack.c.l.bf16 %v51_v3 }
 0x146   :  { %v1501_v55 = vmul.f32 %v5437_v44, %v854_v47  ;;  %v1792_v59 = vpack.c.bf16 %v1477_v51, %v1462_v49  ;;  %v1815_v44 = vpack.c.bf16 %v1515_v17, %v1500_v16  ;;  %v923_v47 = vsub.s32 4, %v4573_v15 }
 0x147   :  { %v1808_v7 = vpack.c.bf16 %v1508_v60, %v1493_v54  ;;  %v1000_v49 = vmul.f32 %v6180_v33, %v353_v32  ;;  %v337_v60 = vunpack.c.l.bf16 %v31_v23 }
 0x148   :  { %v1816_v10 = vpack.c.bf16 %v1516_v56, %v1501_v55  ;;  %v352_v55 = vunpack.c.l.bf16 %v39_v24  ;;  %v6201_v56 = vrot.slane %v4619_v31, %v923_v47 }
 0x14a   :  { %v999_v9 = vmul.f32 %v6201_v56, %v352_v55  ;;  %v6282_v55 = vld [vmem:[%s7283_s2 + $0x178] sm:$0xff] }
 0x14b   :  { %2565 = vmatmul.mubr.bf16.gmra.mrb[56].mxu1 %v1762_v6  ;;  %v1800_v6 = vpack.c.bf16 %v1485_v53, %v1470_v52  ;;  %v1822_v53 = vpack.c.bf16 %v1537_v43, %v1522_v41  ;;  %v421_v41 = vunpack.c.h.bf16 %v6250_v26 }
 0x14c   :  { %3305 = vmatmul.mubr.bf16.gmra.mrb[56].mxu0 %v1770_v13  ;;  %2572 = vmatprep.mubr.bf16.mxu1 %v1778_v14  ;;  %v1492_v13 = vmul.f32 %v5455_v57, %v845_v63  ;;  %v1507_v14 = vmul.f32 %v5455_v57, %v860_v1  ;;  %v47_v57 = vld [vmem:[%s7283_s2 + $0x88] sm:$0xff]  ;;  %v6210_v63 = vrot.slane %v4623_v35, %v923_v47  ;;  %v2061_v47 = vld [vmem:[%s7281_s1 + $0x710] sm:$0xff] }
 0x14d   :  { %3312 = vmatprep.mubr.bf16.mxu0 %v1786_v18  ;;  %v1523_v18 = vmul.f32 %v5434_v38, %v876_v8  ;;  %v35_v38 = vld [vmem:[%s7283_s2 + $0x30] sm:$0xff]  ;;  %v368_v4 = vunpack.c.h.bf16 %v47_v57  ;;  %v984_v8 = vmul.f32 %v6201_v56, %v337_v60  ;;  %v367_v23 = vunpack.c.l.bf16 %v47_v57  ;;  %v1935_v60 = vld [vmem:[%s7281_s1 + $0x320] sm:$0xff] }
 0x14e   :  { %v1807_v28 = vpack.c.bf16 %v1507_v14, %v1492_v13  ;;  %v345_v61 = vunpack.c.l.bf16 %v35_v38  ;;  %v1007_v11 = vmul.f32 %v6210_v63, %v360_v62  ;;  %v1932_v13 = vld [vmem:[%s7281_s1 + $0x308] sm:$0xff]  ;;  %v2059_v14 = vld [vmem:[%s7281_s1 + $0x700] sm:$0xff]  ;;  %v83_v62 = vld [vmem:[%s7283_s2 + $0x198] sm:$0xff] }
 0x14f   :  { %v1823_v30 = vpack.c.bf16 %v1538_v19, %v1523_v18  ;;  %v1015_v16 = vmul.f32 %v6180_v33, %v368_v4  ;;  %v6230_v18 = vld [vmem:[%s7283_s2 + $0x100] sm:$0xff]  ;;  %v2111_v39 = vpack.c.bf16 %v1932_v13, %v1931_v12 }
 0x150   :  { %v6235_v19 = vld [vmem:[%s7283_s2 + $0x13c] sm:$0xff] }
 0x153   :  { %2573 = vmatmul.mubr.bf16.gmra.mrb[60].mxu1 %v1777_v34  ;;  %v1831_v34 = vpack.c.bf16 %v1546_v22, %v1531_v21 }
 0x154   :  { %3313 = vmatmul.mubr.bf16.gmra.mrb[60].mxu0 %v1785_v36  ;;  %2580 = vmatprep.mubr.bf16.mxu1 %v1793_v40  ;;  %v346_v36 = vunpack.c.h.bf16 %v35_v38  ;;  %v6183_v40 = vrot.slane %v4623_v35, %v927_v20  ;;  %v2060_v20 = vld [vmem:[%s7281_s1 + $0x708] sm:$0xff]  ;;  %v1554_v38 = vpack.c.bf16 %v999_v9, %v984_v8  ;;  %v420_v9 = vunpack.c.l.bf16 %v6250_v26 }
 0x155   :  { %3320 = vmatprep.mubr.bf16.mxu0 %v1801_v46  ;;  %v1545_v46 = vmul.f32 %v5464_v2, %v898_v29  ;;  %v55_v2 = vld [vmem:[%s7283_s2 + $0xc4] sm:$0xff]  ;;  %v398_v29 = vunpack.c.h.bf16 %v6230_v18  ;;  %v2175_v42 = vpack.c.bf16 %v2060_v20, %v2059_v14  ;;  %v436_v14 = vunpack.c.h.bf16 %v83_v62 }
 0x156   :  { %v993_v51 = vmul.f32 %v6183_v40, %v346_v36  ;;  %v1008_v52 = vmul.f32 %v6183_v40, %v361_v37  ;;  %v383_v5 = vunpack.c.h.bf16 %v55_v2  ;;  %v382_v24 = vunpack.c.l.bf16 %v55_v2  ;;  %v1934_v36 = vld [vmem:[%s7281_s1 + $0x318] sm:$0xff] }
 0x157   :  { %v1830_v54 = vpack.c.bf16 %v1545_v46, %v1530_v45  ;;  %v406_v37 = vunpack.c.h.bf16 %v6245_v25  ;;  %v1014_v45 = vmul.f32 %v6201_v56, %v367_v23 }
 0x158   :  { %v1563_v1 = vpack.c.bf16 %v1008_v52, %v993_v51  ;;  %v1030_v17 = vmul.f32 %v6180_v33, %v383_v5  ;;  %v1029_v46 = vmul.f32 %v6201_v56, %v382_v24  ;;  %v397_v5 = vunpack.c.l.bf16 %v6230_v18  ;;  %v1938_v18 = vld [vmem:[%s7281_s1 + $0x338] sm:$0xff] }
 0x159   :  { %v1053_v2 = vmul.f32 %v6183_v40, %v406_v37 }
 0x15a   :  { %v1570_v32 = vpack.c.bf16 %v1030_v17, %v1015_v16  ;;  %v1937_v17 = vld [vmem:[%s7281_s1 + $0x330] sm:$0xff] }
 0x15b   :  { %2581 = vmatmul.mubr.bf16.gmra.mrb[64].mxu1 %v1792_v59  ;;  %v1555_v59 = vpack.c.bf16 %v1000_v49, %v985_v48  ;;  %v2062_v48 = vld [vmem:[%s7281_s1 + $0x718] sm:$0xff]  ;;  %v1022_v49 = vmul.f32 %v6210_v63, %v375_v27  ;;  %v6324_v27 = vld [vmem:[%s7283_s2 + $0x1f0] sm:$0xff] }
 0x15c   :  { %3321 = vmatmul.mubr.bf16.gmra.mrb[64].mxu0 %v1800_v6  ;;  %2588 = vmatprep.mubr.bf16.mxu1 %v1808_v7  ;;  %v376_v6 = vunpack.c.h.bf16 %v51_v3  ;;  %v391_v7 = vunpack.c.h.bf16 %v59_v58  ;;  %v6287_v3 = vld [vmem:[%s7283_s2 + $0x1b4] sm:$0xff] }
 0x15d   :  { %3328 = vmatprep.mubr.bf16.mxu0 %v1816_v10  ;;  %v992_v10 = vmul.f32 %v6210_v63, %v345_v61  ;;  %v1936_v61 = vld [vmem:[%s7281_s1 + $0x328] sm:$0xff] }
 0x15e   :  { %v1023_v21 = vmul.f32 %v6183_v40, %v376_v6  ;;  %v1038_v22 = vmul.f32 %v6183_v40, %v391_v7  ;;  %v412_v6 = vunpack.c.l.bf16 %v6235_v19  ;;  %v405_v7 = vunpack.c.l.bf16 %v6245_v25 }
 0x15f   :  { %v2113_v13 = vpack.c.bf16 %v1936_v61, %v1935_v60  ;;  %v1083_v25 = vmul.f32 %v6183_v40, %v436_v14  ;;  %v111_v61 = vld [vmem:[%s7283_s2 + $0x268] sm:$0xff] }
 0x160   :  { %v1578_v43 = vpack.c.bf16 %v1038_v22, %v1023_v21  ;;  %v1059_v20 = vmul.f32 %v6201_v56, %v412_v6  ;;  %v1052_v21 = vmul.f32 %v6210_v63, %v405_v7  ;;  %v1067_v22 = vmul.f32 %v6210_v63, %v420_v9  ;;  %v6383_v6 = vld [vmem:[%s7283_s2 + $0x2c4] sm:$0xff] }
 0x161   :  { %v1943_v7 = vld [vmem:[%s7281_s1 + $0x360] sm:$0xff] }
 0x163   :  { %2589 = vmatmul.mubr.bf16.gmra.mrb[68].mxu1 %v1807_v28  ;;  %v390_v28 = vunpack.c.l.bf16 %v59_v58  ;;  %v2176_v58 = vpack.c.bf16 %v2062_v48, %v2061_v47 }
 0x164   :  { %3329 = vmatmul.mubr.bf16.gmra.mrb[68].mxu0 %v1815_v44  ;;  %2596 = vmatprep.mubr.bf16.mxu1 %v1823_v30  ;;  %v1562_v44 = vpack.c.bf16 %v1007_v11, %v992_v10  ;;  %v413_v30 = vunpack.c.h.bf16 %v6235_v19  ;;  %v428_v10 = vunpack.c.h.bf16 %v6282_v55  ;;  %v443_v11 = vunpack.c.h.bf16 %v6287_v3 }
 0x165   :  { %3336 = vmatprep.mubr.bf16.mxu0 %v1831_v34  ;;  %v1933_v34 = vld [vmem:[%s7281_s1 + $0x310] sm:$0xff]  ;;  %v1037_v51 = vmul.f32 %v6210_v63, %v390_v28  ;;  %v1044_v19 = vmul.f32 %v6201_v56, %v397_v5 }
 0x166   :  { %v2112_v52 = vpack.c.bf16 %v1934_v36, %v1933_v34  ;;  %v1060_v57 = vmul.f32 %v6180_v33, %v413_v30  ;;  %v1075_v23 = vmul.f32 %v6180_v33, %v428_v10  ;;  %v1090_v24 = vmul.f32 %v6180_v33, %v443_v11  ;;  %v6329_v28 = vld [vmem:[%s7283_s2 + $0x22c] sm:$0xff] }
 0x167   :  { %v1577_v4 = vpack.c.bf16 %v1037_v51, %v1022_v49  ;;  %v6342_v30 = vld [vmem:[%s7283_s2 + $0x24c] sm:$0xff]  ;;  %v1584_v34 = vpack.c.bf16 %v1059_v20, %v1044_v19  ;;  %v435_v36 = vunpack.c.l.bf16 %v83_v62  ;;  %v119_v62 = vld [vmem:[%s7283_s2 + $0x2a4] sm:$0xff]  ;;  %v457_v10 = vunpack.c.l.bf16 %v6324_v27 }
 0x168   :  { %v481_v49 = vunpack.c.h.bf16 %v6342_v30  ;;  %v472_v11 = vunpack.c.l.bf16 %v6329_v28  ;;  %v480_v14 = vunpack.c.l.bf16 %v6342_v30  ;;  %v511_v20 = vunpack.c.h.bf16 %v6383_v6  ;;  %v6421_v30 = vld [vmem:[%s7283_s2 + $0x31c] sm:$0xff] }
 0x16b   :  { %2597 = vmatmul.mubr.bf16.gmra.mrb[72].mxu1 %v1822_v53  ;;  %v1045_v53 = vmul.f32 %v6180_v33, %v398_v29  ;;  %v442_v29 = vunpack.c.l.bf16 %v6287_v3 }
 0x16c   :  { %3337 = vmatmul.mubr.bf16.gmra.mrb[72].mxu0 %v1830_v54  ;;  %2637 = vmatprep.mubr.bf16.mxu1 %v1555_v59  ;;  %v1068_v54 = vmul.f32 %v6183_v40, %v421_v41  ;;  %v1569_v59 = vpack.c.bf16 %v1029_v46, %v1014_v45  ;;  %v1592_v41 = vpack.c.bf16 %v1067_v22, %v1052_v21  ;;  %v458_v45 = vunpack.c.h.bf16 %v6324_v27  ;;  %v1945_v22 = vld [vmem:[%s7281_s1 + $0x370] sm:$0xff] }
 0x16d   :  { %3377 = vmatprep.mubr.bf16.mxu0 %v1563_v1  ;;  %v91_v1 = vld [vmem:[%s7283_s2 + $0x1d4] sm:$0xff]  ;;  %v1585_v8 = vpack.c.bf16 %v1060_v57, %v1045_v53  ;;  %v473_v46 = vunpack.c.h.bf16 %v6329_v28  ;;  %v1089_v53 = vmul.f32 %v6201_v56, %v442_v29  ;;  %v6416_v29 = vld [vmem:[%s7283_s2 + $0x2e0] sm:$0xff] }
 0x16e   :  { %v1593_v12 = vpack.c.bf16 %v1068_v54, %v1053_v2  ;;  %v451_v16 = vunpack.c.h.bf16 %v91_v1  ;;  %v450_v37 = vunpack.c.l.bf16 %v91_v1  ;;  %v1941_v57 = vld [vmem:[%s7281_s1 + $0x350] sm:$0xff]  ;;  %v1942_v2 = vld [vmem:[%s7281_s1 + $0x358] sm:$0xff]  ;;  %v1082_v54 = vmul.f32 %v6210_v63, %v435_v36  ;;  %v6378_v1 = vld [vmem:[%s7283_s2 + $0x288] sm:$0xff] }
 0x16f   :  { %v1120_v3 = vmul.f32 %v6180_v33, %v473_v46  ;;  %v496_v19 = vunpack.c.h.bf16 %v6378_v1  ;;  %v502_v36 = vunpack.c.l.bf16 %v119_v62  ;;  %v495_v46 = vunpack.c.l.bf16 %v6378_v1 }
 0x170   :  { %v1098_v26 = vmul.f32 %v6183_v40, %v451_v16  ;;  %v1097_v60 = vmul.f32 %v6210_v63, %v450_v37  ;;  %v488_v16 = vunpack.c.h.bf16 %v111_v61  ;;  %v6431_v37 = vld [vmem:[%s7283_s2 + $0x33c] sm:$0xff] }
 0x172   :  { %v1608_v47 = vpack.c.bf16 %v1098_v26, %v1083_v25  ;;  %v1607_v9 = vpack.c.bf16 %v1097_v60, %v1082_v54  ;;  %v1119_v25 = vmul.f32 %v6201_v56, %v472_v11  ;;  %v1135_v27 = vmul.f32 %v6180_v33, %v488_v16  ;;  %v6475_v11 = vld [vmem:[%s7283_s2 + $0x3b4] sm:$0xff] }
 0x173   :  { %2638 = vmatmul.mubr.bf16.vlgmr.msra.gmra.mrb[0].mxu1 %v1554_v38  ;;  %v2114_v38 = vpack.c.bf16 %v1938_v18, %v1937_v17  ;;  %v503_v17 = vunpack.c.h.bf16 %v119_v62  ;;  %v517_v16 = vunpack.c.l.bf16 %v6416_v29 }
 0x174   :  { %3378 = vmatmul.mubr.bf16.vlgmr.msra.gmra.mrb[0].mxu0 %v1562_v44  ;;  %2791 = vmatpush1.bf16.msra.mxu1 %v2111_v39  ;;  %v6334_v44 = vld [vmem:[%s7283_s2 + $0x210] sm:$0xff]  ;;  %v427_v39 = vunpack.c.l.bf16 %v6282_v55  ;;  %v1105_v55 = vmul.f32 %v6180_v33, %v458_v45 }
 0x175   :  { %3801 = vmatpush3.bf16.msra.mxu0 %v2175_v42  ;;  %2645 = vmatprep.mubr.bf16.mxu1 %v1570_v32  ;;  %v1939_v42 = vld [vmem:[%s7281_s1 + $0x340] sm:$0xff]  ;;  %v1940_v32 = vld [vmem:[%s7281_s1 + $0x348] sm:$0xff]  ;;  %v466_v48 = vunpack.c.h.bf16 %v6334_v44  ;;  %v1150_v28 = vmul.f32 %v6180_v33, %v503_v17  ;;  %v532_v17 = vunpack.c.l.bf16 %v6421_v30 }
 0x176   :  { %3385 = vmatprep.mubr.bf16.mxu0 %v1578_v43  ;;  %2792 = vmatprep.subr.bf16.mxu1 %v4385_v0  ;;  %v1600_v43 = vpack.c.bf16 %v1090_v24, %v1075_v23  ;;  %v2115_v51 = vpack.c.bf16 %v1940_v32, %v1939_v42  ;;  %v1946_v23 = vld [vmem:[%s7281_s1 + $0x378] sm:$0xff]  ;;  %v1104_v24 = vmul.f32 %v6201_v56, %v457_v10  ;;  %v6426_v42 = vld [vmem:[%s7283_s2 + $0x300] sm:$0xff] }
 0x177   :  { %3802 = vmatprep.subr.bf16.mxu0 %v4386_v50  ;;  %v2118_v32 = vpack.c.bf16 %v1946_v23, %v1945_v22 }
 0x178   :  { %2793 = vmatpush1.bf16.msra.mxu1 %v2112_v52  ;;  %v1074_v52 = vmul.f32 %v6201_v56, %v427_v39  ;;  %v1158_v39 = vmul.f32 %v6183_v40, %v511_v20  ;;  %v1614_v45 = vpack.c.bf16 %v1119_v25, %v1104_v24  ;;  %v540_v20 = vunpack.c.l.bf16 %v6431_v37 }
 0x179   :  { %2794 = vmatprep.subr.bf16.mxu1 %v4385_v0  ;;  %3803 = vmatpush3.bf16.msra.mxu0 %v2176_v58  ;;  %v1113_v58 = vmul.f32 %v6183_v40, %v466_v48  ;;  %v571_v25 = vunpack.c.h.bf16 %v6475_v11 }
 0x17a   :  { %v1599_v5 = vpack.c.bf16 %v1089_v53, %v1074_v52  ;;  %v533_v52 = vunpack.c.h.bf16 %v6421_v30 }
 0x17b   :  { %2646 = vmatmul.mubr.bf16.gmra.mrb[4].mxu1 %v1569_v59  ;;  %v1128_v59 = vmul.f32 %v6183_v40, %v481_v49  ;;  %v1630_v49 = vpack.c.bf16 %v1150_v28, %v1135_v27  ;;  %v1954_v27 = vld [vmem:[%s7281_s1 + $0x3b8] sm:$0xff]  ;;  %v1164_v28 = vmul.f32 %v6201_v56, %v517_v16 }
 0x17c   :  { %3386 = vmatmul.mubr.bf16.gmra.mrb[4].mxu0 %v1577_v4  ;;  %2653 = vmatprep.mubr.bf16.mxu1 %v1585_v8  ;;  %v2116_v4 = vpack.c.bf16 %v1942_v2, %v1941_v57  ;;  %v1944_v8 = vld [vmem:[%s7281_s1 + $0x368] sm:$0xff]  ;;  %v526_v57 = vunpack.c.h.bf16 %v6426_v42  ;;  %v541_v2 = vunpack.c.h.bf16 %v6431_v37  ;;  %v1180_v1 = vmul.f32 %v6180_v33, %v533_v52 }
 0x17d   :  { %3393 = vmatprep.mubr.bf16.mxu0 %v1593_v12  ;;  %2795 = vmatpush1.bf16.msra.mxu1 %v2113_v13  ;;  %v465_v12 = vunpack.c.l.bf16 %v6334_v44  ;;  %v1615_v13 = vpack.c.bf16 %v1120_v3, %v1105_v55  ;;  %v1623_v18 = vpack.c.bf16 %v1128_v59, %v1113_v58  ;;  %v2117_v21 = vpack.c.bf16 %v1944_v8, %v1943_v7  ;;  %v1949_v3 = vld [vmem:[%s7281_s1 + $0x390] sm:$0xff]  ;;  %v1950_v58 = vld [vmem:[%s7281_s1 + $0x398] sm:$0xff] }
 0x17e   :  { %2796 = vmatprep.subr.bf16.mxu1 %v4385_v0  ;;  %v1143_v44 = vmul.f32 %v6183_v40, %v496_v19  ;;  %v1149_v55 = vmul.f32 %v6201_v56, %v502_v36  ;;  %v1142_v59 = vmul.f32 %v6210_v63, %v495_v46  ;;  %v151_v7 = vld [vmem:[%s7283_s2 + $0x394] sm:$0xff]  ;;  %v6513_v37 = vld [vmem:[%s7283_s2 + $0x40c] sm:$0xff] }
 0x17f   :  { %v1112_v26 = vmul.f32 %v6210_v63, %v465_v12  ;;  %v6470_v8 = vld [vmem:[%s7283_s2 + $0x378] sm:$0xff]  ;;  %v1951_v12 = vld [vmem:[%s7281_s1 + $0x3a0] sm:$0xff]  ;;  %v563_v22 = vunpack.c.h.bf16 %v151_v7  ;;  %v6508_v36 = vld [vmem:[%s7283_s2 + $0x3d0] sm:$0xff]  ;;  %v562_v46 = vunpack.c.l.bf16 %v151_v7 }
 0x180   :  { %v1638_v53 = vpack.c.bf16 %v1158_v39, %v1143_v44  ;;  %v556_v24 = vunpack.c.h.bf16 %v6470_v8  ;;  %v1179_v44 = vmul.f32 %v6201_v56, %v532_v17  ;;  %v555_v52 = vunpack.c.l.bf16 %v6470_v8  ;;  %v187_v17 = vld [vmem:[%s7283_s2 + $0x4a4] sm:$0xff] }
 0x181   :  { %2797 = vmatpush1.bf16.msra.mxu1 %v2114_v38  ;;  %v1127_v38 = vmul.f32 %v6210_v63, %v480_v14 }
 0x182   :  { %2798 = vmatprep.subr.bf16.mxu1 %v4385_v0 }
 0x183   :  { %2654 = vmatmul.mubr.bf16.gmra.mrb[8].mxu1 %v1584_v34  ;;  %v487_v34 = vunpack.c.l.bf16 %v111_v61  ;;  %v1622_v48 = vpack.c.bf16 %v1127_v38, %v1112_v26  ;;  %v1953_v38 = vld [vmem:[%s7281_s1 + $0x3b0] sm:$0xff] }
 0x184   :  { %3394 = vmatmul.mubr.bf16.gmra.mrb[8].mxu0 %v1592_v41  ;;  %2661 = vmatprep.mubr.bf16.mxu1 %v1600_v43  ;;  %v1947_v41 = vld [vmem:[%s7281_s1 + $0x380] sm:$0xff]  ;;  %v1948_v43 = vld [vmem:[%s7281_s1 + $0x388] sm:$0xff] }
 0x185   :  { %3401 = vmatprep.mubr.bf16.mxu0 %v1608_v47  ;;  %2799 = vmatpush1.bf16.msra.mxu1 %v2115_v51  ;;  %v510_v47 = vunpack.c.l.bf16 %v6383_v6  ;;  %v518_v51 = vunpack.c.h.bf16 %v6416_v29  ;;  %v2119_v54 = vpack.c.bf16 %v1948_v43, %v1947_v41  ;;  %v1134_v60 = vmul.f32 %v6201_v56, %v487_v34  ;;  %v143_v6 = vld [vmem:[%s7283_s2 + $0x358] sm:$0xff]  ;;  %v6518_v41 = vld [vmem:[%s7283_s2 + $0x3f0] sm:$0xff] }
 0x186   :  { %2800 = vmatprep.subr.bf16.mxu1 %v4385_v0  ;;  %v1187_v29 = vmul.f32 %v6210_v63, %v540_v20  ;;  %v1218_v34 = vmul.f32 %v6183_v40, %v571_v25  ;;  %v2122_v43 = vpack.c.bf16 %v1954_v27, %v1953_v38 }
 0x187   :  { %v1157_v61 = vmul.f32 %v6210_v63, %v510_v47  ;;  %v1165_v62 = vmul.f32 %v6180_v33, %v518_v51  ;;  %v1629_v10 = vpack.c.bf16 %v1149_v55, %v1134_v60  ;;  %v6523_v47 = vld [vmem:[%s7283_s2 + $0x42c] sm:$0xff]  ;;  %v1644_v51 = vpack.c.bf16 %v1179_v44, %v1164_v28 }
 0x188   :  { %v593_v60 = vunpack.c.h.bf16 %v6513_v37  ;;  %v600_v25 = vunpack.c.l.bf16 %v6523_v47  ;;  %v631_v44 = vunpack.c.h.bf16 %v187_v17 }
 0x189   :  { %2801 = vmatpush1.bf16.msra.mxu1 %v2116_v4  ;;  %v1173_v4 = vmul.f32 %v6183_v40, %v526_v57  ;;  %v1637_v14 = vpack.c.bf16 %v1157_v61, %v1142_v59  ;;  %v1645_v19 = vpack.c.bf16 %v1180_v1, %v1165_v62  ;;  %v1209_v62 = vmul.f32 %v6201_v56, %v562_v46  ;;  %v1957_v1 = vld [vmem:[%s7281_s1 + $0x3d0] sm:$0xff]  ;;  %v191_v46 = vld [vmem:[%s7283_s2 + $0x4c0] sm:$0xff] }
 0x18a   :  { %2802 = vmatprep.subr.bf16.mxu1 %v4385_v0  ;;  %v1240_v8 = vmul.f32 %v6180_v33, %v593_v60 }
 0x18b   :  { %2662 = vmatmul.mubr.bf16.gmra.mrb[12].mxu1 %v1599_v5  ;;  %v1188_v5 = vmul.f32 %v6183_v40, %v541_v2 }
 0x18c   :  { %3402 = vmatmul.mubr.bf16.gmra.mrb[12].mxu0 %v1607_v9  ;;  %2669 = vmatprep.mubr.bf16.mxu1 %v1615_v13  ;;  %v2120_v9 = vpack.c.bf16 %v1950_v58, %v1949_v3  ;;  %v1952_v13 = vld [vmem:[%s7281_s1 + $0x3a8] sm:$0xff]  ;;  %v586_v3 = vunpack.c.h.bf16 %v6518_v41  ;;  %v601_v58 = vunpack.c.h.bf16 %v6523_v47  ;;  %v199_v47 = vld [vmem:[%s7283_s2 + $0x4fc] sm:$0xff] }
 0x18d   :  { %3409 = vmatprep.mubr.bf16.mxu0 %v1623_v18  ;;  %2803 = vmatpush1.bf16.msra.mxu1 %v2117_v21  ;;  %v525_v18 = vunpack.c.l.bf16 %v6426_v42  ;;  %v548_v21 = vunpack.c.h.bf16 %v143_v6  ;;  %v1653_v23 = vpack.c.bf16 %v1188_v5, %v1173_v4  ;;  %v2121_v26 = vpack.c.bf16 %v1952_v13, %v1951_v12  ;;  %v1958_v4 = vld [vmem:[%s7281_s1 + $0x3d8] sm:$0xff]  ;;  %v183_v12 = vld [vmem:[%s7283_s2 + $0x484] sm:$0xff] }
 0x18e   :  { %2804 = vmatprep.subr.bf16.mxu1 %v4385_v0  ;;  %v1210_v42 = vmul.f32 %v6180_v33, %v563_v22  ;;  %v1202_v5 = vmul.f32 %v6210_v63, %v555_v52  ;;  %v179_v13 = vld [vmem:[%s7283_s2 + $0x468] sm:$0xff]  ;;  %v592_v22 = vunpack.c.l.bf16 %v6513_v37  ;;  %v623_v38 = vunpack.c.h.bf16 %v183_v12  ;;  %v195_v52 = vld [vmem:[%s7283_s2 + $0x4e0] sm:$0xff] }
 0x18f   :  { %v1172_v39 = vmul.f32 %v6210_v63, %v525_v18  ;;  %v1195_v30 = vmul.f32 %v6180_v33, %v548_v21  ;;  %v1959_v18 = vld [vmem:[%s7281_s1 + $0x3e0] sm:$0xff]  ;;  %v577_v21 = vunpack.c.l.bf16 %v6508_v36  ;;  %v616_v28 = vunpack.c.h.bf16 %v179_v13 }
 0x191   :  { %2805 = vmatpush1.bf16.msra.mxu1 %v2118_v32  ;;  %v1203_v32 = vmul.f32 %v6183_v40, %v556_v24  ;;  %v1652_v57 = vpack.c.bf16 %v1187_v29, %v1172_v39  ;;  %v1660_v2 = vpack.c.bf16 %v1210_v42, %v1195_v30  ;;  %v1961_v29 = vld [vmem:[%s7281_s1 + $0x3f0] sm:$0xff]  ;;  %v1962_v30 = vld [vmem:[%s7281_s1 + $0x3f8] sm:$0xff]  ;;  %v1224_v42 = vmul.f32 %v6201_v56, %v577_v21 }
 0x192   :  { %2806 = vmatprep.subr.bf16.mxu1 %v4385_v0 }
 0x193   :  { %2670 = vmatmul.mubr.bf16.gmra.mrb[16].mxu1 %v1614_v45  ;;  %v547_v45 = vunpack.c.l.bf16 %v143_v6  ;;  %v1668_v55 = vpack.c.bf16 %v1218_v34, %v1203_v32  ;;  %v1239_v32 = vmul.f32 %v6201_v56, %v592_v22 }
 0x194   :  { %3410 = vmatmul.mubr.bf16.gmra.mrb[16].mxu0 %v1622_v48  ;;  %2677 = vmatprep.mubr.bf16.mxu1 %v1630_v49  ;;  %v1955_v48 = vld [vmem:[%s7281_s1 + $0x3c0] sm:$0xff]  ;;  %v1956_v49 = vld [vmem:[%s7281_s1 + $0x3c8] sm:$0xff] }
 0x195   :  { %3417 = vmatprep.mubr.bf16.mxu0 %v1638_v53  ;;  %2807 = vmatpush1.bf16.msra.mxu1 %v2119_v54  ;;  %v570_v53 = vunpack.c.l.bf16 %v6475_v11  ;;  %v578_v54 = vunpack.c.h.bf16 %v6508_v36  ;;  %v2123_v59 = vpack.c.bf16 %v1956_v49, %v1955_v48  ;;  %v1194_v61 = vmul.f32 %v6201_v56, %v547_v45  ;;  %v175_v11 = vld [vmem:[%s7283_s2 + $0x448] sm:$0xff] }
 0x196   :  { %2808 = vmatprep.subr.bf16.mxu1 %v4385_v0  ;;  %v1247_v36 = vmul.f32 %v6210_v63, %v600_v25  ;;  %v1278_v45 = vmul.f32 %v6183_v40, %v631_v44  ;;  %v2126_v48 = vpack.c.bf16 %v1962_v30, %v1961_v29  ;;  %v607_v49 = vunpack.c.l.bf16 %v175_v11 }
 0x197   :  { %v1217_v6 = vmul.f32 %v6210_v63, %v570_v53  ;;  %v1225_v7 = vmul.f32 %v6180_v33, %v578_v54  ;;  %v1659_v16 = vpack.c.bf16 %v1209_v62, %v1194_v61  ;;  %v203_v53 = vld [vmem:[%s7283_s2 + $0x51c] sm:$0xff]  ;;  %v630_v54 = vunpack.c.l.bf16 %v187_v17 }
 0x198   :  { %v646_v61 = vunpack.c.h.bf16 %v195_v52  ;;  %v661_v62 = vunpack.c.h.bf16 %v203_v53  ;;  %v637_v17 = vunpack.c.l.bf16 %v191_v46  ;;  %v660_v21 = vunpack.c.l.bf16 %v203_v53 }
 0x199   :  { %2809 = vmatpush1.bf16.msra.mxu1 %v2120_v9  ;;  %v1233_v9 = vmul.f32 %v6183_v40, %v586_v3  ;;  %v1667_v20 = vpack.c.bf16 %v1217_v6, %v1202_v5  ;;  %v1675_v24 = vpack.c.bf16 %v1240_v8, %v1225_v7  ;;  %v638_v3 = vunpack.c.h.bf16 %v191_v46 }
 0x19a   :  { %2810 = vmatprep.subr.bf16.mxu1 %v4385_v0  ;;  %v1293_v8 = vmul.f32 %v6183_v40, %v646_v61  ;;  %v1307_v44 = vmul.f32 %v6210_v63, %v660_v21 }
 0x19b   :  { %2678 = vmatmul.mubr.bf16.gmra.mrb[20].mxu1 %v1629_v10  ;;  %v1248_v10 = vmul.f32 %v6183_v40, %v601_v58  ;;  %v653_v58 = vunpack.c.h.bf16 %v199_v47  ;;  %v1285_v6 = vmul.f32 %v6180_v33, %v638_v3 }
 0x19c   :  { %3418 = vmatmul.mubr.bf16.gmra.mrb[20].mxu0 %v1637_v14  ;;  %2685 = vmatprep.mubr.bf16.mxu1 %v1645_v19  ;;  %v2124_v14 = vpack.c.bf16 %v1958_v4, %v1957_v1  ;;  %v1960_v19 = vld [vmem:[%s7281_s1 + $0x3e8] sm:$0xff]  ;;  %v1254_v1 = vmul.f32 %v6201_v56, %v607_v49 }
 0x19d   :  { %3425 = vmatprep.mubr.bf16.mxu0 %v1653_v23  ;;  %2811 = vmatpush1.bf16.msra.mxu1 %v2121_v26  ;;  %v585_v23 = vunpack.c.l.bf16 %v6518_v41  ;;  %v608_v26 = vunpack.c.h.bf16 %v175_v11  ;;  %v1683_v27 = vpack.c.bf16 %v1248_v10, %v1233_v9  ;;  %v2125_v39 = vpack.c.bf16 %v1960_v19, %v1959_v18  ;;  %v207_v10 = vld [vmem:[%s7283_s2 + $0x538] sm:$0xff] }
 0x19e   :  { %2812 = vmatprep.subr.bf16.mxu1 %v4385_v0  ;;  %v1270_v41 = vmul.f32 %v6180_v33, %v623_v38  ;;  %v1300_v7 = vmul.f32 %v6180_v33, %v653_v58  ;;  %v1308_v9 = vmul.f32 %v6183_v40, %v661_v62  ;;  %v215_v11 = vld [vmem:[%s7283_s2 + $0x574] sm:$0xff]  ;;  %v652_v18 = vunpack.c.l.bf16 %v199_v47 }
 0x19f   :  { %v1232_v34 = vmul.f32 %v6210_v63, %v585_v23  ;;  %v1255_v37 = vmul.f32 %v6180_v33, %v608_v26  ;;  %v645_v19 = vunpack.c.l.bf16 %v195_v52  ;;  %v668_v22 = vunpack.c.h.bf16 %v207_v10 }
 0x1a0   :  { %v683_v23 = vunpack.c.h.bf16 %v215_v11  ;;  %v1284_v38 = vmul.f32 %v6201_v56, %v637_v17 }
 0x1a1   :  { %2813 = vmatpush1.bf16.msra.mxu1 %v2122_v43  ;;  %v1263_v43 = vmul.f32 %v6183_v40, %v616_v28  ;;  %v1682_v60 = vpack.c.bf16 %v1247_v36, %v1232_v34  ;;  %v1292_v28 = vmul.f32 %v6210_v63, %v645_v19  ;;  %v231_v34 = vld [vmem:[%s7283_s2 + $0x5ec] sm:$0xff]  ;;  %v667_v36 = vunpack.c.l.bf16 %v207_v10 }
 0x1a2   :  { %2814 = vmatprep.subr.bf16.mxu1 %v4385_v0  ;;  %v1330_v29 = vmul.f32 %v6180_v33, %v683_v23  ;;  %v713_v52 = vunpack.c.h.bf16 %v231_v34 }
 0x1a3   :  { %2686 = vmatmul.mubr.bf16.gmra.mrb[24].mxu1 %v1644_v51  ;;  %v622_v51 = vunpack.c.l.bf16 %v183_v12 }
 0x1a4   :  { %3426 = vmatmul.mubr.bf16.gmra.mrb[24].mxu0 %v1652_v57  ;;  %2693 = vmatprep.mubr.bf16.mxu1 %v1660_v2  ;;  %v1674_v57 = vpack.c.bf16 %v1239_v32, %v1224_v42  ;;  %v615_v2 = vunpack.c.l.bf16 %v179_v13  ;;  %v211_v13 = vld [vmem:[%s7283_s2 + $0x558] sm:$0xff]  ;;  %v223_v32 = vld [vmem:[%s7283_s2 + $0x5b0] sm:$0xff] }
 0x1a5   :  { %3433 = vmatprep.mubr.bf16.mxu0 %v1668_v55  ;;  %2815 = vmatpush1.bf16.msra.mxu1 %v2123_v59  ;;  %v1690_v55 = vpack.c.bf16 %v1270_v41, %v1255_v37  ;;  %v1698_v59 = vpack.c.bf16 %v1278_v45, %v1263_v43  ;;  %v1269_v4 = vmul.f32 %v6201_v56, %v622_v51  ;;  %v676_v25 = vunpack.c.h.bf16 %v211_v13  ;;  %v227_v41 = vld [vmem:[%s7283_s2 + $0x5d0] sm:$0xff] }
 0x1a6   :  { %2816 = vmatprep.subr.bf16.mxu1 %v4385_v0  ;;  %v1262_v5 = vmul.f32 %v6210_v63, %v615_v2  ;;  %v682_v37 = vunpack.c.l.bf16 %v215_v11  ;;  %v235_v43 = vld [vmem:[%s7283_s2 + $0x60c] sm:$0xff]  ;;  %v675_v46 = vunpack.c.l.bf16 %v211_v13  ;;  %v698_v51 = vunpack.c.h.bf16 %v223_v32 }
 0x1a7   :  { %v1689_v12 = vpack.c.bf16 %v1269_v4, %v1254_v1  ;;  %v1323_v30 = vmul.f32 %v6183_v40, %v676_v25  ;;  %v721_v2 = vunpack.c.h.bf16 %v235_v43  ;;  %v239_v1 = vld [vmem:[%s7283_s2 + $0x628] sm:$0xff]  ;;  %v705_v10 = vunpack.c.l.bf16 %v227_v41 }
 0x1a8   :  { %v1345_v58 = vmul.f32 %v6180_v33, %v698_v51  ;;  %v247_v4 = vld [vmem:[%s7283_s2 + $0x664] sm:$0xff]  ;;  %v728_v13 = vunpack.c.h.bf16 %v239_v1 }
 0x1a9   :  { %2817 = vmatpush1.bf16.msra.mxu1 %v2124_v14  ;;  %v219_v14 = vld [vmem:[%s7283_s2 + $0x594] sm:$0xff]  ;;  %v1368_v62 = vmul.f32 %v6183_v40, %v721_v2  ;;  %v1352_v21 = vmul.f32 %v6210_v63, %v705_v10 }
 0x1aa   :  { %2818 = vmatprep.subr.bf16.mxu1 %v4385_v0  ;;  %v691_v26 = vunpack.c.h.bf16 %v219_v14  ;;  %v690_v47 = vunpack.c.l.bf16 %v219_v14  ;;  %v743_v14 = vunpack.c.h.bf16 %v247_v4  ;;  %v1375_v23 = vmul.f32 %v6180_v33, %v728_v13 }
 0x1ab   :  { %2694 = vmatmul.mubr.bf16.gmra.mrb[28].mxu1 %v1659_v16 }
 0x1ac   :  { %3434 = vmatmul.mubr.bf16.gmra.mrb[28].mxu0 %v1667_v20  ;;  %2701 = vmatprep.mubr.bf16.mxu1 %v1675_v24  ;;  %v1705_v20 = vpack.c.bf16 %v1300_v7, %v1285_v6  ;;  %v1713_v24 = vpack.c.bf16 %v1308_v9, %v1293_v8  ;;  %v1338_v42 = vmul.f32 %v6183_v40, %v691_v26  ;;  %v251_v6 = vld [vmem:[%s7283_s2 + $0x684] sm:$0xff]  ;;  %v697_v8 = vunpack.c.l.bf16 %v223_v32 }
 0x1ad   :  { %3441 = vmatprep.mubr.bf16.mxu0 %v1683_v27  ;;  %2819 = vmatpush1.bf16.msra.mxu1 %v2125_v39  ;;  %v1299_v27 = vmul.f32 %v6201_v56, %v652_v18  ;;  %v1315_v39 = vmul.f32 %v6180_v33, %v668_v22  ;;  %v1337_v3 = vmul.f32 %v6210_v63, %v690_v47  ;;  %v712_v9 = vunpack.c.l.bf16 %v231_v34 }
 0x1ae   :  { %2820 = vmatprep.subr.bf16.mxu1 %v4385_v0  ;;  %v1277_v0 = vmul.f32 %v6210_v63, %v630_v54  ;;  %v1728_v53 = vpack.c.bf16 %v1338_v42, %v1323_v30  ;;  %v1314_v54 = vmul.f32 %v6201_v56, %v667_v36  ;;  %v751_v18 = vunpack.c.h.bf16 %v251_v6 }
 0x1af   :  { %v1704_v45 = vpack.c.bf16 %v1299_v27, %v1284_v38  ;;  %v1720_v49 = vpack.c.bf16 %v1330_v29, %v1315_v39  ;;  %v1344_v19 = vmul.f32 %v6201_v56, %v697_v8  ;;  %v255_v38 = vld [vmem:[%s7283_s2 + $0x6a0] sm:$0xff]  ;;  %v750_v32 = vunpack.c.l.bf16 %v251_v6 }
 0x1b0   :  { %v1697_v16 = vpack.c.bf16 %v1277_v0, %v1262_v5  ;;  %v243_v0 = vld [vmem:[%s7283_s2 + $0x648] sm:$0xff]  ;;  %v1398_v26 = vmul.f32 %v6183_v40, %v751_v18  ;;  %v263_v27 = vld [vmem:[%s7283_s2 + $0x6dc] sm:$0xff] }
 0x1b1   :  { %2821 = vmatpush1.bf16.msra.mxu1 %v2126_v48  ;;  %v1712_v48 = vpack.c.bf16 %v1307_v44, %v1292_v28  ;;  %v736_v17 = vunpack.c.h.bf16 %v243_v0  ;;  %v727_v28 = vunpack.c.l.bf16 %v239_v1  ;;  %v742_v44 = vunpack.c.l.bf16 %v247_v4  ;;  %v259_v39 = vld [vmem:[%s7283_s2 + $0x6c0] sm:$0xff] }
 0x1b2   :  { %v267_v29 = vld [vmem:[%s7283_s2 + $0x6fc] sm:$0xff]  ;;  %v735_v42 = vunpack.c.l.bf16 %v243_v0  ;;  %v1397_v51 = vmul.f32 %v6210_v63, %v750_v32  ;;  %v765_v1 = vunpack.c.l.bf16 %v259_v39 }
 0x1b3   :  { %2702 = vmatmul.mubr.bf16.gmra.mrb[32].mxu1 %v1674_v57  ;;  %v706_v57 = vunpack.c.h.bf16 %v227_v41  ;;  %v1383_v25 = vmul.f32 %v6183_v40, %v736_v17  ;;  %v773_v41 = vunpack.c.h.bf16 %v263_v27  ;;  %v1374_v47 = vmul.f32 %v6201_v56, %v727_v28 }
 0x1b4   :  { %3442 = vmatmul.mubr.bf16.gmra.mrb[32].mxu0 %v1682_v60  ;;  %2709 = vmatprep.mubr.bf16.mxu1 %v1690_v55  ;;  %v1329_v60 = vmul.f32 %v6201_v56, %v682_v37  ;;  %v1322_v55 = vmul.f32 %v6210_v63, %v675_v46  ;;  %v758_v37 = vunpack.c.h.bf16 %v255_v38  ;;  %v781_v46 = vunpack.c.h.bf16 %v267_v29 }
 0x1b5   :  { %3449 = vmatprep.mubr.bf16.mxu0 %v1698_v59  ;;  %v1360_v59 = vmul.f32 %v6180_v33, %v713_v52  ;;  %v1353_v61 = vmul.f32 %v6183_v40, %v706_v57 }
 0x1b6   :  { %v1719_v5 = vpack.c.bf16 %v1329_v60, %v1314_v54  ;;  %v1727_v7 = vpack.c.bf16 %v1337_v3, %v1322_v55  ;;  %v1405_v52 = vmul.f32 %v6180_v33, %v758_v37  ;;  %v1428_v2 = vmul.f32 %v6183_v40, %v781_v46  ;;  %v271_v54 = vld [vmem:[%s7283_s2 + $0x718] sm:$0xff] }
 0x1b7   :  { %v1735_v11 = vpack.c.bf16 %v1360_v59, %v1345_v58  ;;  %v279_v60 = vld [vmem:[%s7283_s2 + $0x754] sm:$0xff]  ;;  %v788_v0 = vunpack.c.h.bf16 %v271_v54 }
 0x1b8   :  { %v275_v3 = vld [vmem:[%s7283_s2 + $0x738] sm:$0xff]  ;;  %v803_v6 = vunpack.c.h.bf16 %v279_v60 }
 0x1b9   :  { %v283_v58 = vld [vmem:[%s7283_s2 + $0x774] sm:$0xff]  ;;  %v796_v8 = vunpack.c.h.bf16 %v275_v3 }
 0x1bb   :  { %2710 = vmatmul.mubr.bf16.gmra.mrb[36].mxu1 %v1689_v12  ;;  %v720_v12 = vunpack.c.l.bf16 %v235_v43  ;;  %v1758_v43 = vpack.c.bf16 %v1398_v26, %v1383_v25  ;;  %v1443_v17 = vmul.f32 %v6183_v40, %v796_v8  ;;  %v795_v26 = vunpack.c.l.bf16 %v275_v3 }
 0x1bc   :  { %3450 = vmatmul.mubr.bf16.gmra.mrb[36].mxu0 %v1697_v16  ;;  %2717 = vmatprep.mubr.bf16.mxu1 %v1705_v20  ;;  %v1743_v16 = vpack.c.bf16 %v1368_v62, %v1353_v61  ;;  %v1359_v20 = vmul.f32 %v6201_v56, %v712_v9  ;;  %v757_v61 = vunpack.c.l.bf16 %v255_v38  ;;  %v772_v62 = vunpack.c.l.bf16 %v263_v27 }
 0x1bd   :  { %3457 = vmatprep.mubr.bf16.mxu0 %v1713_v24  ;;  %v1367_v22 = vmul.f32 %v6210_v63, %v720_v12  ;;  %v1390_v24 = vmul.f32 %v6180_v33, %v743_v14  ;;  %v811_v9 = vunpack.c.h.bf16 %v283_v58  ;;  %v1412_v12 = vmul.f32 %v6210_v63, %v765_v1 }
 0x1be   :  { %v1734_v30 = vpack.c.bf16 %v1359_v20, %v1344_v19  ;;  %v1404_v10 = vmul.f32 %v6201_v56, %v757_v61  ;;  %v1435_v14 = vmul.f32 %v6180_v33, %v788_v0  ;;  %v287_v19 = vld [vmem:[%s7283_s2 + $0x790] sm:$0xff]  ;;  %v810_v38 = vunpack.c.l.bf16 %v283_v58 }
 0x1bf   :  { %v1742_v34 = vpack.c.bf16 %v1367_v22, %v1352_v21  ;;  %v1750_v36 = vpack.c.bf16 %v1390_v24, %v1375_v23  ;;  %v1458_v18 = vmul.f32 %v6183_v40, %v811_v9  ;;  %v295_v20 = vld [vmem:[%s7283_s2 + $0x7cc] sm:$0xff]  ;;  %v787_v21 = vunpack.c.l.bf16 %v271_v54 }
 0x1c0   :  { %v802_v22 = vunpack.c.l.bf16 %v279_v60  ;;  %v291_v23 = vld [vmem:[%s7283_s2 + $0x7b0] sm:$0xff]  ;;  %v1457_v37 = vmul.f32 %v6210_v63, %v810_v38 }
 0x1c1   :  { %v299_v24 = vld [vmem:[%s7283_s2 + $0x7ec] sm:$0xff]  ;;  %v1434_v32 = vmul.f32 %v6201_v56, %v787_v21  ;;  %v825_v54 = vunpack.c.l.bf16 %v291_v23 }
 0x1c3   :  { %2718 = vmatmul.mubr.bf16.gmra.mrb[40].mxu1 %v1704_v45  ;;  %v766_v45 = vunpack.c.h.bf16 %v259_v39  ;;  %v833_v39 = vunpack.c.h.bf16 %v295_v20 }
 0x1c4   :  { %3458 = vmatmul.mubr.bf16.gmra.mrb[40].mxu0 %v1712_v48  ;;  %2725 = vmatprep.mubr.bf16.mxu1 %v1720_v49  ;;  %v1389_v48 = vmul.f32 %v6201_v56, %v742_v44  ;;  %v1382_v49 = vmul.f32 %v6210_v63, %v735_v42  ;;  %v818_v44 = vunpack.c.h.bf16 %v287_v19  ;;  %v841_v42 = vunpack.c.h.bf16 %v299_v24 }
 0x1c5   :  { %3465 = vmatprep.mubr.bf16.mxu0 %v1728_v53  ;;  %v1420_v53 = vmul.f32 %v6180_v33, %v773_v41  ;;  %v1413_v57 = vmul.f32 %v6183_v40, %v766_v45 }
 0x1c6   :  { %v1749_v55 = vpack.c.bf16 %v1389_v48, %v1374_v47  ;;  %v1757_v59 = vpack.c.bf16 %v1397_v51, %v1382_v49  ;;  %v1465_v41 = vmul.f32 %v6180_v33, %v818_v44  ;;  %v1488_v46 = vmul.f32 %v6183_v40, %v841_v42  ;;  %v303_v47 = vld [vmem:[%s7283_s2 + $0x808] sm:$0xff] }
 0x1c7   :  { %v1765_v4 = vpack.c.bf16 %v1420_v53, %v1405_v52  ;;  %v311_v48 = vld [vmem:[%s7283_s2 + $0x844] sm:$0xff]  ;;  %v848_v3 = vunpack.c.h.bf16 %v303_v47 }
 0x1c8   :  { %v307_v51 = vld [vmem:[%s7283_s2 + $0x828] sm:$0xff]  ;;  %v863_v58 = vunpack.c.h.bf16 %v311_v48 }
 0x1c9   :  { %v315_v52 = vld [vmem:[%s7283_s2 + $0x864] sm:$0xff]  ;;  %v856_v61 = vunpack.c.h.bf16 %v307_v51 }
 0x1cb   :  { %2726 = vmatmul.mubr.bf16.gmra.mrb[44].mxu1 %v1719_v5  ;;  %v780_v5 = vunpack.c.l.bf16 %v267_v29  ;;  %v1788_v29 = vpack.c.bf16 %v1458_v18, %v1443_v17  ;;  %v1503_v8 = vmul.f32 %v6183_v40, %v856_v61  ;;  %v323_v17 = vld [vmem:[%s7283_s2 + $0x8a0] sm:$0xff] }
 0x1cc   :  { %3466 = vmatmul.mubr.bf16.gmra.mrb[44].mxu0 %v1727_v7  ;;  %2733 = vmatprep.mubr.bf16.mxu1 %v1735_v11  ;;  %v1773_v7 = vpack.c.bf16 %v1428_v2, %v1413_v57  ;;  %v1419_v11 = vmul.f32 %v6201_v56, %v772_v62  ;;  %v817_v57 = vunpack.c.l.bf16 %v287_v19  ;;  %v832_v2 = vunpack.c.l.bf16 %v295_v20  ;;  %v331_v18 = vld [vmem:[%s7283_s2 + $0x8dc] sm:$0xff] }
 0x1cd   :  { %3473 = vmatprep.mubr.bf16.mxu0 %v1743_v16  ;;  %v1427_v13 = vmul.f32 %v6210_v63, %v780_v5  ;;  %v1450_v16 = vmul.f32 %v6180_v33, %v803_v6  ;;  %v871_v62 = vunpack.c.h.bf16 %v315_v52  ;;  %v1472_v5 = vmul.f32 %v6210_v63, %v825_v54 }
 0x1ce   :  { %v1764_v25 = vpack.c.bf16 %v1419_v11, %v1404_v10  ;;  %v1464_v1 = vmul.f32 %v6201_v56, %v817_v57  ;;  %v1495_v6 = vmul.f32 %v6180_v33, %v848_v3  ;;  %v319_v10 = vld [vmem:[%s7283_s2 + $0x880] sm:$0xff]  ;;  %v36_v3 = vld [vmem:[%s7283_s2 + $0x38] ss:$60 sps:$4 sm:$0xff]  }
 0x1cf   :  { %v1772_v27 = vpack.c.bf16 %v1427_v13, %v1412_v12  ;;  %v1780_v28 = vpack.c.bf16 %v1450_v16, %v1435_v14  ;;  %v1518_v9 = vmul.f32 %v6183_v40, %v871_v62  ;;  %v327_v11 = vld [vmem:[%s7283_s2 + $0x8bc] sm:$0xff]  ;;  %v847_v12 = vunpack.c.l.bf16 %v303_v47 }
 0x1d0   :  { %v862_v13 = vunpack.c.l.bf16 %v311_v48  ;;  %v855_v14 = vunpack.c.l.bf16 %v307_v51  ;;  %v870_v16 = vunpack.c.l.bf16 %v315_v52  ;;  %v931_v52 = vsub.s32 6, %v4573_v15 }
 0x1d1   :  { %v1494_v38 = vmul.f32 %v6201_v56, %v847_v12  ;;  %v52_v12 = vld [vmem:[%s7283_s2 + $0xb0] ss:$60 sps:$4 sm:$0xff]  }
 0x1d2   :  { %v1517_v44 = vmul.f32 %v6210_v63, %v870_v16  ;;  %v6802_v62 = vrot.slane %v4623_v35, %v931_v52 }
 0x1d3   :  { %2734 = vmatmul.mubr.bf16.gmra.mrb[48].mxu1 %v1734_v30  ;;  %v826_v30 = vunpack.c.h.bf16 %v291_v23  ;;  %v893_v23 = vunpack.c.h.bf16 %v327_v11 }
 0x1d4   :  { %3474 = vmatmul.mubr.bf16.gmra.mrb[48].mxu0 %v1742_v34  ;;  %2741 = vmatprep.mubr.bf16.mxu1 %v1750_v36  ;;  %v1449_v34 = vmul.f32 %v6201_v56, %v802_v22  ;;  %v1442_v36 = vmul.f32 %v6210_v63, %v795_v26  ;;  %v878_v22 = vunpack.c.h.bf16 %v319_v10  ;;  %v901_v26 = vunpack.c.h.bf16 %v331_v18 }
 0x1d5   :  { %3481 = vmatprep.mubr.bf16.mxu0 %v1758_v43  ;;  %v1480_v43 = vmul.f32 %v6180_v33, %v833_v39  ;;  %v1473_v45 = vmul.f32 %v6183_v40, %v826_v30  ;;  %v935_v30 = vsub.s32 7, %v4573_v15  ;;  %v48_v15 = vld [vmem:[%s7283_s2 + $0x90] sm:$0xff] }
 0x1d6   :  { %v1779_v49 = vpack.c.bf16 %v1449_v34, %v1434_v32  ;;  %v1787_v53 = vpack.c.bf16 %v1457_v37, %v1442_v36  ;;  %v1525_v39 = vmul.f32 %v6180_v33, %v878_v22  ;;  %v1548_v32 = vmul.f32 %v6183_v40, %v901_v26  ;;  %v32_v34 = vld [vmem:[%s7283_s2 + $0x18] sm:$0xff] }
 0x1d7   :  { %v1795_v60 = vpack.c.bf16 %v1480_v43, %v1465_v41  ;;  %v40_v36 = vld [vmem:[%s7283_s2 + $0x54] sm:$0xff]  ;;  %v877_v43 = vunpack.c.l.bf16 %v319_v10  ;;  %v340_v48 = vunpack.c.h.bf16 %v32_v34  ;;  %v6780_v51 = vrot.slane %v4619_v31, %v935_v30  ;;  %v88_v30 = vld [vmem:[%s7283_s2 + $0x1bc] sm:$0xff] }
 0x1d8   :  { %v392_v22 = vunpack.c.h.bf16 %v52_v12 }
 0x1db   :  { %2742 = vmatmul.mubr.bf16.gmra.mrb[52].mxu1 %v1749_v55  ;;  %v840_v55 = vunpack.c.l.bf16 %v299_v24  ;;  %v1818_v24 = vpack.c.bf16 %v1518_v9, %v1503_v8 }
 0x1dc   :  { %3482 = vmatmul.mubr.bf16.gmra.mrb[52].mxu0 %v1757_v59  ;;  %2749 = vmatprep.mubr.bf16.mxu1 %v1765_v4  ;;  %v1803_v59 = vpack.c.bf16 %v1488_v46, %v1473_v45  ;;  %v1479_v4 = vmul.f32 %v6201_v56, %v832_v2  ;;  %v892_v45 = vunpack.c.l.bf16 %v327_v11  ;;  %v900_v46 = vunpack.c.l.bf16 %v331_v18 }
 0x1dd   :  { %3489 = vmatprep.mubr.bf16.mxu0 %v1773_v7  ;;  %v1487_v0 = vmul.f32 %v6210_v63, %v840_v55  ;;  %v1510_v7 = vmul.f32 %v6180_v33, %v863_v58  ;;  %v339_v58 = vunpack.c.l.bf16 %v32_v34  ;;  %v369_v18 = vunpack.c.l.bf16 %v48_v15 }
 0x1de   :  { %v1794_v19 = vpack.c.bf16 %v1479_v4, %v1464_v1  ;;  %v1539_v57 = vmul.f32 %v6201_v56, %v892_v45  ;;  %v1547_v54 = vmul.f32 %v6210_v63, %v900_v46  ;;  %v347_v1 = vunpack.c.l.bf16 %v36_v3 }
 0x1df   :  { %v1802_v20 = vpack.c.bf16 %v1487_v0, %v1472_v5  ;;  %v1810_v21 = vpack.c.bf16 %v1510_v7, %v1495_v6  ;;  %v362_v4 = vunpack.c.h.bf16 %v36_v3  ;;  %v370_v6 = vunpack.c.h.bf16 %v48_v15 }
 0x1e0   :  { %v994_v10 = vmul.f32 %v6802_v62, %v347_v1  ;;  %v444_v3 = vunpack.c.l.bf16 %v88_v30 }
 0x1e1   :  { %v1017_v35 = vmul.f32 %v6780_v51, %v370_v6 }
 0x1e3   :  { %2750 = vmatmul.mubr.bf16.gmra.mrb[56].mxu1 %v1764_v25  ;;  %v886_v25 = vunpack.c.h.bf16 %v323_v17 }
 0x1e4   :  { %3490 = vmatmul.mubr.bf16.gmra.mrb[56].mxu0 %v1772_v27  ;;  %2757 = vmatprep.mubr.bf16.mxu1 %v1780_v28  ;;  %v1509_v27 = vmul.f32 %v6201_v56, %v862_v13  ;;  %v1502_v28 = vmul.f32 %v6210_v63, %v855_v14  ;;  %v64_v13 = vld [vmem:[%s7283_s2 + $0x108] sm:$0xff] }
 0x1e5   :  { %3497 = vmatprep.mubr.bf16.mxu0 %v1788_v29  ;;  %v1540_v29 = vmul.f32 %v6180_v33, %v893_v23  ;;  %v1533_v42 = vmul.f32 %v6183_v40, %v886_v25  ;;  %v885_v33 = vunpack.c.l.bf16 %v323_v17  ;;  %v72_v14 = vld [vmem:[%s7283_s2 + $0x144] sm:$0xff]  ;;  %v400_v23 = vunpack.c.h.bf16 %v64_v13 }
 0x1e6   :  { %v1809_v37 = vpack.c.bf16 %v1509_v27, %v1494_v38  ;;  %v1817_v41 = vpack.c.bf16 %v1517_v44, %v1502_v28  ;;  %v1039_v27 = vmul.f32 %v6802_v62, %v392_v22 }
 0x1e7   :  { %v1825_v47 = vpack.c.bf16 %v1540_v29, %v1525_v39  ;;  %v1833_v40 = vpack.c.bf16 %v1548_v32, %v1533_v42  ;;  %v1532_v2 = vmul.f32 %v6210_v63, %v885_v33  ;;  %v6799_v63 = vrot.slane %v4619_v31, %v931_v52  ;;  %v68_v39 = vld [vmem:[%s7283_s2 + $0x128] ss:$60 sps:$4 sm:$0xff]  }
 0x1e8   :  { %v1009_v31 = vmul.f32 %v6802_v62, %v362_v4  ;;  %v1047_v28 = vmul.f32 %v6780_v51, %v400_v23  ;;  %v80_v29 = vld [vmem:[%s7283_s2 + $0x180] sm:$0xff]  ;;  %v399_v42 = vunpack.c.l.bf16 %v64_v13  ;;  %v414_v32 = vunpack.c.l.bf16 %v72_v14 }
 0x1e9   :  { %v1832_v5 = vpack.c.bf16 %v1547_v54, %v1532_v2  ;;  %v986_v8 = vmul.f32 %v6799_v63, %v339_v58  ;;  %v1016_v25 = vmul.f32 %v6799_v63, %v369_v18  ;;  %v430_v45 = vunpack.c.h.bf16 %v80_v29  ;;  %v104_v2 = vld [vmem:[%s7283_s2 + $0x234] sm:$0xff] }
 0x1ea   :  { %v1564_v17 = vpack.c.bf16 %v1009_v31, %v994_v10  ;;  %v445_v33 = vunpack.c.h.bf16 %v88_v30  ;;  %v1046_v46 = vmul.f32 %v6799_v63, %v399_v42  ;;  %v1091_v4 = vmul.f32 %v6799_v63, %v444_v3  ;;  %v120_v10 = vld [vmem:[%s7283_s2 + $0x2ac] sm:$0xff] }
 0x1eb   :  { %2758 = vmatmul.mubr.bf16.gmra.mrb[60].mxu1 %v1779_v49  ;;  %v355_v49 = vunpack.c.h.bf16 %v40_v36  ;;  %v505_v18 = vunpack.c.h.bf16 %v120_v10 }
 0x1ec   :  { %3498 = vmatmul.mubr.bf16.gmra.mrb[60].mxu0 %v1787_v53  ;;  %2765 = vmatprep.mubr.bf16.mxu1 %v1795_v60  ;;  %v1524_v53 = vmul.f32 %v6201_v56, %v877_v43  ;;  %v987_v60 = vmul.f32 %v6780_v51, %v340_v48  ;;  %v56_v56 = vld [vmem:[%s7283_s2 + $0xcc] sm:$0xff]  ;;  %v1092_v52 = vmul.f32 %v6780_v51, %v445_v33 }
 0x1ed   :  { %3505 = vmatprep.mubr.bf16.mxu0 %v1803_v59  ;;  %v1002_v55 = vmul.f32 %v6780_v51, %v355_v49  ;;  %v354_v59 = vunpack.c.l.bf16 %v40_v36  ;;  %v385_v7 = vunpack.c.h.bf16 %v56_v56  ;;  %v407_v36 = vunpack.c.l.bf16 %v68_v39 }
 0x1ee   :  { %v1824_v61 = vpack.c.bf16 %v1539_v57, %v1524_v53  ;;  %v84_v53 = vld [vmem:[%s7283_s2 + $0x1a0] ss:$60 sps:$4 sm:$0xff]  }
 0x1ef   :  { %v1557_v0 = vpack.c.bf16 %v1002_v55, %v987_v60  ;;  %v1001_v9 = vmul.f32 %v6799_v63, %v354_v59  ;;  %v1032_v11 = vmul.f32 %v6780_v51, %v385_v7  ;;  %v1054_v48 = vmul.f32 %v6802_v62, %v407_v36  ;;  %v96_v57 = vld [vmem:[%s7283_s2 + $0x1f8] sm:$0xff] }
 0x1f0   :  { %v429_v55 = vunpack.c.l.bf16 %v80_v29  ;;  %v437_v15 = vunpack.c.l.bf16 %v84_v53  ;;  %v452_v58 = vunpack.c.h.bf16 %v84_v53  ;;  %v460_v59 = vunpack.c.h.bf16 %v96_v57 }
 0x1f1   :  { %v1556_v16 = vpack.c.bf16 %v1001_v9, %v986_v8  ;;  %v100_v8 = vld [vmem:[%s7283_s2 + $0x218] ss:$60 sps:$4 sm:$0xff]   ;;  %v459_v31 = vunpack.c.l.bf16 %v96_v57 }
 0x1f2   :  { %v1076_v1 = vmul.f32 %v6799_v63, %v429_v55  ;;  %v1107_v6 = vmul.f32 %v6780_v51, %v460_v59  ;;  %v112_v9 = vld [vmem:[%s7283_s2 + $0x270] sm:$0xff]  ;;  %v482_v13 = vunpack.c.h.bf16 %v100_v8 }
 0x1f3   :  { %2766 = vmatmul.mubr.bf16.gmra.mrb[64].mxu1 %v1794_v19  ;;  %v384_v19 = vunpack.c.l.bf16 %v56_v56 }
 0x1f4   :  { %3506 = vmatmul.mubr.bf16.gmra.mrb[64].mxu0 %v1802_v20  ;;  %2773 = vmatprep.mubr.bf16.mxu1 %v1810_v21  ;;  %v377_v20 = vunpack.c.l.bf16 %v52_v12  ;;  %v1572_v21 = vpack.c.bf16 %v1032_v11, %v1017_v35  ;;  %v474_v35 = vunpack.c.l.bf16 %v104_v2  ;;  %v1601_v11 = vpack.c.bf16 %v1091_v4, %v1076_v1  ;;  %v148_v1 = vld [vmem:[%s7283_s2 + $0x380] ss:$60 sps:$4 sm:$0xff]  }
 0x1f5   :  { %3513 = vmatprep.mubr.bf16.mxu0 %v1818_v24  ;;  %v415_v24 = vunpack.c.h.bf16 %v72_v14  ;;  %v1031_v26 = vmul.f32 %v6799_v63, %v384_v19  ;;  %v467_v12 = vunpack.c.l.bf16 %v100_v8  ;;  %v1106_v19 = vmul.f32 %v6799_v63, %v459_v31  ;;  %v160_v4 = vld [vmem:[%s7283_s2 + $0x3d8] sm:$0xff] }
 0x1f6   :  { %v1024_v38 = vmul.f32 %v6802_v62, %v377_v20  ;;  %v1121_v20 = vmul.f32 %v6799_v63, %v474_v35  ;;  %v1129_v22 = vmul.f32 %v6802_v62, %v482_v13  ;;  %v572_v31 = vunpack.c.h.bf16 %v148_v1 }
 0x1f7   :  { %v1062_v44 = vmul.f32 %v6780_v51, %v415_v24  ;;  %v1571_v34 = vpack.c.bf16 %v1031_v26, %v1016_v25  ;;  %v1152_v24 = vmul.f32 %v6780_v51, %v505_v18  ;;  %v116_v25 = vld [vmem:[%s7283_s2 + $0x290] ss:$60 sps:$4 sm:$0xff]   ;;  %v580_v35 = vunpack.c.h.bf16 %v160_v4 }
 0x1f8   :  { %v128_v26 = vld [vmem:[%s7283_s2 + $0x2e8] sm:$0xff]  ;;  %v497_v29 = vunpack.c.l.bf16 %v116_v25  ;;  %v512_v42 = vunpack.c.h.bf16 %v116_v25 }
 0x1f9   :  { %v1587_v43 = vpack.c.bf16 %v1062_v44, %v1047_v28  ;;  %v489_v44 = vunpack.c.l.bf16 %v112_v9 }
 0x1fb   :  { %2774 = vmatmul.mubr.bf16.gmra.mrb[68].mxu1 %v1809_v37  ;;  %v422_v37 = vunpack.c.h.bf16 %v68_v39  ;;  %v504_v39 = vunpack.c.l.bf16 %v120_v10  ;;  %v1136_v36 = vmul.f32 %v6799_v63, %v489_v44 }
 0x1fc   :  { %3514 = vmatmul.mubr.bf16.gmra.mrb[68].mxu0 %v1817_v41  ;;  %2781 = vmatprep.mubr.bf16.mxu1 %v1825_v47  ;;  %v1579_v41 = vpack.c.bf16 %v1039_v27, %v1024_v38  ;;  %v1061_v47 = vmul.f32 %v6799_v63, %v414_v32  ;;  %v136_v38 = vld [vmem:[%s7283_s2 + $0x324] sm:$0xff]  ;;  %v1616_v27 = vpack.c.bf16 %v1121_v20, %v1106_v19  ;;  %v520_v32 = vunpack.c.h.bf16 %v128_v26  ;;  %v164_v19 = vld [vmem:[%s7283_s2 + $0x3f8] ss:$60 sps:$4 sm:$0xff]  }
 0x1fd   :  { %3521 = vmatprep.mubr.bf16.mxu0 %v1833_v40  ;;  %v1069_v49 = vmul.f32 %v6802_v62, %v422_v37  ;;  %v1077_v40 = vmul.f32 %v6780_v51, %v430_v45  ;;  %v1151_v37 = vmul.f32 %v6799_v63, %v504_v39  ;;  %v176_v20 = vld [vmem:[%s7283_s2 + $0x450] sm:$0xff]  ;;  %v587_v25 = vunpack.c.l.bf16 %v164_v19 }
 0x1fe   :  { %v1586_v54 = vpack.c.bf16 %v1061_v47, %v1046_v46  ;;  %v1167_v45 = vmul.f32 %v6780_v51, %v520_v32  ;;  %v132_v46 = vld [vmem:[%s7283_s2 + $0x308] ss:$60 sps:$4 sm:$0xff]  }
 0x1ff   :  { %v1594_v60 = vpack.c.bf16 %v1069_v49, %v1054_v48  ;;  %v1602_v56 = vpack.c.bf16 %v1092_v52, %v1077_v40  ;;  %v144_v47 = vld [vmem:[%s7283_s2 + $0x360] sm:$0xff]  ;;  %v519_v49 = vunpack.c.l.bf16 %v128_v26  ;;  %v534_v40 = vunpack.c.l.bf16 %v136_v38 }
 0x200   :  { %v152_v48 = vld [vmem:[%s7283_s2 + $0x39c] sm:$0xff]  ;;  %v1631_v52 = vpack.c.bf16 %v1151_v37, %v1136_v36  ;;  %v527_v53 = vunpack.c.l.bf16 %v132_v46  ;;  %v542_v57 = vunpack.c.h.bf16 %v132_v46  ;;  %v602_v26 = vunpack.c.h.bf16 %v164_v19  ;;  %v180_v36 = vld [vmem:[%s7283_s2 + $0x470] ss:$60 sps:$4 sm:$0xff]  }
 0x201   :  { %v565_v55 = vunpack.c.h.bf16 %v152_v48  ;;  %v1166_v3 = vmul.f32 %v6799_v63, %v519_v49  ;;  %v564_v8 = vunpack.c.l.bf16 %v152_v48  ;;  %v192_v37 = vld [vmem:[%s7283_s2 + $0x4c8] sm:$0xff]  ;;  %v632_v49 = vunpack.c.h.bf16 %v180_v36 }
 0x203   :  { %2782 = vmatmul.mubr.bf16.gmra.mrb[72].mxu1 %v1824_v61  ;;  %v475_v61 = vunpack.c.h.bf16 %v104_v2  ;;  %v1211_v13 = vmul.f32 %v6799_v63, %v564_v8 }
 0x204   :  { %3522 = vmatmul.mubr.bf16.gmra.mrb[72].mxu0 %v1832_v5  ;;  %2822 = vmatprep.mubr.bf16.mxu1 %v1557_v0  ;;  %v1084_v5 = vmul.f32 %v6802_v62, %v437_v15  ;;  %v1099_v0 = vmul.f32 %v6802_v62, %v452_v58  ;;  %v1181_v15 = vmul.f32 %v6799_v63, %v534_v40  ;;  %v640_v40 = vunpack.c.h.bf16 %v192_v37 }
 0x205   :  { %3804 = vmatprep.mubr.msk.bf16.mxu0 %vm4387_vm0, %v4386_v50  ;;  %v1122_v7 = vmul.f32 %v6780_v51, %v475_v61  ;;  %v1189_v58 = vmul.f32 %v6802_v62, %v542_v57  ;;  %v1212_v61 = vmul.f32 %v6780_v51, %v565_v55 }
 0x206   :  { %v1609_v14 = vpack.c.bf16 %v1099_v0, %v1084_v5  ;;  %v168_v5 = vld [vmem:[%s7283_s2 + $0x414] sm:$0xff]  ;;  %v1646_v0 = vpack.c.bf16 %v1181_v15, %v1166_v3  ;;  %v196_v3 = vld [vmem:[%s7283_s2 + $0x4e8] ss:$60 sps:$4 sm:$0xff]  }
 0x207   :  { %v208_v15 = vld [vmem:[%s7283_s2 + $0x540] sm:$0xff] }
 0x20b   :  { %2823 = vmatmul.mubr.bf16.vlgmr.msra.gmra.mrb[0].mxu1 %v1556_v16  ;;  %v1617_v16 = vpack.c.bf16 %v1122_v7, %v1107_v6  ;;  %v549_v7 = vunpack.c.l.bf16 %v144_v47 }
 0x20c   :  { %3805 = vmatmul.mubr.msk.bf16.vlgmr.msra.gmra.mrb[0].mxu0 %vm2177_vm1, %v1564_v17  ;;  %2830 = vmatprep.mubr.bf16.mxu1 %v1572_v21  ;;  %v490_v17 = vunpack.c.h.bf16 %v112_v9  ;;  %v1114_v21 = vmul.f32 %v6802_v62, %v467_v12  ;;  %v557_v9 = vunpack.c.l.bf16 %v148_v1  ;;  %v647_v1 = vunpack.c.l.bf16 %v196_v3 }
 0x20d   :  { %3808 = vmatprep.mubr.msk.bf16.mxu0 %vm4387_vm0, %v4386_v50  ;;  %v1196_v12 = vmul.f32 %v6799_v63, %v549_v7 }
 0x20e   :  { %v1137_v23 = vmul.f32 %v6780_v51, %v490_v17  ;;  %v1624_v28 = vpack.c.bf16 %v1129_v22, %v1114_v21  ;;  %v1227_v17 = vmul.f32 %v6780_v51, %v580_v35  ;;  %v184_v21 = vld [vmem:[%s7283_s2 + $0x48c] sm:$0xff]  ;;  %v579_v22 = vunpack.c.l.bf16 %v160_v4 }
 0x20f   :  { %v625_v44 = vunpack.c.h.bf16 %v184_v21  ;;  %v624_v46 = vunpack.c.l.bf16 %v184_v21  ;;  %v662_v4 = vunpack.c.h.bf16 %v196_v3 }
 0x210   :  { %v1632_v30 = vpack.c.bf16 %v1152_v24, %v1137_v23  ;;  %v594_v23 = vunpack.c.l.bf16 %v168_v5  ;;  %v1661_v24 = vpack.c.bf16 %v1211_v13, %v1196_v12  ;;  %v1226_v39 = vmul.f32 %v6799_v63, %v579_v22  ;;  %v212_v12 = vld [vmem:[%s7283_s2 + $0x560] ss:$60 sps:$4 sm:$0xff]  }
 0x211   :  { %v1271_v57 = vmul.f32 %v6799_v63, %v624_v46  ;;  %v224_v13 = vld [vmem:[%s7283_s2 + $0x5b8] sm:$0xff]  ;;  %v692_v22 = vunpack.c.h.bf16 %v212_v12 }
 0x213   :  { %2831 = vmatmul.mubr.bf16.gmra.mrb[4].mxu1 %v1571_v34  ;;  %v535_v34 = vunpack.c.h.bf16 %v136_v38 }
 0x214   :  { %3809 = vmatmul.mubr.msk.bf16.gmra.mrb[4].mxu0 %vm2177_vm1, %v1579_v41  ;;  %2838 = vmatprep.mubr.bf16.mxu1 %v1587_v43  ;;  %v1144_v41 = vmul.f32 %v6802_v62, %v497_v29  ;;  %v1159_v43 = vmul.f32 %v6802_v62, %v512_v42  ;;  %v1241_v29 = vmul.f32 %v6799_v63, %v594_v23  ;;  %v700_v23 = vunpack.c.h.bf16 %v224_v13 }
 0x215   :  { %3812 = vmatprep.mubr.msk.bf16.mxu0 %vm4387_vm0, %v4386_v50  ;;  %v1182_v33 = vmul.f32 %v6780_v51, %v535_v34  ;;  %v1249_v42 = vmul.f32 %v6802_v62, %v602_v26  ;;  %v1272_v34 = vmul.f32 %v6780_v51, %v625_v44 }
 0x216   :  { %v1639_v2 = vpack.c.bf16 %v1159_v43, %v1144_v41  ;;  %v200_v41 = vld [vmem:[%s7283_s2 + $0x504] sm:$0xff]  ;;  %v1676_v43 = vpack.c.bf16 %v1241_v29, %v1226_v39  ;;  %v228_v39 = vld [vmem:[%s7283_s2 + $0x5d8] ss:$60 sps:$4 sm:$0xff]  }
 0x217   :  { %v240_v29 = vld [vmem:[%s7283_s2 + $0x630] sm:$0xff] }
 0x21b   :  { %2839 = vmatmul.mubr.bf16.gmra.mrb[8].mxu1 %v1586_v54  ;;  %v1647_v54 = vpack.c.bf16 %v1182_v33, %v1167_v45  ;;  %v609_v33 = vunpack.c.l.bf16 %v176_v20 }
 0x21c   :  { %3813 = vmatmul.mubr.msk.bf16.gmra.mrb[8].mxu0 %vm2177_vm1, %v1594_v60  ;;  %2846 = vmatprep.mubr.bf16.mxu1 %v1602_v56  ;;  %v550_v60 = vunpack.c.h.bf16 %v144_v47  ;;  %v1174_v56 = vmul.f32 %v6802_v62, %v527_v53  ;;  %v617_v47 = vunpack.c.l.bf16 %v180_v36  ;;  %v707_v36 = vunpack.c.l.bf16 %v228_v39 }
 0x21d   :  { %3816 = vmatprep.mubr.msk.bf16.mxu0 %vm4387_vm0, %v4386_v50  ;;  %v1256_v53 = vmul.f32 %v6799_v63, %v609_v33 }
 0x21e   :  { %v1197_v59 = vmul.f32 %v6780_v51, %v550_v60  ;;  %v1654_v6 = vpack.c.bf16 %v1189_v58, %v1174_v56  ;;  %v1287_v60 = vmul.f32 %v6780_v51, %v640_v40  ;;  %v216_v56 = vld [vmem:[%s7283_s2 + $0x57c] sm:$0xff]  ;;  %v639_v58 = vunpack.c.l.bf16 %v192_v37 }
 0x21f   :  { %v685_v7 = vunpack.c.h.bf16 %v216_v56  ;;  %v684_v19 = vunpack.c.l.bf16 %v216_v56  ;;  %v722_v37 = vunpack.c.h.bf16 %v228_v39 }
 0x220   :  { %v1662_v10 = vpack.c.bf16 %v1212_v61, %v1197_v59  ;;  %v654_v59 = vunpack.c.l.bf16 %v200_v41  ;;  %v1691_v61 = vpack.c.bf16 %v1271_v57, %v1256_v53  ;;  %v1286_v8 = vmul.f32 %v6799_v63, %v639_v58  ;;  %v244_v53 = vld [vmem:[%s7283_s2 + $0x650] ss:$60 sps:$4 sm:$0xff]  }
 0x221   :  { %v1331_v26 = vmul.f32 %v6799_v63, %v684_v19  ;;  %v256_v57 = vld [vmem:[%s7283_s2 + $0x6a8] sm:$0xff]  ;;  %v752_v58 = vunpack.c.h.bf16 %v244_v53 }
 0x223   :  { %2847 = vmatmul.mubr.bf16.gmra.mrb[12].mxu1 %v1601_v11  ;;  %v595_v11 = vunpack.c.h.bf16 %v168_v5 }
 0x224   :  { %3817 = vmatmul.mubr.msk.bf16.gmra.mrb[12].mxu0 %vm2177_vm1, %v1609_v14  ;;  %2854 = vmatprep.mubr.bf16.mxu1 %v1617_v16  ;;  %v1204_v14 = vmul.f32 %v6802_v62, %v557_v9  ;;  %v1219_v16 = vmul.f32 %v6802_v62, %v572_v31  ;;  %v1301_v9 = vmul.f32 %v6799_v63, %v654_v59  ;;  %v760_v59 = vunpack.c.h.bf16 %v256_v57 }
 0x225   :  { %3820 = vmatprep.mubr.msk.bf16.mxu0 %vm4387_vm0, %v4386_v50  ;;  %v1242_v18 = vmul.f32 %v6780_v51, %v595_v11  ;;  %v1309_v31 = vmul.f32 %v6802_v62, %v662_v4  ;;  %v1332_v11 = vmul.f32 %v6780_v51, %v685_v7 }
 0x226   :  { %v1669_v38 = vpack.c.bf16 %v1219_v16, %v1204_v14  ;;  %v232_v14 = vld [vmem:[%s7283_s2 + $0x5f4] sm:$0xff]  ;;  %v1706_v16 = vpack.c.bf16 %v1301_v9, %v1286_v8  ;;  %v260_v8 = vld [vmem:[%s7283_s2 + $0x6c8] ss:$60 sps:$4 sm:$0xff]  }
 0x227   :  { %v272_v9 = vld [vmem:[%s7283_s2 + $0x720] sm:$0xff] }
 0x22b   :  { %2855 = vmatmul.mubr.bf16.gmra.mrb[16].mxu1 %v1616_v27  ;;  %v1677_v27 = vpack.c.bf16 %v1242_v18, %v1227_v17  ;;  %v669_v18 = vunpack.c.l.bf16 %v208_v15 }
 0x22c   :  { %3821 = vmatmul.mubr.msk.bf16.gmra.mrb[16].mxu0 %vm2177_vm1, %v1624_v28  ;;  %2862 = vmatprep.mubr.bf16.mxu1 %v1632_v30  ;;  %v610_v28 = vunpack.c.h.bf16 %v176_v20  ;;  %v1234_v30 = vmul.f32 %v6802_v62, %v587_v25  ;;  %v677_v20 = vunpack.c.l.bf16 %v212_v12  ;;  %v767_v12 = vunpack.c.l.bf16 %v260_v8 }
 0x22d   :  { %3824 = vmatprep.mubr.msk.bf16.mxu0 %vm4387_vm0, %v4386_v50  ;;  %v1316_v25 = vmul.f32 %v6799_v63, %v669_v18 }
 0x22e   :  { %v1257_v32 = vmul.f32 %v6780_v51, %v610_v28  ;;  %v1684_v45 = vpack.c.bf16 %v1249_v42, %v1234_v30  ;;  %v1347_v28 = vmul.f32 %v6780_v51, %v700_v23  ;;  %v248_v30 = vld [vmem:[%s7283_s2 + $0x66c] sm:$0xff]  ;;  %v699_v42 = vunpack.c.l.bf16 %v224_v13 }
 0x22f   :  { %v745_v33 = vunpack.c.h.bf16 %v248_v30  ;;  %v744_v3 = vunpack.c.l.bf16 %v248_v30  ;;  %v782_v13 = vunpack.c.h.bf16 %v260_v8 }
 0x230   :  { %v1692_v48 = vpack.c.bf16 %v1272_v34, %v1257_v32  ;;  %v714_v32 = vunpack.c.l.bf16 %v232_v14  ;;  %v1721_v34 = vpack.c.bf16 %v1331_v26, %v1316_v25  ;;  %v1346_v46 = vmul.f32 %v6799_v63, %v699_v42  ;;  %v276_v25 = vld [vmem:[%s7283_s2 + $0x740] ss:$60 sps:$4 sm:$0xff]  }
 0x231   :  { %v1391_v4 = vmul.f32 %v6799_v63, %v744_v3  ;;  %v288_v26 = vld [vmem:[%s7283_s2 + $0x798] sm:$0xff]  ;;  %v812_v42 = vunpack.c.h.bf16 %v276_v25 }
 0x233   :  { %2863 = vmatmul.mubr.bf16.gmra.mrb[20].mxu1 %v1631_v52  ;;  %v655_v52 = vunpack.c.h.bf16 %v200_v41 }
 0x234   :  { %3825 = vmatmul.mubr.msk.bf16.gmra.mrb[20].mxu0 %vm2177_vm1, %v1639_v2  ;;  %2870 = vmatprep.mubr.bf16.mxu1 %v1647_v54  ;;  %v1264_v2 = vmul.f32 %v6802_v62, %v617_v47  ;;  %v1279_v54 = vmul.f32 %v6802_v62, %v632_v49  ;;  %v1361_v47 = vmul.f32 %v6799_v63, %v714_v32  ;;  %v820_v32 = vunpack.c.h.bf16 %v288_v26 }
 0x235   :  { %3828 = vmatprep.mubr.msk.bf16.mxu0 %vm4387_vm0, %v4386_v50  ;;  %v1302_v55 = vmul.f32 %v6780_v51, %v655_v52  ;;  %v1369_v49 = vmul.f32 %v6802_v62, %v722_v37  ;;  %v1392_v52 = vmul.f32 %v6780_v51, %v745_v33 }
 0x236   :  { %v1699_v5 = vpack.c.bf16 %v1279_v54, %v1264_v2  ;;  %v264_v2 = vld [vmem:[%s7283_s2 + $0x6e4] sm:$0xff]  ;;  %v1736_v54 = vpack.c.bf16 %v1361_v47, %v1346_v46  ;;  %v292_v46 = vld [vmem:[%s7283_s2 + $0x7b8] ss:$60 sps:$4 sm:$0xff]  }
 0x237   :  { %v304_v47 = vld [vmem:[%s7283_s2 + $0x810] sm:$0xff] }
 0x23b   :  { %2871 = vmatmul.mubr.bf16.gmra.mrb[24].mxu1 %v1646_v0  ;;  %v1707_v0 = vpack.c.bf16 %v1302_v55, %v1287_v60  ;;  %v729_v55 = vunpack.c.l.bf16 %v240_v29 }
 0x23c   :  { %3829 = vmatmul.mubr.msk.bf16.gmra.mrb[24].mxu0 %vm2177_vm1, %v1654_v6  ;;  %2878 = vmatprep.mubr.bf16.mxu1 %v1662_v10  ;;  %v670_v6 = vunpack.c.h.bf16 %v208_v15  ;;  %v1294_v10 = vmul.f32 %v6802_v62, %v647_v1  ;;  %v737_v15 = vunpack.c.l.bf16 %v244_v53  ;;  %v827_v53 = vunpack.c.l.bf16 %v292_v46 }
 0x23d   :  { %3832 = vmatprep.mubr.msk.bf16.mxu0 %vm4387_vm0, %v4386_v50  ;;  %v1376_v1 = vmul.f32 %v6799_v63, %v729_v55 }
 0x23e   :  { %v1317_v35 = vmul.f32 %v6780_v51, %v670_v6  ;;  %v1714_v17 = vpack.c.bf16 %v1309_v31, %v1294_v10  ;;  %v1407_v6 = vmul.f32 %v6780_v51, %v760_v59  ;;  %v280_v10 = vld [vmem:[%s7283_s2 + $0x75c] sm:$0xff]  ;;  %v759_v31 = vunpack.c.l.bf16 %v256_v57 }
 0x23f   :  { %v805_v18 = vunpack.c.h.bf16 %v280_v10  ;;  %v804_v39 = vunpack.c.l.bf16 %v280_v10  ;;  %v842_v57 = vunpack.c.h.bf16 %v292_v46 }
 0x240   :  { %v1722_v21 = vpack.c.bf16 %v1332_v11, %v1317_v35  ;;  %v774_v35 = vunpack.c.l.bf16 %v264_v2  ;;  %v1751_v11 = vpack.c.bf16 %v1391_v4, %v1376_v1  ;;  %v1406_v19 = vmul.f32 %v6799_v63, %v759_v31  ;;  %v308_v1 = vld [vmem:[%s7283_s2 + $0x830] ss:$60 sps:$4 sm:$0xff]  }
 0x241   :  { %v1451_v37 = vmul.f32 %v6799_v63, %v804_v39  ;;  %v320_v4 = vld [vmem:[%s7283_s2 + $0x888] sm:$0xff]  ;;  %v872_v31 = vunpack.c.h.bf16 %v308_v1 }
 0x243   :  { %2879 = vmatmul.mubr.bf16.gmra.mrb[28].mxu1 %v1661_v24  ;;  %v715_v24 = vunpack.c.h.bf16 %v232_v14 }
 0x244   :  { %3833 = vmatmul.mubr.msk.bf16.gmra.mrb[28].mxu0 %vm2177_vm1, %v1669_v38  ;;  %2886 = vmatprep.mubr.bf16.mxu1 %v1677_v27  ;;  %v1324_v38 = vmul.f32 %v6802_v62, %v677_v20  ;;  %v1339_v27 = vmul.f32 %v6802_v62, %v692_v22  ;;  %v1421_v20 = vmul.f32 %v6799_v63, %v774_v35  ;;  %v880_v35 = vunpack.c.h.bf16 %v320_v4 }
 0x245   :  { %3836 = vmatprep.mubr.msk.bf16.mxu0 %vm4387_vm0, %v4386_v50  ;;  %v1362_v44 = vmul.f32 %v6780_v51, %v715_v24  ;;  %v1429_v22 = vmul.f32 %v6802_v62, %v782_v13  ;;  %v1452_v24 = vmul.f32 %v6780_v51, %v805_v18 }
 0x246   :  { %v1729_v41 = vpack.c.bf16 %v1339_v27, %v1324_v38  ;;  %v296_v38 = vld [vmem:[%s7283_s2 + $0x7d4] sm:$0xff]  ;;  %v1766_v27 = vpack.c.bf16 %v1421_v20, %v1406_v19  ;;  %v324_v19 = vld [vmem:[%s7283_s2 + $0x8a8] ss:$60 sps:$4 sm:$0xff]  }
 0x24b   :  { %2887 = vmatmul.mubr.bf16.gmra.mrb[32].mxu1 %v1676_v43  ;;  %v1737_v43 = vpack.c.bf16 %v1362_v44, %v1347_v28  ;;  %v789_v44 = vunpack.c.l.bf16 %v272_v9 }
 0x24c   :  { %3837 = vmatmul.mubr.msk.bf16.gmra.mrb[32].mxu0 %vm2177_vm1, %v1684_v45  ;;  %2894 = vmatprep.mubr.bf16.mxu1 %v1692_v48  ;;  %v730_v45 = vunpack.c.h.bf16 %v240_v29  ;;  %v1354_v48 = vmul.f32 %v6802_v62, %v707_v36  ;;  %v797_v29 = vunpack.c.l.bf16 %v276_v25  ;;  %v887_v25 = vunpack.c.l.bf16 %v324_v19 }
 0x24d   :  { %3840 = vmatprep.mubr.msk.bf16.mxu0 %vm4387_vm0, %v4386_v50  ;;  %v1436_v36 = vmul.f32 %v6799_v63, %v789_v44 }
 0x24e   :  { %v1377_v40 = vmul.f32 %v6780_v51, %v730_v45  ;;  %v1744_v60 = vpack.c.bf16 %v1369_v49, %v1354_v48  ;;  %v1467_v45 = vmul.f32 %v6780_v51, %v820_v32  ;;  %v312_v48 = vld [vmem:[%s7283_s2 + $0x84c] sm:$0xff]  ;;  %v819_v49 = vunpack.c.l.bf16 %v288_v26 }
 0x24f   :  { %v865_v55 = vunpack.c.h.bf16 %v312_v48  ;;  %v864_v8 = vunpack.c.l.bf16 %v312_v48  ;;  %v902_v26 = vunpack.c.h.bf16 %v324_v19 }
 0x250   :  { %v1752_v56 = vpack.c.bf16 %v1392_v52, %v1377_v40  ;;  %v834_v40 = vunpack.c.l.bf16 %v296_v38  ;;  %v1781_v52 = vpack.c.bf16 %v1451_v37, %v1436_v36  ;;  %v1466_v3 = vmul.f32 %v6799_v63, %v819_v49 }
 0x251   :  { %v1511_v13 = vmul.f32 %v6799_v63, %v864_v8 }
 0x253   :  { %2895 = vmatmul.mubr.bf16.gmra.mrb[36].mxu1 %v1691_v61  ;;  %v775_v61 = vunpack.c.h.bf16 %v264_v2 }
 0x254   :  { %3841 = vmatmul.mubr.msk.bf16.gmra.mrb[36].mxu0 %vm2177_vm1, %v1699_v5  ;;  %2902 = vmatprep.mubr.bf16.mxu1 %v1707_v0  ;;  %v1384_v5 = vmul.f32 %v6802_v62, %v737_v15  ;;  %v1399_v0 = vmul.f32 %v6802_v62, %v752_v58  ;;  %v1481_v15 = vmul.f32 %v6799_v63, %v834_v40 }
 0x255   :  { %3844 = vmatprep.mubr.msk.bf16.mxu0 %vm4387_vm0, %v4386_v50  ;;  %v1422_v7 = vmul.f32 %v6780_v51, %v775_v61  ;;  %v1489_v58 = vmul.f32 %v6802_v62, %v842_v57  ;;  %v1512_v61 = vmul.f32 %v6780_v51, %v865_v55 }
 0x256   :  { %v1759_v14 = vpack.c.bf16 %v1399_v0, %v1384_v5  ;;  %v328_v5 = vld [vmem:[%s7283_s2 + $0x8c4] sm:$0xff]  ;;  %v1796_v0 = vpack.c.bf16 %v1481_v15, %v1466_v3 }
 0x25b   :  { %2903 = vmatmul.mubr.bf16.gmra.mrb[40].mxu1 %v1706_v16  ;;  %v1767_v16 = vpack.c.bf16 %v1422_v7, %v1407_v6  ;;  %v849_v7 = vunpack.c.l.bf16 %v304_v47 }
 0x25c   :  { %3845 = vmatmul.mubr.msk.bf16.gmra.mrb[40].mxu0 %vm2177_vm1, %v1714_v17  ;;  %2910 = vmatprep.mubr.bf16.mxu1 %v1722_v21  ;;  %v790_v17 = vunpack.c.h.bf16 %v272_v9  ;;  %v1414_v21 = vmul.f32 %v6802_v62, %v767_v12  ;;  %v857_v9 = vunpack.c.l.bf16 %v308_v1 }
 0x25d   :  { %3848 = vmatprep.mubr.msk.bf16.mxu0 %vm4387_vm0, %v4386_v50  ;;  %v1496_v12 = vmul.f32 %v6799_v63, %v849_v7 }
 0x25e   :  { %v1437_v23 = vmul.f32 %v6780_v51, %v790_v17  ;;  %v1774_v28 = vpack.c.bf16 %v1429_v22, %v1414_v21  ;;  %v1527_v17 = vmul.f32 %v6780_v51, %v880_v35  ;;  %v879_v21 = vunpack.c.l.bf16 %v320_v4 }
 0x25f   :  { %v1811_v20 = vpack.c.bf16 %v1511_v13, %v1496_v12  ;;  %v894_v22 = vunpack.c.l.bf16 %v328_v5 }
 0x260   :  { %v1782_v30 = vpack.c.bf16 %v1452_v24, %v1437_v23 }
 0x263   :  { %2911 = vmatmul.mubr.bf16.gmra.mrb[44].mxu1 %v1721_v34  ;;  %v835_v34 = vunpack.c.h.bf16 %v296_v38  ;;  %v1526_v38 = vmul.f32 %v6799_v63, %v879_v21 }
 0x264   :  { %3849 = vmatmul.mubr.msk.bf16.gmra.mrb[44].mxu0 %vm2177_vm1, %v1729_v41  ;;  %2918 = vmatprep.mubr.bf16.mxu1 %v1737_v43  ;;  %v1444_v41 = vmul.f32 %v6802_v62, %v797_v29  ;;  %v1459_v43 = vmul.f32 %v6802_v62, %v812_v42 }
 0x265   :  { %3852 = vmatprep.mubr.msk.bf16.mxu0 %vm4387_vm0, %v4386_v50  ;;  %v1482_v33 = vmul.f32 %v6780_v51, %v835_v34 }
 0x266   :  { %v1789_v2 = vpack.c.bf16 %v1459_v43, %v1444_v41 }
 0x26b   :  { %2919 = vmatmul.mubr.bf16.gmra.mrb[48].mxu1 %v1736_v54  ;;  %v1797_v54 = vpack.c.bf16 %v1482_v33, %v1467_v45 }
 0x26c   :  { %3853 = vmatmul.mubr.msk.bf16.gmra.mrb[48].mxu0 %vm2177_vm1, %v1744_v60  ;;  %2926 = vmatprep.mubr.bf16.mxu1 %v1752_v56  ;;  %v850_v60 = vunpack.c.h.bf16 %v304_v47  ;;  %v1474_v56 = vmul.f32 %v6802_v62, %v827_v53 }
 0x26d   :  { %3856 = vmatprep.mubr.msk.bf16.mxu0 %vm4387_vm0, %v4386_v50 }
 0x26e   :  { %v1497_v59 = vmul.f32 %v6780_v51, %v850_v60  ;;  %v1804_v6 = vpack.c.bf16 %v1489_v58, %v1474_v56 }
 0x270   :  { %v1812_v10 = vpack.c.bf16 %v1512_v61, %v1497_v59 }
 0x273   :  { %2927 = vmatmul.mubr.bf16.gmra.mrb[52].mxu1 %v1751_v11  ;;  %v895_v11 = vunpack.c.h.bf16 %v328_v5 }
 0x274   :  { %3857 = vmatmul.mubr.msk.bf16.gmra.mrb[52].mxu0 %vm2177_vm1, %v1759_v14  ;;  %2934 = vmatprep.mubr.bf16.mxu1 %v1767_v16  ;;  %v1504_v14 = vmul.f32 %v6802_v62, %v857_v9  ;;  %v1519_v16 = vmul.f32 %v6802_v62, %v872_v31 }
 0x275   :  { %3860 = vmatprep.mubr.msk.bf16.mxu0 %vm4387_vm0, %v4386_v50  ;;  %v1542_v18 = vmul.f32 %v6780_v51, %v895_v11  ;;  %v1534_v51 = vmul.f32 %v6802_v62, %v887_v25 }
 0x276   :  { %v1819_v23 = vpack.c.bf16 %v1519_v16, %v1504_v14 }
 0x277   :  { %v1827_v24 = vpack.c.bf16 %v1542_v18, %v1527_v17 }
 0x27b   :  { %2935 = vmatmul.mubr.bf16.gmra.mrb[56].mxu1 %v1766_v27  ;;  %v1541_v27 = vmul.f32 %v6799_v63, %v894_v22 }
 0x27c   :  { %3861 = vmatmul.mubr.msk.bf16.gmra.mrb[56].mxu0 %vm2177_vm1, %v1774_v28  ;;  %2942 = vmatprep.mubr.bf16.mxu1 %v1782_v30  ;;  %v1549_v28 = vmul.f32 %v6802_v62, %v902_v26 }
 0x27d   :  { %3864 = vmatprep.mubr.msk.bf16.mxu0 %vm4387_vm0, %v4386_v50  ;;  %v1826_v44 = vpack.c.bf16 %v1541_v27, %v1526_v38 }
 0x27e   :  { %v1834_v39 = vpack.c.bf16 %v1549_v28, %v1534_v51 }
 0x283   :  { %2943 = vmatmul.mubr.bf16.gmra.mrb[60].mxu1 %v1781_v52 }
 0x284   :  { %3865 = vmatmul.mubr.msk.bf16.gmra.mrb[60].mxu0 %vm2177_vm1, %v1789_v2  ;;  %2950 = vmatprep.mubr.bf16.mxu1 %v1797_v54 }
 0x285   :  { %3868 = vmatprep.mubr.msk.bf16.mxu0 %vm4387_vm0, %v4386_v50 }
 0x28b   :  { %2951 = vmatmul.mubr.bf16.gmra.mrb[64].mxu1 %v1796_v0 }
 0x28c   :  { %3869 = vmatmul.mubr.msk.bf16.gmra.mrb[64].mxu0 %vm2177_vm1, %v1804_v6  ;;  %2958 = vmatprep.mubr.bf16.mxu1 %v1812_v10 }
 0x28d   :  { %3872 = vmatprep.mubr.msk.bf16.mxu0 %vm4387_vm0, %v4386_v50 }
 0x293   :  { %2959 = vmatmul.mubr.bf16.gmra.mrb[68].mxu1 %v1811_v20 }
 0x294   :  { %3873 = vmatmul.mubr.msk.bf16.gmra.mrb[68].mxu0 %vm2177_vm1, %v1819_v23  ;;  %2966 = vmatprep.mubr.bf16.mxu1 %v1827_v24 }
 0x295   :  { %3876 = vmatprep.mubr.msk.bf16.mxu0 %vm4387_vm0, %v4386_v50 }
 0x29b   :  { %2967 = vmatmul.mubr.bf16.gmra.mrb[72].mxu1 %v1826_v44 }
 0x29c   :  { %3877 = vmatmul.mubr.msk.bf16.gmra.mrb[72].mxu0 %vm2177_vm1, %v1834_v39 }
 0x2de   :  { %v2824_v29 = vpop.f32.mrb[0].mxu1 }
 0x2df   :  { %v3564_v30 = vpop.f32.mrb[0].mxu0  ;;  %v2826_v42 = vpop.f32.mrb[1].mxu1 }
 0x2e0   :  { %v3880_v63 = vadd.f32 %v3564_v30, %v2824_v29  ;;  %v3806_v32 = vpop.f32.mrb[1].mxu0  ;;  %v2827_v34 = vpop.f32.mrb[2].mxu1 }
 0x2e1   :  { %v3567_v36 = vpop.f32.mrb[2].mxu0  ;;  %v2829_v37 = vpop.f32.mrb[3].mxu1 }
 0x2e2   :  { %3716 = vst.msk [vmem:[%s7284_s3] sm:$0xff] %vm3715_vm2, %v3880_v63  ;;  %v3881_v50 = vadd.f32 %v3567_v36, %v2827_v34  ;;  %v3807_v62 = vpop.f32.mrb[3].mxu0 }
 0x2e4   :  { %3717 = vst.msk [vmem:[%s7284_s3 + $0x8] sm:$0xff] %vm3715_vm2, %v3881_v50 }
 0x2e6   :  { %v2832_v41 = vpop.f32.mrb[4].mxu1 }
 0x2e7   :  { %v3572_v43 = vpop.f32.mrb[4].mxu0  ;;  %v2834_v45 = vpop.f32.mrb[5].mxu1 }
 0x2e8   :  { %v3882_v33 = vadd.f32 %v3572_v43, %v2832_v41  ;;  %v3810_v46 = vpop.f32.mrb[5].mxu0  ;;  %v2835_v47 = vpop.f32.mrb[6].mxu1 }
 0x2e9   :  { %v3575_v48 = vpop.f32.mrb[6].mxu0  ;;  %v2837_v49 = vpop.f32.mrb[7].mxu1 }
 0x2ea   :  { %3718 = vst.msk [vmem:[%s7284_s3 + $0x10] sm:$0xff] %vm3715_vm2, %v3882_v33  ;;  %v3883_v40 = vadd.f32 %v3575_v48, %v2835_v47  ;;  %v3811_v52 = vpop.f32.mrb[7].mxu0 }
 0x2ec   :  { %3719 = vst.msk [vmem:[%s7284_s3 + $0x18] sm:$0xff] %vm3715_vm2, %v3883_v40 }
 0x2ee   :  { %v2840_v53 = vpop.f32.mrb[8].mxu1 }
 0x2ef   :  { %v3580_v57 = vpop.f32.mrb[8].mxu0  ;;  %v2842_v2 = vpop.f32.mrb[9].mxu1 }
 0x2f0   :  { %v3884_v54 = vadd.f32 %v3580_v57, %v2840_v53  ;;  %v3814_v60 = vpop.f32.mrb[9].mxu0  ;;  %v2843_v55 = vpop.f32.mrb[10].mxu1 }
 0x2f1   :  { %v3583_v3 = vpop.f32.mrb[10].mxu0  ;;  %v2845_v15 = vpop.f32.mrb[11].mxu1 }
 0x2f2   :  { %3720 = vst.msk [vmem:[%s7284_s3 + $0x20] sm:$0xff] %vm3715_vm2, %v3884_v54  ;;  %v3885_v56 = vadd.f32 %v3583_v3, %v2843_v55  ;;  %v3815_v58 = vpop.f32.mrb[11].mxu0 }
 0x2f4   :  { %3721 = vst.msk [vmem:[%s7284_s3 + $0x28] sm:$0xff] %vm3715_vm2, %v3885_v56 }
 0x2f6   :  { %v2848_v59 = vpop.f32.mrb[12].mxu1 }
 0x2f7   :  { %v3588_v61 = vpop.f32.mrb[12].mxu0  ;;  %v2850_v1 = vpop.f32.mrb[13].mxu1 }
 0x2f8   :  { %v3886_v4 = vadd.f32 %v3588_v61, %v2848_v59  ;;  %v3818_v5 = vpop.f32.mrb[13].mxu0  ;;  %v2851_v0 = vpop.f32.mrb[14].mxu1 }
 0x2f9   :  { %v3591_v6 = vpop.f32.mrb[14].mxu0  ;;  %v2853_v7 = vpop.f32.mrb[15].mxu1 }
 0x2fa   :  { %3722 = vst.msk [vmem:[%s7284_s3 + $0x30] sm:$0xff] %vm3715_vm2, %v3886_v4  ;;  %v3887_v8 = vadd.f32 %v3591_v6, %v2851_v0  ;;  %v3819_v9 = vpop.f32.mrb[15].mxu0 }
 0x2fc   :  { %3723 = vst.msk [vmem:[%s7284_s3 + $0x38] sm:$0xff] %vm3715_vm2, %v3887_v8 }
 0x2fe   :  { %v2856_v10 = vpop.f32.mrb[16].mxu1 }
 0x2ff   :  { %v3596_v31 = vpop.f32.mrb[16].mxu0  ;;  %v2858_v35 = vpop.f32.mrb[17].mxu1 }
 0x300   :  { %v3888_v11 = vadd.f32 %v3596_v31, %v2856_v10  ;;  %v3822_v12 = vpop.f32.mrb[17].mxu0  ;;  %v2859_v13 = vpop.f32.mrb[18].mxu1 }
 0x301   :  { %v3599_v14 = vpop.f32.mrb[18].mxu0  ;;  %v2861_v16 = vpop.f32.mrb[19].mxu1 }
 0x302   :  { %3724 = vst.msk [vmem:[%s7284_s3 + $0x40] sm:$0xff] %vm3715_vm2, %v3888_v11  ;;  %v3889_v17 = vadd.f32 %v3599_v14, %v2859_v13  ;;  %v3823_v18 = vpop.f32.mrb[19].mxu0 }
 0x304   :  { %3725 = vst.msk [vmem:[%s7284_s3 + $0x48] sm:$0xff] %vm3715_vm2, %v3889_v17 }
 0x306   :  { %v2864_v19 = vpop.f32.mrb[20].mxu1 }
 0x307   :  { %v3604_v20 = vpop.f32.mrb[20].mxu0  ;;  %v2866_v21 = vpop.f32.mrb[21].mxu1 }
 0x308   :  { %v3890_v22 = vadd.f32 %v3604_v20, %v2864_v19  ;;  %v3826_v23 = vpop.f32.mrb[21].mxu0  ;;  %v2867_v24 = vpop.f32.mrb[22].mxu1 }
 0x309   :  { %v3607_v25 = vpop.f32.mrb[22].mxu0  ;;  %v2869_v26 = vpop.f32.mrb[23].mxu1 }
 0x30a   :  { %3726 = vst.msk [vmem:[%s7284_s3 + $0x50] sm:$0xff] %vm3715_vm2, %v3890_v22  ;;  %v3891_v38 = vadd.f32 %v3607_v25, %v2867_v24  ;;  %v3827_v27 = vpop.f32.mrb[23].mxu0 }
 0x30c   :  { %3727 = vst.msk [vmem:[%s7284_s3 + $0x58] sm:$0xff] %vm3715_vm2, %v3891_v38 }
 0x30e   :  { %v2872_v51 = vpop.f32.mrb[24].mxu1 }
 0x30f   :  { %v3612_v28 = vpop.f32.mrb[24].mxu0  ;;  %v2874_v44 = vpop.f32.mrb[25].mxu1 }
 0x310   :  { %v3892_v39 = vadd.f32 %v3612_v28, %v2872_v51  ;;  %v3830_v29 = vpop.f32.mrb[25].mxu0  ;;  %v2875_v30 = vpop.f32.mrb[26].mxu1 }
 0x311   :  { %v3615_v42 = vpop.f32.mrb[26].mxu0  ;;  %v2877_v63 = vpop.f32.mrb[27].mxu1 }
 0x312   :  { %3728 = vst.msk [vmem:[%s7284_s3 + $0x60] sm:$0xff] %vm3715_vm2, %v3892_v39  ;;  %v3893_v32 = vadd.f32 %v3615_v42, %v2875_v30  ;;  %v3831_v34 = vpop.f32.mrb[27].mxu0 }
 0x314   :  { %3729 = vst.msk [vmem:[%s7284_s3 + $0x68] sm:$0xff] %vm3715_vm2, %v3893_v32 }
 0x316   :  { %v2880_v36 = vpop.f32.mrb[28].mxu1 }
 0x317   :  { %v3620_v37 = vpop.f32.mrb[28].mxu0  ;;  %v2882_v50 = vpop.f32.mrb[29].mxu1 }
 0x318   :  { %v3894_v62 = vadd.f32 %v3620_v37, %v2880_v36  ;;  %v3834_v41 = vpop.f32.mrb[29].mxu0  ;;  %v2883_v43 = vpop.f32.mrb[30].mxu1 }
 0x319   :  { %v3623_v45 = vpop.f32.mrb[30].mxu0  ;;  %v2885_v33 = vpop.f32.mrb[31].mxu1 }
 0x31a   :  { %3730 = vst.msk [vmem:[%s7284_s3 + $0x70] sm:$0xff] %vm3715_vm2, %v3894_v62  ;;  %v3895_v46 = vadd.f32 %v3623_v45, %v2883_v43  ;;  %v3835_v47 = vpop.f32.mrb[31].mxu0 }
 0x31c   :  { %3731 = vst.msk [vmem:[%s7284_s3 + $0x78] sm:$0xff] %vm3715_vm2, %v3895_v46 }
 0x31e   :  { %v2888_v48 = vpop.f32.mrb[32].mxu1 }
 0x31f   :  { %v3628_v49 = vpop.f32.mrb[32].mxu0  ;;  %v2890_v40 = vpop.f32.mrb[33].mxu1 }
 0x320   :  { %v3896_v52 = vadd.f32 %v3628_v49, %v2888_v48  ;;  %v3838_v53 = vpop.f32.mrb[33].mxu0  ;;  %v2891_v57 = vpop.f32.mrb[34].mxu1 }
 0x321   :  { %v3631_v2 = vpop.f32.mrb[34].mxu0  ;;  %v2893_v54 = vpop.f32.mrb[35].mxu1 }
 0x322   :  { %3732 = vst.msk [vmem:[%s7284_s3 + $0x80] sm:$0xff] %vm3715_vm2, %v3896_v52  ;;  %v3897_v60 = vadd.f32 %v3631_v2, %v2891_v57  ;;  %v3839_v55 = vpop.f32.mrb[35].mxu0 }
 0x324   :  { %3733 = vst.msk [vmem:[%s7284_s3 + $0x88] sm:$0xff] %vm3715_vm2, %v3897_v60 }
 0x326   :  { %v2896_v3 = vpop.f32.mrb[36].mxu1 }
 0x327   :  { %v3636_v15 = vpop.f32.mrb[36].mxu0  ;;  %v2898_v56 = vpop.f32.mrb[37].mxu1 }
 0x328   :  { %v3898_v58 = vadd.f32 %v3636_v15, %v2896_v3  ;;  %v3842_v59 = vpop.f32.mrb[37].mxu0  ;;  %v2899_v61 = vpop.f32.mrb[38].mxu1 }
 0x329   :  { %v3639_v1 = vpop.f32.mrb[38].mxu0  ;;  %v2901_v4 = vpop.f32.mrb[39].mxu1 }
 0x32a   :  { %3734 = vst.msk [vmem:[%s7284_s3 + $0x90] sm:$0xff] %vm3715_vm2, %v3898_v58  ;;  %v3899_v5 = vadd.f32 %v3639_v1, %v2899_v61  ;;  %v3843_v0 = vpop.f32.mrb[39].mxu0 }
 0x32c   :  { %3735 = vst.msk [vmem:[%s7284_s3 + $0x98] sm:$0xff] %vm3715_vm2, %v3899_v5 }
 0x32e   :  { %v2904_v6 = vpop.f32.mrb[40].mxu1 }
 0x32f   :  { %v3644_v7 = vpop.f32.mrb[40].mxu0  ;;  %v2906_v8 = vpop.f32.mrb[41].mxu1 }
 0x330   :  { %v3900_v9 = vadd.f32 %v3644_v7, %v2904_v6  ;;  %v3846_v10 = vpop.f32.mrb[41].mxu0  ;;  %v2907_v31 = vpop.f32.mrb[42].mxu1 }
 0x331   :  { %v3647_v35 = vpop.f32.mrb[42].mxu0  ;;  %v2909_v11 = vpop.f32.mrb[43].mxu1 }
 0x332   :  { %3736 = vst.msk [vmem:[%s7284_s3 + $0xa0] sm:$0xff] %vm3715_vm2, %v3900_v9  ;;  %v3901_v12 = vadd.f32 %v3647_v35, %v2907_v31  ;;  %v3847_v13 = vpop.f32.mrb[43].mxu0 }
 0x334   :  { %3737 = vst.msk [vmem:[%s7284_s3 + $0xa8] sm:$0xff] %vm3715_vm2, %v3901_v12 }
 0x336   :  { %v2912_v14 = vpop.f32.mrb[44].mxu1 }
 0x337   :  { %v3652_v16 = vpop.f32.mrb[44].mxu0  ;;  %v2914_v17 = vpop.f32.mrb[45].mxu1 }
 0x338   :  { %v3902_v18 = vadd.f32 %v3652_v16, %v2912_v14  ;;  %v3850_v19 = vpop.f32.mrb[45].mxu0  ;;  %v2915_v20 = vpop.f32.mrb[46].mxu1 }
 0x339   :  { %v3655_v21 = vpop.f32.mrb[46].mxu0  ;;  %v2917_v22 = vpop.f32.mrb[47].mxu1 }
 0x33a   :  { %3738 = vst.msk [vmem:[%s7284_s3 + $0xb0] sm:$0xff] %vm3715_vm2, %v3902_v18  ;;  %v3903_v23 = vadd.f32 %v3655_v21, %v2915_v20  ;;  %v3851_v24 = vpop.f32.mrb[47].mxu0 }
 0x33c   :  { %3739 = vst.msk [vmem:[%s7284_s3 + $0xb8] sm:$0xff] %vm3715_vm2, %v3903_v23 }
 0x33e   :  { %v2920_v25 = vpop.f32.mrb[48].mxu1 }
 0x33f   :  { %v3660_v26 = vpop.f32.mrb[48].mxu0  ;;  %v2922_v38 = vpop.f32.mrb[49].mxu1 }
 0x340   :  { %v3904_v27 = vadd.f32 %v3660_v26, %v2920_v25  ;;  %v3854_v51 = vpop.f32.mrb[49].mxu0  ;;  %v2923_v28 = vpop.f32.mrb[50].mxu1 }
 0x341   :  { %v3663_v44 = vpop.f32.mrb[50].mxu0  ;;  %v2925_v39 = vpop.f32.mrb[51].mxu1 }
 0x342   :  { %3740 = vst.msk [vmem:[%s7284_s3 + $0xc0] sm:$0xff] %vm3715_vm2, %v3904_v27  ;;  %v3905_v29 = vadd.f32 %v3663_v44, %v2923_v28  ;;  %v3855_v30 = vpop.f32.mrb[51].mxu0 }
 0x344   :  { %3741 = vst.msk [vmem:[%s7284_s3 + $0xc8] sm:$0xff] %vm3715_vm2, %v3905_v29 }
 0x346   :  { %v2928_v42 = vpop.f32.mrb[52].mxu1 }
 0x347   :  { %v3668_v63 = vpop.f32.mrb[52].mxu0  ;;  %v2930_v32 = vpop.f32.mrb[53].mxu1 }
 0x348   :  { %v3906_v34 = vadd.f32 %v3668_v63, %v2928_v42  ;;  %v3858_v36 = vpop.f32.mrb[53].mxu0  ;;  %v2931_v37 = vpop.f32.mrb[54].mxu1 }
 0x349   :  { %v3671_v50 = vpop.f32.mrb[54].mxu0  ;;  %v2933_v62 = vpop.f32.mrb[55].mxu1 }
 0x34a   :  { %3742 = vst.msk [vmem:[%s7284_s3 + $0xd0] sm:$0xff] %vm3715_vm2, %v3906_v34  ;;  %v3907_v41 = vadd.f32 %v3671_v50, %v2931_v37  ;;  %v3859_v43 = vpop.f32.mrb[55].mxu0 }
 0x34c   :  { %3743 = vst.msk [vmem:[%s7284_s3 + $0xd8] sm:$0xff] %vm3715_vm2, %v3907_v41 }
 0x34e   :  { %v2936_v45 = vpop.f32.mrb[56].mxu1 }
 0x34f   :  { %v3676_v33 = vpop.f32.mrb[56].mxu0  ;;  %v2938_v46 = vpop.f32.mrb[57].mxu1 }
 0x350   :  { %v3908_v47 = vadd.f32 %v3676_v33, %v2936_v45  ;;  %v3862_v48 = vpop.f32.mrb[57].mxu0  ;;  %v2939_v49 = vpop.f32.mrb[58].mxu1 }
 0x351   :  { %v3679_v40 = vpop.f32.mrb[58].mxu0  ;;  %v2941_v52 = vpop.f32.mrb[59].mxu1 }
 0x352   :  { %3744 = vst.msk [vmem:[%s7284_s3 + $0xe0] sm:$0xff] %vm3715_vm2, %v3908_v47  ;;  %v3909_v53 = vadd.f32 %v3679_v40, %v2939_v49  ;;  %v3863_v57 = vpop.f32.mrb[59].mxu0 }
 0x354   :  { %3745 = vst.msk [vmem:[%s7284_s3 + $0xe8] sm:$0xff] %vm3715_vm2, %v3909_v53 }
 0x356   :  { %v2944_v2 = vpop.f32.mrb[60].mxu1 }
 0x357   :  { %v3684_v54 = vpop.f32.mrb[60].mxu0  ;;  %v2946_v60 = vpop.f32.mrb[61].mxu1 }
 0x358   :  { %v3910_v55 = vadd.f32 %v3684_v54, %v2944_v2  ;;  %v3866_v3 = vpop.f32.mrb[61].mxu0  ;;  %v2947_v15 = vpop.f32.mrb[62].mxu1 }
 0x359   :  { %v3687_v56 = vpop.f32.mrb[62].mxu0  ;;  %v2949_v58 = vpop.f32.mrb[63].mxu1 }
 0x35a   :  { %3746 = vst.msk [vmem:[%s7284_s3 + $0xf0] sm:$0xff] %vm3715_vm2, %v3910_v55  ;;  %v3911_v59 = vadd.f32 %v3687_v56, %v2947_v15  ;;  %v3867_v61 = vpop.f32.mrb[63].mxu0 }
 0x35c   :  { %3747 = vst.msk [vmem:[%s7284_s3 + $0xf8] sm:$0xff] %vm3715_vm2, %v3911_v59 }
 0x35e   :  { %v2952_v1 = vpop.f32.mrb[64].mxu1 }
 0x35f   :  { %v3692_v4 = vpop.f32.mrb[64].mxu0  ;;  %v2954_v5 = vpop.f32.mrb[65].mxu1 }
 0x360   :  { %v3912_v0 = vadd.f32 %v3692_v4, %v2952_v1  ;;  %v3870_v6 = vpop.f32.mrb[65].mxu0  ;;  %v2955_v7 = vpop.f32.mrb[66].mxu1 }
 0x361   :  { %v3695_v8 = vpop.f32.mrb[66].mxu0  ;;  %v2957_v9 = vpop.f32.mrb[67].mxu1 }
 0x362   :  { %3748 = vst.msk [vmem:[%s7284_s3 + $0x100] sm:$0xff] %vm3715_vm2, %v3912_v0  ;;  %v3913_v10 = vadd.f32 %v3695_v8, %v2955_v7  ;;  %v3871_v31 = vpop.f32.mrb[67].mxu0 }
 0x364   :  { %3749 = vst.msk [vmem:[%s7284_s3 + $0x108] sm:$0xff] %vm3715_vm2, %v3913_v10 }
 0x366   :  { %v2960_v35 = vpop.f32.mrb[68].mxu1 }
 0x367   :  { %v3700_v11 = vpop.f32.mrb[68].mxu0  ;;  %v2962_v12 = vpop.f32.mrb[69].mxu1 }
 0x368   :  { %v3914_v13 = vadd.f32 %v3700_v11, %v2960_v35  ;;  %v3874_v14 = vpop.f32.mrb[69].mxu0  ;;  %v2963_v16 = vpop.f32.mrb[70].mxu1 }
 0x369   :  { %v3703_v17 = vpop.f32.mrb[70].mxu0  ;;  %v2965_v18 = vpop.f32.mrb[71].mxu1 }
 0x36a   :  { %3750 = vst.msk [vmem:[%s7284_s3 + $0x110] sm:$0xff] %vm3715_vm2, %v3914_v13  ;;  %v3915_v19 = vadd.f32 %v3703_v17, %v2963_v16  ;;  %v3875_v20 = vpop.f32.mrb[71].mxu0 }
 0x36c   :  { %3751 = vst.msk [vmem:[%s7284_s3 + $0x118] sm:$0xff] %vm3715_vm2, %v3915_v19 }
 0x36e   :  { %v2968_v21 = vpop.f32.mrb[72].mxu1 }
 0x36f   :  { %v3708_v22 = vpop.f32.mrb[72].mxu0  ;;  %v2970_v23 = vpop.f32.mrb[73].mxu1 }
 0x370   :  { %v3916_v24 = vadd.f32 %v3708_v22, %v2968_v21  ;;  %v3878_v25 = vpop.f32.mrb[73].mxu0  ;;  %v2971_v26 = vpop.f32.mrb[74].mxu1 }
 0x371   :  { %v3711_v38 = vpop.f32.mrb[74].mxu0  ;;  %v2973_v27 = vpop.f32.mrb[75].mxu1 }
 0x372   :  { %3752 = vst.msk [vmem:[%s7284_s3 + $0x120] sm:$0xff] %vm3715_vm2, %v3916_v24  ;;  %v3917_v51 = vadd.f32 %v3711_v38, %v2971_v26  ;;  %v3879_v28 = vpop.f32.mrb[75].mxu0 }
 0x374   :  { %3753 = vst.msk [vmem:[%s7284_s3 + $0x128] sm:$0xff] %vm3715_vm2, %v3917_v51 }

</bundles_post_ra>
